<compile_context>
chip_gen: v7x
topology: tpu7x:2x2x1
jax: 0.10.0
libtpu: 0.0.40
codegen_flags: <defaults>
</compile_context>

<pallas_src>
import math
import numpy as np
import jax
import jax.numpy as jnp
from jax.experimental import pallas as pl
from jax.experimental.pallas import tpu as pltpu


# ----------------------------- parameter setup ------------------------------

def _fspecial_gauss_1d(size, sigma):
    """1-D gauss kernel taps, matches the torch reference (float32)."""
    coords = np.arange(size, dtype=np.float32)
    coords -= size // 2
    g = np.exp(-(coords ** 2) / (2.0 * np.float32(sigma) ** 2)).astype(np.float32)
    return g / g.sum()


def _pool_out_size(n):
    """Output size of F.avg_pool2d(kernel=2, stride=2, padding=n % 2)."""
    return (n + 2 * (n % 2) - 2) // 2 + 1


def _pool_matrix(n):
    """(n, m) matrix P with (x @ P)[j] = 0.5 * (x_pad[2j] + x_pad[2j+1]).
    Right/left application reproduces F.avg_pool2d(kernel=2, stride=2,
    padding=n % 2, count_include_pad=True)."""
    pad = n % 2
    m = _pool_out_size(n)
    P = np.zeros((n, m), dtype=np.float32)
    for j in range(m):
        for t in (2 * j, 2 * j + 1):
            src = t - pad
            if 0 <= src < n:
                P[src, j] = 0.5
    return P


def _blur_matrix_right(n, taps):
    """(n, n-s+1) Gw with (x @ Gw)[j] = sum_k taps[k] * x[j+k] ('valid' corr)."""
    s = len(taps)
    m = n - s + 1
    G = np.zeros((n, m), dtype=np.float32)
    for j in range(m):
        for k in range(s):
            G[j + k, j] = np.float32(taps[k])
    return G


def _blur_matrix_left(n, taps):
    """(n-s+1, n) Gh with (Gh @ x)[i] = sum_k taps[k] * x[i+k] ('valid' corr)."""
    return np.ascontiguousarray(_blur_matrix_right(n, taps).T)


def _pyramid_shapes(H, W, levels):
    shapes = [(H, W)]
    for _ in range(levels - 1):
        h, w = shapes[-1]
        shapes.append((_pool_out_size(h), _pool_out_size(w)))
    return shapes


def _build_constants(H, W, levels, taps, tb):
    """All constant matrices, ordered:
       for l in 0..levels-1: Gw_l, (I_tb (x) Gh_l), Sel_l
       for l in 0..levels-2: Pw_l, (I_tb (x) Ph_l)
    """
    s = len(taps)
    shapes = _pyramid_shapes(H, W, levels)
    eye = np.eye(tb, dtype=np.float32)
    consts = []
    for (h, w) in shapes:
        oh, ow = h - s + 1, w - s + 1
        gw = _blur_matrix_right(w, taps)                               # (w, ow)
        gh_big = np.kron(eye, _blur_matrix_left(h, taps))              # (tb*oh, tb*h)
        sel = np.kron(eye, np.full((1, oh), 1.0 / float(oh * ow),
                                   dtype=np.float32))                  # (tb, tb*oh)
        consts += [gw, gh_big, sel]
    for (h, w) in shapes[:-1]:
        pw = _pool_matrix(w)                                           # (w, w2)
        ph_big = np.kron(eye, np.ascontiguousarray(_pool_matrix(h).T)) # (tb*h2, tb*h)
        consts += [pw, ph_big]
    return [np.ascontiguousarray(c, dtype=np.float32) for c in consts]


# ------------------------------ fused kernel ---------------------------------

def _make_kernel(levels, c1, c2):
    """Fused MS-SSIM pyramid + Gaussian-weighted-L1 kernel on a (tb*H, W) slab.

    Writes a (tb, levels+1) block:
      cols 0..levels-2 : per-image spatial mean of cs_map at levels 0..levels-2
      col  levels-1    : per-image spatial mean of ssim_map at the final level
      col  levels      : per-image mean of the Gaussian-blurred |x - y| (level 0)
    """

    def kernel(x_ref, y_ref, *refs):
        out_ref = refs[-1]
        cref = refs[:-1]
        base = 3 * levels

        def dot32(a, b):
            return jnp.dot(a, b, preferred_element_type=jnp.float32)

        x = x_ref[...].astype(jnp.float32)
        y = y_ref[...].astype(jnp.float32)

        for l in range(levels):
            gw = cref[3 * l + 0][...]      # (W_l, ow_l)
            gh = cref[3 * l + 1][...]      # (tb*oh_l, tb*H_l)  block-diag
            sel = cref[3 * l + 2][...]     # (tb, tb*oh_l)      block mean-selector

            def blur(a):
                # Separable 'valid' Gaussian as two constant MXU matmuls.
                return dot32(gh, dot32(a, gw))

            def img_mean(m):
                # Per-image spatial mean: block-selector matmul (scale folded in)
                # followed by a tiny cross-lane reduce.  -> (tb, 1)
                return jnp.sum(dot32(sel, m), axis=1, keepdims=True)

            mu1 = blur(x)
            mu2 = blur(y)
            mu1_sq = mu1 * mu1
            mu2_sq = mu2 * mu2
            mu1_mu2 = mu1 * mu2
            sigma1_sq = blur(x * x) - mu1_sq
            sigma2_sq = blur(y * y) - mu2_sq
            sigma12 = blur(x * y) - mu1_mu2
            cs_map = (2.0 * sigma12 + c2) / (sigma1_sq + sigma2_sq + c2)

            if l == 0:
                # Gaussian-weighted L1 reuses the already-loaded level-0 x/y.
                out_ref[:, levels:levels + 1] = img_mean(blur(jnp.abs(x - y)))

            if l < levels - 1:
                out_ref[:, l:l + 1] = img_mean(cs_map)
                # 2x2 avg-pool (count_include_pad, odd-size padding folded into the
                # constant matrices) as two constant MXU matmuls; pooled images
                # never leave VMEM.
                pw = cref[base + 2 * l + 0][...]
                ph = cref[base + 2 * l + 1][...]
                x = dot32(ph, dot32(x, pw))
                y = dot32(ph, dot32(y, pw))
            else:
                ssim_map = (2.0 * mu1_mu2 + c1) / (mu1_sq + mu2_sq + c1) * cs_map
                out_ref[:, l:l + 1] = img_mean(ssim_map)

    return kernel


# ------------------------------ kernel wrapper --------------------------------

def _fused_msssim_l1(x3, y3, levels, taps, c1, c2):
    """x3, y3: (B, H, W).  Returns (B, levels+1) f32 per-image statistics."""
    B, H, W = x3.shape

    # tb images per grid step; tb*H must be sublane (8) aligned for the 2-D layout.
    # Keep tb small (<=8): constants scale as tb^2 and per-step work is already
    # plenty to hide the tiny DMAs; tb=8 keeps grid>=2 (megacore) once B>=16.
    g = 8 // math.gcd(H, 8)
    tb = max(1, min(8, B))
    tb = ((tb + g - 1) // g) * g
    B_pad = ((B + tb - 1) // tb) * tb

    if B_pad != B:
        pad = B_pad - B
        x3 = jnp.concatenate([x3, jnp.zeros((pad, H, W), x3.dtype)], axis=0)
        y3 = jnp.concatenate([y3, jnp.zeros((pad, H, W), y3.dtype)], axis=0)

    # Fold the batch into sublanes: every in-kernel op becomes 2-D.
    x2d = x3.reshape(B_pad * H, W)
    y2d = y3.reshape(B_pad * H, W)

    consts = _build_constants(H, W, levels, taps, tb)
    kernel = _make_kernel(levels, float(c1), float(c2))

    data_spec = pl.BlockSpec((tb * H, W), lambda b: (b, 0))
    const_specs = [pl.BlockSpec(c.shape, lambda b: (0, 0)) for c in consts]

    out = pl.pallas_call(
        kernel,
        out_shape=jax.ShapeDtypeStruct((B_pad, levels + 1), jnp.float32),
        grid=(B_pad // tb,),
        in_specs=[data_spec, data_spec] + const_specs,
        out_specs=pl.BlockSpec((tb, levels + 1), lambda b: (b, 0)),
        compiler_params=pltpu.CompilerParams(
            dimension_semantics=("parallel",),
            vmem_limit_bytes=32 * 1024 * 1024),
    )(x2d, y2d, *[jnp.asarray(c) for c in consts])
    return out[:B]


# --------------------------------- module -------------------------------------

class MSSSIML1LossPallas:
    """Pallas TPU port of MSSSIML1_Loss.forward (defaults match the torch module)."""

    def __init__(self, data_range=1, size_average=False, win_size=3, win_sigma=0.1,
                 channel=1, weights=None, K=(0.01, 0.03), alpha=0.5):
        self.win_size = win_size
        self.win_sigma = win_sigma
        self.win_taps = _fspecial_gauss_1d(win_size, win_sigma)
        self.size_average = size_average
        self.data_range = data_range
        self.weights = ([0.0448, 0.2856, 0.3001, 0.2363, 0.1333]
                        if weights is None else list(weights))
        self.K = K
        self.alpha = alpha
        self.threshold = 0.05  # unused in forward; kept for parity
        # jit once; retraces (and rebuilds the pallas_call) only per new shape.
        self._jit_forward = jax.jit(self._forward)

    def _forward(self, X, Y):
        N, C, H, W = X.shape
        levels = len(self.weights)
        K1, K2 = self.K
        c1 = (K1 * self.data_range) ** 2
        c2 = (K2 * self.data_range) ** 2

        # The ms-ssim window and the gauss_weighted_l1 window coincide:
        # real_size = min(win_size, H, W) == win_size, guaranteed by the size check.
        B = N * C
        x = X.reshape(B, H, W)  # keep input dtype; upcast happens inside the kernel
        y = Y.reshape(B, H, W)

        stats = _fused_msssim_l1(x, y, levels,
                                 tuple(float(t) for t in self.win_taps),
                                 c1, c2)                              # (B, levels+1)

        # Same level combination as the torch module: relu(spatial mean) ** weight,
        # mean over batch, then (1 - .) * alpha + l1 * (1 - alpha), global mean.
        per_level = jax.nn.relu(stats[:, :levels]).reshape(N, C, levels)
        w = jnp.asarray(self.weights, dtype=jnp.float32).reshape(1, 1, levels)
        ms_ssim_map = (per_level ** w).mean(axis=0)      # (C, levels) == ref (levels,C).T
        l1 = jnp.mean(stats[:, levels])                  # scalar global mean

        loss_map = (1.0 - ms_ssim_map) * self.alpha + l1 * (1.0 - self.alpha)
        return loss_map.mean()

    def __call__(self, X, Y):
        assert X.ndim == 4 and X.shape == Y.shape, "Inputs must be matching NCHW tensors."
        _, _, H, W = X.shape
        win_size = int(self.win_taps.shape[0])
        assert win_size % 2 == 1, "Window size should be odd."
        assert min(H, W) > (win_size - 1) * 2 ** 4, (
            "Image size should be larger than %d" % ((win_size - 1) * 2 ** 4))
        return self._jit_forward(X, Y)


# ----------------------------------- main ------------------------------------

if __name__ == "__main__":
    key = jax.random.PRNGKey(0)
    k1, k2 = jax.random.split(key)
    # channel=1 per module default; ms_ssim requires min(H, W) > (3-1)*2**4 = 32.
    N, C, H, W = 2, 1, 48, 48
    X = jax.random.uniform(k1, (N, C, H, W), dtype=jnp.float32)
    Y = jax.random.uniform(k2, (N, C, H, W), dtype=jnp.float32)

    loss_fn = MSSSIML1LossPallas()
    loss = loss_fn(X, Y)
    jax.block_until_ready(loss)
    print("KERNEL_OK")
</pallas_src>

<mosaic_0001>
module attributes {stable_mosaic.version = 11 : i64} {
  func.func @kernel(%arg0: i32, %arg1: memref<96x48xf32, #tpu.memory_space<vmem>>, %arg2: memref<96x48xf32, #tpu.memory_space<vmem>>, %arg3: memref<48x46xf32, #tpu.memory_space<vmem>>, %arg4: memref<92x96xf32, #tpu.memory_space<vmem>>, %arg5: memref<2x92xf32, #tpu.memory_space<vmem>>, %arg6: memref<24x22xf32, #tpu.memory_space<vmem>>, %arg7: memref<44x48xf32, #tpu.memory_space<vmem>>, %arg8: memref<2x44xf32, #tpu.memory_space<vmem>>, %arg9: memref<12x10xf32, #tpu.memory_space<vmem>>, %arg10: memref<20x24xf32, #tpu.memory_space<vmem>>, %arg11: memref<2x20xf32, #tpu.memory_space<vmem>>, %arg12: memref<6x4xf32, #tpu.memory_space<vmem>>, %arg13: memref<8x12xf32, #tpu.memory_space<vmem>>, %arg14: memref<2x8xf32, #tpu.memory_space<vmem>>, %arg15: memref<3x1xf32, #tpu.memory_space<vmem>>, %arg16: memref<2x6xf32, #tpu.memory_space<vmem>>, %arg17: memref<2x2xf32, #tpu.memory_space<vmem>>, %arg18: memref<48x24xf32, #tpu.memory_space<vmem>>, %arg19: memref<48x96xf32, #tpu.memory_space<vmem>>, %arg20: memref<24x12xf32, #tpu.memory_space<vmem>>, %arg21: memref<24x48xf32, #tpu.memory_space<vmem>>, %arg22: memref<12x6xf32, #tpu.memory_space<vmem>>, %arg23: memref<12x24xf32, #tpu.memory_space<vmem>>, %arg24: memref<6x3xf32, #tpu.memory_space<vmem>>, %arg25: memref<6x12xf32, #tpu.memory_space<vmem>>, %arg26: memref<2x6xf32, #tpu.memory_space<vmem>>) attributes {dimension_semantics = [#tpu.dimension_semantics<parallel>], iteration_bounds = array<i64: 1>, scalar_prefetch = 0 : i64, scratch_operands = 0 : i64, tpu.core_type = #tpu.core_type<tc>, window_params = [{transform_indices = @transform_0, window_bounds = array<i64: 96, 48>}, {transform_indices = @transform_1, window_bounds = array<i64: 96, 48>}, {pipeline_mode = #tpu.pipeline_mode<synchronous>, transform_indices = @transform_2, window_bounds = array<i64: 48, 46>}, {pipeline_mode = #tpu.pipeline_mode<synchronous>, transform_indices = @transform_3, window_bounds = array<i64: 92, 96>}, {pipeline_mode = #tpu.pipeline_mode<synchronous>, transform_indices = @transform_4, window_bounds = array<i64: 2, 92>}, {pipeline_mode = #tpu.pipeline_mode<synchronous>, transform_indices = @transform_5, window_bounds = array<i64: 24, 22>}, {pipeline_mode = #tpu.pipeline_mode<synchronous>, transform_indices = @transform_6, window_bounds = array<i64: 44, 48>}, {pipeline_mode = #tpu.pipeline_mode<synchronous>, transform_indices = @transform_7, window_bounds = array<i64: 2, 44>}, {pipeline_mode = #tpu.pipeline_mode<synchronous>, transform_indices = @transform_8, window_bounds = array<i64: 12, 10>}, {pipeline_mode = #tpu.pipeline_mode<synchronous>, transform_indices = @transform_9, window_bounds = array<i64: 20, 24>}, {pipeline_mode = #tpu.pipeline_mode<synchronous>, transform_indices = @transform_10, window_bounds = array<i64: 2, 20>}, {pipeline_mode = #tpu.pipeline_mode<synchronous>, transform_indices = @transform_11, window_bounds = array<i64: 6, 4>}, {pipeline_mode = #tpu.pipeline_mode<synchronous>, transform_indices = @transform_12, window_bounds = array<i64: 8, 12>}, {pipeline_mode = #tpu.pipeline_mode<synchronous>, transform_indices = @transform_13, window_bounds = array<i64: 2, 8>}, {pipeline_mode = #tpu.pipeline_mode<synchronous>, transform_indices = @transform_14, window_bounds = array<i64: 3, 1>}, {pipeline_mode = #tpu.pipeline_mode<synchronous>, transform_indices = @transform_15, window_bounds = array<i64: 2, 6>}, {pipeline_mode = #tpu.pipeline_mode<synchronous>, transform_indices = @transform_16, window_bounds = array<i64: 2, 2>}, {pipeline_mode = #tpu.pipeline_mode<synchronous>, transform_indices = @transform_17, window_bounds = array<i64: 48, 24>}, {pipeline_mode = #tpu.pipeline_mode<synchronous>, transform_indices = @transform_18, window_bounds = array<i64: 48, 96>}, {pipeline_mode = #tpu.pipeline_mode<synchronous>, transform_indices = @transform_19, window_bounds = array<i64: 24, 12>}, {pipeline_mode = #tpu.pipeline_mode<synchronous>, transform_indices = @transform_20, window_bounds = array<i64: 24, 48>}, {pipeline_mode = #tpu.pipeline_mode<synchronous>, transform_indices = @transform_21, window_bounds = array<i64: 12, 6>}, {pipeline_mode = #tpu.pipeline_mode<synchronous>, transform_indices = @transform_22, window_bounds = array<i64: 12, 24>}, {pipeline_mode = #tpu.pipeline_mode<synchronous>, transform_indices = @transform_23, window_bounds = array<i64: 6, 3>}, {pipeline_mode = #tpu.pipeline_mode<synchronous>, transform_indices = @transform_24, window_bounds = array<i64: 6, 12>}, {transform_indices = @transform_25, window_bounds = array<i64: 2, 6>}]} {
    %c0 = arith.constant 0 : index
    %c0_0 = arith.constant 0 : index
    %0 = vector.load %arg1[%c0, %c0_0] : memref<96x48xf32, #tpu.memory_space<vmem>>, vector<96x48xf32>
    %c0_1 = arith.constant 0 : index
    %c0_2 = arith.constant 0 : index
    %1 = vector.load %arg2[%c0_1, %c0_2] : memref<96x48xf32, #tpu.memory_space<vmem>>, vector<96x48xf32>
    %c0_3 = arith.constant 0 : index
    %c0_4 = arith.constant 0 : index
    %2 = vector.load %arg3[%c0_3, %c0_4] : memref<48x46xf32, #tpu.memory_space<vmem>>, vector<48x46xf32>
    %c0_5 = arith.constant 0 : index
    %c0_6 = arith.constant 0 : index
    %3 = vector.load %arg4[%c0_5, %c0_6] : memref<92x96xf32, #tpu.memory_space<vmem>>, vector<92x96xf32>
    %c0_7 = arith.constant 0 : index
    %c0_8 = arith.constant 0 : index
    %4 = vector.load %arg5[%c0_7, %c0_8] : memref<2x92xf32, #tpu.memory_space<vmem>>, vector<2x92xf32>
    %cst = arith.constant dense<0.000000e+00> : vector<96x46xf32>
    %5 = tpu.matmul %0, %2, %cst {dimension_numbers = #tpu.dot_dimension_numbers<[1], [0], [0], [1], [0, 0, 1, 1], [], []>} : vector<96x48xf32>, vector<48x46xf32>, vector<96x46xf32> -> vector<96x46xf32>
    %cst_9 = arith.constant dense<0.000000e+00> : vector<92x46xf32>
    %6 = tpu.matmul %3, %5, %cst_9 {dimension_numbers = #tpu.dot_dimension_numbers<[1], [0], [0], [1], [0, 0, 1, 1], [], []>} : vector<92x96xf32>, vector<96x46xf32>, vector<92x46xf32> -> vector<92x46xf32>
    %cst_10 = arith.constant dense<0.000000e+00> : vector<96x46xf32>
    %7 = tpu.matmul %1, %2, %cst_10 {dimension_numbers = #tpu.dot_dimension_numbers<[1], [0], [0], [1], [0, 0, 1, 1], [], []>} : vector<96x48xf32>, vector<48x46xf32>, vector<96x46xf32> -> vector<96x46xf32>
    %cst_11 = arith.constant dense<0.000000e+00> : vector<92x46xf32>
    %8 = tpu.matmul %3, %7, %cst_11 {dimension_numbers = #tpu.dot_dimension_numbers<[1], [0], [0], [1], [0, 0, 1, 1], [], []>} : vector<92x96xf32>, vector<96x46xf32>, vector<92x46xf32> -> vector<92x46xf32>
    %9 = arith.mulf %6, %6 : vector<92x46xf32>
    %10 = arith.mulf %8, %8 : vector<92x46xf32>
    %11 = arith.mulf %6, %8 : vector<92x46xf32>
    %12 = arith.mulf %0, %0 : vector<96x48xf32>
    %cst_12 = arith.constant dense<0.000000e+00> : vector<96x46xf32>
    %13 = tpu.matmul %12, %2, %cst_12 {dimension_numbers = #tpu.dot_dimension_numbers<[1], [0], [0], [1], [0, 0, 1, 1], [], []>} : vector<96x48xf32>, vector<48x46xf32>, vector<96x46xf32> -> vector<96x46xf32>
    %cst_13 = arith.constant dense<0.000000e+00> : vector<92x46xf32>
    %14 = tpu.matmul %3, %13, %cst_13 {dimension_numbers = #tpu.dot_dimension_numbers<[1], [0], [0], [1], [0, 0, 1, 1], [], []>} : vector<92x96xf32>, vector<96x46xf32>, vector<92x46xf32> -> vector<92x46xf32>
    %15 = arith.subf %14, %9 : vector<92x46xf32>
    %16 = arith.mulf %1, %1 : vector<96x48xf32>
    %cst_14 = arith.constant dense<0.000000e+00> : vector<96x46xf32>
    %17 = tpu.matmul %16, %2, %cst_14 {dimension_numbers = #tpu.dot_dimension_numbers<[1], [0], [0], [1], [0, 0, 1, 1], [], []>} : vector<96x48xf32>, vector<48x46xf32>, vector<96x46xf32> -> vector<96x46xf32>
    %cst_15 = arith.constant dense<0.000000e+00> : vector<92x46xf32>
    %18 = tpu.matmul %3, %17, %cst_15 {dimension_numbers = #tpu.dot_dimension_numbers<[1], [0], [0], [1], [0, 0, 1, 1], [], []>} : vector<92x96xf32>, vector<96x46xf32>, vector<92x46xf32> -> vector<92x46xf32>
    %19 = arith.subf %18, %10 : vector<92x46xf32>
    %20 = arith.mulf %0, %1 : vector<96x48xf32>
    %cst_16 = arith.constant dense<0.000000e+00> : vector<96x46xf32>
    %21 = tpu.matmul %20, %2, %cst_16 {dimension_numbers = #tpu.dot_dimension_numbers<[1], [0], [0], [1], [0, 0, 1, 1], [], []>} : vector<96x48xf32>, vector<48x46xf32>, vector<96x46xf32> -> vector<96x46xf32>
    %cst_17 = arith.constant dense<0.000000e+00> : vector<92x46xf32>
    %22 = tpu.matmul %3, %21, %cst_17 {dimension_numbers = #tpu.dot_dimension_numbers<[1], [0], [0], [1], [0, 0, 1, 1], [], []>} : vector<92x96xf32>, vector<96x46xf32>, vector<92x46xf32> -> vector<92x46xf32>
    %23 = arith.subf %22, %11 : vector<92x46xf32>
    %cst_18 = arith.constant 2.000000e+00 : f32
    %24 = vector.broadcast %cst_18 : f32 to vector<92x46xf32>
    %25 = arith.mulf %24, %23 : vector<92x46xf32>
    %cst_19 = arith.constant 8.99999984E-4 : f32
    %26 = vector.broadcast %cst_19 : f32 to vector<92x46xf32>
    %27 = arith.addf %25, %26 : vector<92x46xf32>
    %28 = arith.addf %15, %19 : vector<92x46xf32>
    %cst_20 = arith.constant 8.99999984E-4 : f32
    %29 = vector.broadcast %cst_20 : f32 to vector<92x46xf32>
    %30 = arith.addf %28, %29 : vector<92x46xf32>
    %31 = arith.divf %27, %30 : vector<92x46xf32>
    %32 = arith.subf %0, %1 : vector<96x48xf32>
    %33 = math.absf %32 : vector<96x48xf32>
    %cst_21 = arith.constant dense<0.000000e+00> : vector<96x46xf32>
    %34 = tpu.matmul %33, %2, %cst_21 {dimension_numbers = #tpu.dot_dimension_numbers<[1], [0], [0], [1], [0, 0, 1, 1], [], []>} : vector<96x48xf32>, vector<48x46xf32>, vector<96x46xf32> -> vector<96x46xf32>
    %cst_22 = arith.constant dense<0.000000e+00> : vector<92x46xf32>
    %35 = tpu.matmul %3, %34, %cst_22 {dimension_numbers = #tpu.dot_dimension_numbers<[1], [0], [0], [1], [0, 0, 1, 1], [], []>} : vector<92x96xf32>, vector<96x46xf32>, vector<92x46xf32> -> vector<92x46xf32>
    %cst_23 = arith.constant dense<0.000000e+00> : vector<2x46xf32>
    %36 = tpu.matmul %4, %35, %cst_23 {dimension_numbers = #tpu.dot_dimension_numbers<[1], [0], [0], [1], [0, 0, 1, 1], [], []>} : vector<2x92xf32>, vector<92x46xf32>, vector<2x46xf32> -> vector<2x46xf32>
    %cst_24 = arith.constant dense<0.000000e+00> : vector<2xf32>
    %37 = vector.multi_reduction <add>, %36, %cst_24 [1] : vector<2x46xf32> to vector<2xf32>
    %38 = vector.shape_cast %37 : vector<2xf32> to vector<2x1xf32>
    %c0_25 = arith.constant 0 : index
    %c5 = arith.constant 5 : index
    %39 = vector.load %arg26[%c0_25, %c5] : memref<2x6xf32, #tpu.memory_space<vmem>>, vector<2x1xf32>
    tpu.vector_store %arg26[%c0_25, %c5], %38 {strides = array<i32>} : memref<2x6xf32, #tpu.memory_space<vmem>>, vector<2x1xf32>,
    %cst_26 = arith.constant dense<0.000000e+00> : vector<2x46xf32>
    %40 = tpu.matmul %4, %31, %cst_26 {dimension_numbers = #tpu.dot_dimension_numbers<[1], [0], [0], [1], [0, 0, 1, 1], [], []>} : vector<2x92xf32>, vector<92x46xf32>, vector<2x46xf32> -> vector<2x46xf32>
    %cst_27 = arith.constant dense<0.000000e+00> : vector<2xf32>
    %41 = vector.multi_reduction <add>, %40, %cst_27 [1] : vector<2x46xf32> to vector<2xf32>
    %42 = vector.shape_cast %41 : vector<2xf32> to vector<2x1xf32>
    %c0_28 = arith.constant 0 : index
    %c0_29 = arith.constant 0 : index
    %43 = vector.load %arg26[%c0_28, %c0_29] : memref<2x6xf32, #tpu.memory_space<vmem>>, vector<2x1xf32>
    tpu.vector_store %arg26[%c0_28, %c0_29], %42 {strides = array<i32>} : memref<2x6xf32, #tpu.memory_space<vmem>>, vector<2x1xf32>,
    %c0_30 = arith.constant 0 : index
    %c0_31 = arith.constant 0 : index
    %44 = vector.load %arg18[%c0_30, %c0_31] : memref<48x24xf32, #tpu.memory_space<vmem>>, vector<48x24xf32>
    %c0_32 = arith.constant 0 : index
    %c0_33 = arith.constant 0 : index
    %45 = vector.load %arg19[%c0_32, %c0_33] : memref<48x96xf32, #tpu.memory_space<vmem>>, vector<48x96xf32>
    %cst_34 = arith.constant dense<0.000000e+00> : vector<96x24xf32>
    %46 = tpu.matmul %0, %44, %cst_34 {dimension_numbers = #tpu.dot_dimension_numbers<[1], [0], [0], [1], [0, 0, 1, 1], [], []>} : vector<96x48xf32>, vector<48x24xf32>, vector<96x24xf32> -> vector<96x24xf32>
    %cst_35 = arith.constant dense<0.000000e+00> : vector<48x24xf32>
    %47 = tpu.matmul %45, %46, %cst_35 {dimension_numbers = #tpu.dot_dimension_numbers<[1], [0], [0], [1], [0, 0, 1, 1], [], []>} : vector<48x96xf32>, vector<96x24xf32>, vector<48x24xf32> -> vector<48x24xf32>
    %cst_36 = arith.constant dense<0.000000e+00> : vector<96x24xf32>
    %48 = tpu.matmul %1, %44, %cst_36 {dimension_numbers = #tpu.dot_dimension_numbers<[1], [0], [0], [1], [0, 0, 1, 1], [], []>} : vector<96x48xf32>, vector<48x24xf32>, vector<96x24xf32> -> vector<96x24xf32>
    %cst_37 = arith.constant dense<0.000000e+00> : vector<48x24xf32>
    %49 = tpu.matmul %45, %48, %cst_37 {dimension_numbers = #tpu.dot_dimension_numbers<[1], [0], [0], [1], [0, 0, 1, 1], [], []>} : vector<48x96xf32>, vector<96x24xf32>, vector<48x24xf32> -> vector<48x24xf32>
    %c0_38 = arith.constant 0 : index
    %c0_39 = arith.constant 0 : index
    %50 = vector.load %arg6[%c0_38, %c0_39] : memref<24x22xf32, #tpu.memory_space<vmem>>, vector<24x22xf32>
    %c0_40 = arith.constant 0 : index
    %c0_41 = arith.constant 0 : index
    %51 = vector.load %arg7[%c0_40, %c0_41] : memref<44x48xf32, #tpu.memory_space<vmem>>, vector<44x48xf32>
    %c0_42 = arith.constant 0 : index
    %c0_43 = arith.constant 0 : index
    %52 = vector.load %arg8[%c0_42, %c0_43] : memref<2x44xf32, #tpu.memory_space<vmem>>, vector<2x44xf32>
    %cst_44 = arith.constant dense<0.000000e+00> : vector<48x22xf32>
    %53 = tpu.matmul %47, %50, %cst_44 {dimension_numbers = #tpu.dot_dimension_numbers<[1], [0], [0], [1], [0, 0, 1, 1], [], []>} : vector<48x24xf32>, vector<24x22xf32>, vector<48x22xf32> -> vector<48x22xf32>
    %cst_45 = arith.constant dense<0.000000e+00> : vector<44x22xf32>
    %54 = tpu.matmul %51, %53, %cst_45 {dimension_numbers = #tpu.dot_dimension_numbers<[1], [0], [0], [1], [0, 0, 1, 1], [], []>} : vector<44x48xf32>, vector<48x22xf32>, vector<44x22xf32> -> vector<44x22xf32>
    %cst_46 = arith.constant dense<0.000000e+00> : vector<48x22xf32>
    %55 = tpu.matmul %49, %50, %cst_46 {dimension_numbers = #tpu.dot_dimension_numbers<[1], [0], [0], [1], [0, 0, 1, 1], [], []>} : vector<48x24xf32>, vector<24x22xf32>, vector<48x22xf32> -> vector<48x22xf32>
    %cst_47 = arith.constant dense<0.000000e+00> : vector<44x22xf32>
    %56 = tpu.matmul %51, %55, %cst_47 {dimension_numbers = #tpu.dot_dimension_numbers<[1], [0], [0], [1], [0, 0, 1, 1], [], []>} : vector<44x48xf32>, vector<48x22xf32>, vector<44x22xf32> -> vector<44x22xf32>
    %57 = arith.mulf %54, %54 : vector<44x22xf32>
    %58 = arith.mulf %56, %56 : vector<44x22xf32>
    %59 = arith.mulf %54, %56 : vector<44x22xf32>
    %60 = arith.mulf %47, %47 : vector<48x24xf32>
    %cst_48 = arith.constant dense<0.000000e+00> : vector<48x22xf32>
    %61 = tpu.matmul %60, %50, %cst_48 {dimension_numbers = #tpu.dot_dimension_numbers<[1], [0], [0], [1], [0, 0, 1, 1], [], []>} : vector<48x24xf32>, vector<24x22xf32>, vector<48x22xf32> -> vector<48x22xf32>
    %cst_49 = arith.constant dense<0.000000e+00> : vector<44x22xf32>
    %62 = tpu.matmul %51, %61, %cst_49 {dimension_numbers = #tpu.dot_dimension_numbers<[1], [0], [0], [1], [0, 0, 1, 1], [], []>} : vector<44x48xf32>, vector<48x22xf32>, vector<44x22xf32> -> vector<44x22xf32>
    %63 = arith.subf %62, %57 : vector<44x22xf32>
    %64 = arith.mulf %49, %49 : vector<48x24xf32>
    %cst_50 = arith.constant dense<0.000000e+00> : vector<48x22xf32>
    %65 = tpu.matmul %64, %50, %cst_50 {dimension_numbers = #tpu.dot_dimension_numbers<[1], [0], [0], [1], [0, 0, 1, 1], [], []>} : vector<48x24xf32>, vector<24x22xf32>, vector<48x22xf32> -> vector<48x22xf32>
    %cst_51 = arith.constant dense<0.000000e+00> : vector<44x22xf32>
    %66 = tpu.matmul %51, %65, %cst_51 {dimension_numbers = #tpu.dot_dimension_numbers<[1], [0], [0], [1], [0, 0, 1, 1], [], []>} : vector<44x48xf32>, vector<48x22xf32>, vector<44x22xf32> -> vector<44x22xf32>
    %67 = arith.subf %66, %58 : vector<44x22xf32>
    %68 = arith.mulf %47, %49 : vector<48x24xf32>
    %cst_52 = arith.constant dense<0.000000e+00> : vector<48x22xf32>
    %69 = tpu.matmul %68, %50, %cst_52 {dimension_numbers = #tpu.dot_dimension_numbers<[1], [0], [0], [1], [0, 0, 1, 1], [], []>} : vector<48x24xf32>, vector<24x22xf32>, vector<48x22xf32> -> vector<48x22xf32>
    %cst_53 = arith.constant dense<0.000000e+00> : vector<44x22xf32>
    %70 = tpu.matmul %51, %69, %cst_53 {dimension_numbers = #tpu.dot_dimension_numbers<[1], [0], [0], [1], [0, 0, 1, 1], [], []>} : vector<44x48xf32>, vector<48x22xf32>, vector<44x22xf32> -> vector<44x22xf32>
    %71 = arith.subf %70, %59 : vector<44x22xf32>
    %cst_54 = arith.constant 2.000000e+00 : f32
    %72 = vector.broadcast %cst_54 : f32 to vector<44x22xf32>
    %73 = arith.mulf %72, %71 : vector<44x22xf32>
    %cst_55 = arith.constant 8.99999984E-4 : f32
    %74 = vector.broadcast %cst_55 : f32 to vector<44x22xf32>
    %75 = arith.addf %73, %74 : vector<44x22xf32>
    %76 = arith.addf %63, %67 : vector<44x22xf32>
    %cst_56 = arith.constant 8.99999984E-4 : f32
    %77 = vector.broadcast %cst_56 : f32 to vector<44x22xf32>
    %78 = arith.addf %76, %77 : vector<44x22xf32>
    %79 = arith.divf %75, %78 : vector<44x22xf32>
    %cst_57 = arith.constant dense<0.000000e+00> : vector<2x22xf32>
    %80 = tpu.matmul %52, %79, %cst_57 {dimension_numbers = #tpu.dot_dimension_numbers<[1], [0], [0], [1], [0, 0, 1, 1], [], []>} : vector<2x44xf32>, vector<44x22xf32>, vector<2x22xf32> -> vector<2x22xf32>
    %cst_58 = arith.constant dense<0.000000e+00> : vector<2xf32>
    %81 = vector.multi_reduction <add>, %80, %cst_58 [1] : vector<2x22xf32> to vector<2xf32>
    %82 = vector.shape_cast %81 : vector<2xf32> to vector<2x1xf32>
    %c0_59 = arith.constant 0 : index
    %c1 = arith.constant 1 : index
    %83 = vector.load %arg26[%c0_59, %c1] : memref<2x6xf32, #tpu.memory_space<vmem>>, vector<2x1xf32>
    tpu.vector_store %arg26[%c0_59, %c1], %82 {strides = array<i32>} : memref<2x6xf32, #tpu.memory_space<vmem>>, vector<2x1xf32>,
    %c0_60 = arith.constant 0 : index
    %c0_61 = arith.constant 0 : index
    %84 = vector.load %arg20[%c0_60, %c0_61] : memref<24x12xf32, #tpu.memory_space<vmem>>, vector<24x12xf32>
    %c0_62 = arith.constant 0 : index
    %c0_63 = arith.constant 0 : index
    %85 = vector.load %arg21[%c0_62, %c0_63] : memref<24x48xf32, #tpu.memory_space<vmem>>, vector<24x48xf32>
    %cst_64 = arith.constant dense<0.000000e+00> : vector<48x12xf32>
    %86 = tpu.matmul %47, %84, %cst_64 {dimension_numbers = #tpu.dot_dimension_numbers<[1], [0], [0], [1], [0, 0, 1, 1], [], []>} : vector<48x24xf32>, vector<24x12xf32>, vector<48x12xf32> -> vector<48x12xf32>
    %cst_65 = arith.constant dense<0.000000e+00> : vector<24x12xf32>
    %87 = tpu.matmul %85, %86, %cst_65 {dimension_numbers = #tpu.dot_dimension_numbers<[1], [0], [0], [1], [0, 0, 1, 1], [], []>} : vector<24x48xf32>, vector<48x12xf32>, vector<24x12xf32> -> vector<24x12xf32>
    %cst_66 = arith.constant dense<0.000000e+00> : vector<48x12xf32>
    %88 = tpu.matmul %49, %84, %cst_66 {dimension_numbers = #tpu.dot_dimension_numbers<[1], [0], [0], [1], [0, 0, 1, 1], [], []>} : vector<48x24xf32>, vector<24x12xf32>, vector<48x12xf32> -> vector<48x12xf32>
    %cst_67 = arith.constant dense<0.000000e+00> : vector<24x12xf32>
    %89 = tpu.matmul %85, %88, %cst_67 {dimension_numbers = #tpu.dot_dimension_numbers<[1], [0], [0], [1], [0, 0, 1, 1], [], []>} : vector<24x48xf32>, vector<48x12xf32>, vector<24x12xf32> -> vector<24x12xf32>
    %c0_68 = arith.constant 0 : index
    %c0_69 = arith.constant 0 : index
    %90 = vector.load %arg9[%c0_68, %c0_69] : memref<12x10xf32, #tpu.memory_space<vmem>>, vector<12x10xf32>
    %c0_70 = arith.constant 0 : index
    %c0_71 = arith.constant 0 : index
    %91 = vector.load %arg10[%c0_70, %c0_71] : memref<20x24xf32, #tpu.memory_space<vmem>>, vector<20x24xf32>
    %c0_72 = arith.constant 0 : index
    %c0_73 = arith.constant 0 : index
    %92 = vector.load %arg11[%c0_72, %c0_73] : memref<2x20xf32, #tpu.memory_space<vmem>>, vector<2x20xf32>
    %cst_74 = arith.constant dense<0.000000e+00> : vector<24x10xf32>
    %93 = tpu.matmul %87, %90, %cst_74 {dimension_numbers = #tpu.dot_dimension_numbers<[1], [0], [0], [1], [0, 0, 1, 1], [], []>} : vector<24x12xf32>, vector<12x10xf32>, vector<24x10xf32> -> vector<24x10xf32>
    %cst_75 = arith.constant dense<0.000000e+00> : vector<20x10xf32>
    %94 = tpu.matmul %91, %93, %cst_75 {dimension_numbers = #tpu.dot_dimension_numbers<[1], [0], [0], [1], [0, 0, 1, 1], [], []>} : vector<20x24xf32>, vector<24x10xf32>, vector<20x10xf32> -> vector<20x10xf32>
    %cst_76 = arith.constant dense<0.000000e+00> : vector<24x10xf32>
    %95 = tpu.matmul %89, %90, %cst_76 {dimension_numbers = #tpu.dot_dimension_numbers<[1], [0], [0], [1], [0, 0, 1, 1], [], []>} : vector<24x12xf32>, vector<12x10xf32>, vector<24x10xf32> -> vector<24x10xf32>
    %cst_77 = arith.constant dense<0.000000e+00> : vector<20x10xf32>
    %96 = tpu.matmul %91, %95, %cst_77 {dimension_numbers = #tpu.dot_dimension_numbers<[1], [0], [0], [1], [0, 0, 1, 1], [], []>} : vector<20x24xf32>, vector<24x10xf32>, vector<20x10xf32> -> vector<20x10xf32>
    %97 = arith.mulf %94, %94 : vector<20x10xf32>
    %98 = arith.mulf %96, %96 : vector<20x10xf32>
    %99 = arith.mulf %94, %96 : vector<20x10xf32>
    %100 = arith.mulf %87, %87 : vector<24x12xf32>
    %cst_78 = arith.constant dense<0.000000e+00> : vector<24x10xf32>
    %101 = tpu.matmul %100, %90, %cst_78 {dimension_numbers = #tpu.dot_dimension_numbers<[1], [0], [0], [1], [0, 0, 1, 1], [], []>} : vector<24x12xf32>, vector<12x10xf32>, vector<24x10xf32> -> vector<24x10xf32>
    %cst_79 = arith.constant dense<0.000000e+00> : vector<20x10xf32>
    %102 = tpu.matmul %91, %101, %cst_79 {dimension_numbers = #tpu.dot_dimension_numbers<[1], [0], [0], [1], [0, 0, 1, 1], [], []>} : vector<20x24xf32>, vector<24x10xf32>, vector<20x10xf32> -> vector<20x10xf32>
    %103 = arith.subf %102, %97 : vector<20x10xf32>
    %104 = arith.mulf %89, %89 : vector<24x12xf32>
    %cst_80 = arith.constant dense<0.000000e+00> : vector<24x10xf32>
    %105 = tpu.matmul %104, %90, %cst_80 {dimension_numbers = #tpu.dot_dimension_numbers<[1], [0], [0], [1], [0, 0, 1, 1], [], []>} : vector<24x12xf32>, vector<12x10xf32>, vector<24x10xf32> -> vector<24x10xf32>
    %cst_81 = arith.constant dense<0.000000e+00> : vector<20x10xf32>
    %106 = tpu.matmul %91, %105, %cst_81 {dimension_numbers = #tpu.dot_dimension_numbers<[1], [0], [0], [1], [0, 0, 1, 1], [], []>} : vector<20x24xf32>, vector<24x10xf32>, vector<20x10xf32> -> vector<20x10xf32>
    %107 = arith.subf %106, %98 : vector<20x10xf32>
    %108 = arith.mulf %87, %89 : vector<24x12xf32>
    %cst_82 = arith.constant dense<0.000000e+00> : vector<24x10xf32>
    %109 = tpu.matmul %108, %90, %cst_82 {dimension_numbers = #tpu.dot_dimension_numbers<[1], [0], [0], [1], [0, 0, 1, 1], [], []>} : vector<24x12xf32>, vector<12x10xf32>, vector<24x10xf32> -> vector<24x10xf32>
    %cst_83 = arith.constant dense<0.000000e+00> : vector<20x10xf32>
    %110 = tpu.matmul %91, %109, %cst_83 {dimension_numbers = #tpu.dot_dimension_numbers<[1], [0], [0], [1], [0, 0, 1, 1], [], []>} : vector<20x24xf32>, vector<24x10xf32>, vector<20x10xf32> -> vector<20x10xf32>
    %111 = arith.subf %110, %99 : vector<20x10xf32>
    %cst_84 = arith.constant 2.000000e+00 : f32
    %112 = vector.broadcast %cst_84 : f32 to vector<20x10xf32>
    %113 = arith.mulf %112, %111 : vector<20x10xf32>
    %cst_85 = arith.constant 8.99999984E-4 : f32
    %114 = vector.broadcast %cst_85 : f32 to vector<20x10xf32>
    %115 = arith.addf %113, %114 : vector<20x10xf32>
    %116 = arith.addf %103, %107 : vector<20x10xf32>
    %cst_86 = arith.constant 8.99999984E-4 : f32
    %117 = vector.broadcast %cst_86 : f32 to vector<20x10xf32>
    %118 = arith.addf %116, %117 : vector<20x10xf32>
    %119 = arith.divf %115, %118 : vector<20x10xf32>
    %cst_87 = arith.constant dense<0.000000e+00> : vector<2x10xf32>
    %120 = tpu.matmul %92, %119, %cst_87 {dimension_numbers = #tpu.dot_dimension_numbers<[1], [0], [0], [1], [0, 0, 1, 1], [], []>} : vector<2x20xf32>, vector<20x10xf32>, vector<2x10xf32> -> vector<2x10xf32>
    %cst_88 = arith.constant dense<0.000000e+00> : vector<2xf32>
    %121 = vector.multi_reduction <add>, %120, %cst_88 [1] : vector<2x10xf32> to vector<2xf32>
    %122 = vector.shape_cast %121 : vector<2xf32> to vector<2x1xf32>
    %c0_89 = arith.constant 0 : index
    %c2 = arith.constant 2 : index
    %123 = vector.load %arg26[%c0_89, %c2] : memref<2x6xf32, #tpu.memory_space<vmem>>, vector<2x1xf32>
    tpu.vector_store %arg26[%c0_89, %c2], %122 {strides = array<i32>} : memref<2x6xf32, #tpu.memory_space<vmem>>, vector<2x1xf32>,
    %c0_90 = arith.constant 0 : index
    %c0_91 = arith.constant 0 : index
    %124 = vector.load %arg22[%c0_90, %c0_91] : memref<12x6xf32, #tpu.memory_space<vmem>>, vector<12x6xf32>
    %c0_92 = arith.constant 0 : index
    %c0_93 = arith.constant 0 : index
    %125 = vector.load %arg23[%c0_92, %c0_93] : memref<12x24xf32, #tpu.memory_space<vmem>>, vector<12x24xf32>
    %cst_94 = arith.constant dense<0.000000e+00> : vector<24x6xf32>
    %126 = tpu.matmul %87, %124, %cst_94 {dimension_numbers = #tpu.dot_dimension_numbers<[1], [0], [0], [1], [0, 0, 1, 1], [], []>} : vector<24x12xf32>, vector<12x6xf32>, vector<24x6xf32> -> vector<24x6xf32>
    %cst_95 = arith.constant dense<0.000000e+00> : vector<12x6xf32>
    %127 = tpu.matmul %125, %126, %cst_95 {dimension_numbers = #tpu.dot_dimension_numbers<[1], [0], [0], [1], [0, 0, 1, 1], [], []>} : vector<12x24xf32>, vector<24x6xf32>, vector<12x6xf32> -> vector<12x6xf32>
    %cst_96 = arith.constant dense<0.000000e+00> : vector<24x6xf32>
    %128 = tpu.matmul %89, %124, %cst_96 {dimension_numbers = #tpu.dot_dimension_numbers<[1], [0], [0], [1], [0, 0, 1, 1], [], []>} : vector<24x12xf32>, vector<12x6xf32>, vector<24x6xf32> -> vector<24x6xf32>
    %cst_97 = arith.constant dense<0.000000e+00> : vector<12x6xf32>
    %129 = tpu.matmul %125, %128, %cst_97 {dimension_numbers = #tpu.dot_dimension_numbers<[1], [0], [0], [1], [0, 0, 1, 1], [], []>} : vector<12x24xf32>, vector<24x6xf32>, vector<12x6xf32> -> vector<12x6xf32>
    %c0_98 = arith.constant 0 : index
    %c0_99 = arith.constant 0 : index
    %130 = vector.load %arg12[%c0_98, %c0_99] : memref<6x4xf32, #tpu.memory_space<vmem>>, vector<6x4xf32>
    %c0_100 = arith.constant 0 : index
    %c0_101 = arith.constant 0 : index
    %131 = vector.load %arg13[%c0_100, %c0_101] : memref<8x12xf32, #tpu.memory_space<vmem>>, vector<8x12xf32>
    %c0_102 = arith.constant 0 : index
    %c0_103 = arith.constant 0 : index
    %132 = vector.load %arg14[%c0_102, %c0_103] : memref<2x8xf32, #tpu.memory_space<vmem>>, vector<2x8xf32>
    %cst_104 = arith.constant dense<0.000000e+00> : vector<12x4xf32>
    %133 = tpu.matmul %127, %130, %cst_104 {dimension_numbers = #tpu.dot_dimension_numbers<[1], [0], [0], [1], [0, 0, 1, 1], [], []>} : vector<12x6xf32>, vector<6x4xf32>, vector<12x4xf32> -> vector<12x4xf32>
    %cst_105 = arith.constant dense<0.000000e+00> : vector<8x4xf32>
    %134 = tpu.matmul %131, %133, %cst_105 {dimension_numbers = #tpu.dot_dimension_numbers<[1], [0], [0], [1], [0, 0, 1, 1], [], []>} : vector<8x12xf32>, vector<12x4xf32>, vector<8x4xf32> -> vector<8x4xf32>
    %cst_106 = arith.constant dense<0.000000e+00> : vector<12x4xf32>
    %135 = tpu.matmul %129, %130, %cst_106 {dimension_numbers = #tpu.dot_dimension_numbers<[1], [0], [0], [1], [0, 0, 1, 1], [], []>} : vector<12x6xf32>, vector<6x4xf32>, vector<12x4xf32> -> vector<12x4xf32>
    %cst_107 = arith.constant dense<0.000000e+00> : vector<8x4xf32>
    %136 = tpu.matmul %131, %135, %cst_107 {dimension_numbers = #tpu.dot_dimension_numbers<[1], [0], [0], [1], [0, 0, 1, 1], [], []>} : vector<8x12xf32>, vector<12x4xf32>, vector<8x4xf32> -> vector<8x4xf32>
    %137 = arith.mulf %134, %134 : vector<8x4xf32>
    %138 = arith.mulf %136, %136 : vector<8x4xf32>
    %139 = arith.mulf %134, %136 : vector<8x4xf32>
    %140 = arith.mulf %127, %127 : vector<12x6xf32>
    %cst_108 = arith.constant dense<0.000000e+00> : vector<12x4xf32>
    %141 = tpu.matmul %140, %130, %cst_108 {dimension_numbers = #tpu.dot_dimension_numbers<[1], [0], [0], [1], [0, 0, 1, 1], [], []>} : vector<12x6xf32>, vector<6x4xf32>, vector<12x4xf32> -> vector<12x4xf32>
    %cst_109 = arith.constant dense<0.000000e+00> : vector<8x4xf32>
    %142 = tpu.matmul %131, %141, %cst_109 {dimension_numbers = #tpu.dot_dimension_numbers<[1], [0], [0], [1], [0, 0, 1, 1], [], []>} : vector<8x12xf32>, vector<12x4xf32>, vector<8x4xf32> -> vector<8x4xf32>
    %143 = arith.subf %142, %137 : vector<8x4xf32>
    %144 = arith.mulf %129, %129 : vector<12x6xf32>
    %cst_110 = arith.constant dense<0.000000e+00> : vector<12x4xf32>
    %145 = tpu.matmul %144, %130, %cst_110 {dimension_numbers = #tpu.dot_dimension_numbers<[1], [0], [0], [1], [0, 0, 1, 1], [], []>} : vector<12x6xf32>, vector<6x4xf32>, vector<12x4xf32> -> vector<12x4xf32>
    %cst_111 = arith.constant dense<0.000000e+00> : vector<8x4xf32>
    %146 = tpu.matmul %131, %145, %cst_111 {dimension_numbers = #tpu.dot_dimension_numbers<[1], [0], [0], [1], [0, 0, 1, 1], [], []>} : vector<8x12xf32>, vector<12x4xf32>, vector<8x4xf32> -> vector<8x4xf32>
    %147 = arith.subf %146, %138 : vector<8x4xf32>
    %148 = arith.mulf %127, %129 : vector<12x6xf32>
    %cst_112 = arith.constant dense<0.000000e+00> : vector<12x4xf32>
    %149 = tpu.matmul %148, %130, %cst_112 {dimension_numbers = #tpu.dot_dimension_numbers<[1], [0], [0], [1], [0, 0, 1, 1], [], []>} : vector<12x6xf32>, vector<6x4xf32>, vector<12x4xf32> -> vector<12x4xf32>
    %cst_113 = arith.constant dense<0.000000e+00> : vector<8x4xf32>
    %150 = tpu.matmul %131, %149, %cst_113 {dimension_numbers = #tpu.dot_dimension_numbers<[1], [0], [0], [1], [0, 0, 1, 1], [], []>} : vector<8x12xf32>, vector<12x4xf32>, vector<8x4xf32> -> vector<8x4xf32>
    %151 = arith.subf %150, %139 : vector<8x4xf32>
    %cst_114 = arith.constant 2.000000e+00 : f32
    %152 = vector.broadcast %cst_114 : f32 to vector<8x4xf32>
    %153 = arith.mulf %152, %151 : vector<8x4xf32>
    %cst_115 = arith.constant 8.99999984E-4 : f32
    %154 = vector.broadcast %cst_115 : f32 to vector<8x4xf32>
    %155 = arith.addf %153, %154 : vector<8x4xf32>
    %156 = arith.addf %143, %147 : vector<8x4xf32>
    %cst_116 = arith.constant 8.99999984E-4 : f32
    %157 = vector.broadcast %cst_116 : f32 to vector<8x4xf32>
    %158 = arith.addf %156, %157 : vector<8x4xf32>
    %159 = arith.divf %155, %158 : vector<8x4xf32>
    %cst_117 = arith.constant dense<0.000000e+00> : vector<2x4xf32>
    %160 = tpu.matmul %132, %159, %cst_117 {dimension_numbers = #tpu.dot_dimension_numbers<[1], [0], [0], [1], [0, 0, 1, 1], [], []>} : vector<2x8xf32>, vector<8x4xf32>, vector<2x4xf32> -> vector<2x4xf32>
    %cst_118 = arith.constant dense<0.000000e+00> : vector<2xf32>
    %161 = vector.multi_reduction <add>, %160, %cst_118 [1] : vector<2x4xf32> to vector<2xf32>
    %162 = vector.shape_cast %161 : vector<2xf32> to vector<2x1xf32>
    %c0_119 = arith.constant 0 : index
    %c3 = arith.constant 3 : index
    %163 = vector.load %arg26[%c0_119, %c3] : memref<2x6xf32, #tpu.memory_space<vmem>>, vector<2x1xf32>
    tpu.vector_store %arg26[%c0_119, %c3], %162 {strides = array<i32>} : memref<2x6xf32, #tpu.memory_space<vmem>>, vector<2x1xf32>,
    %c0_120 = arith.constant 0 : index
    %c0_121 = arith.constant 0 : index
    %164 = vector.load %arg24[%c0_120, %c0_121] : memref<6x3xf32, #tpu.memory_space<vmem>>, vector<6x3xf32>
    %c0_122 = arith.constant 0 : index
    %c0_123 = arith.constant 0 : index
    %165 = vector.load %arg25[%c0_122, %c0_123] : memref<6x12xf32, #tpu.memory_space<vmem>>, vector<6x12xf32>
    %cst_124 = arith.constant dense<0.000000e+00> : vector<12x3xf32>
    %166 = tpu.matmul %127, %164, %cst_124 {dimension_numbers = #tpu.dot_dimension_numbers<[1], [0], [0], [1], [0, 0, 1, 1], [], []>} : vector<12x6xf32>, vector<6x3xf32>, vector<12x3xf32> -> vector<12x3xf32>
    %cst_125 = arith.constant dense<0.000000e+00> : vector<6x3xf32>
    %167 = tpu.matmul %165, %166, %cst_125 {dimension_numbers = #tpu.dot_dimension_numbers<[1], [0], [0], [1], [0, 0, 1, 1], [], []>} : vector<6x12xf32>, vector<12x3xf32>, vector<6x3xf32> -> vector<6x3xf32>
    %cst_126 = arith.constant dense<0.000000e+00> : vector<12x3xf32>
    %168 = tpu.matmul %129, %164, %cst_126 {dimension_numbers = #tpu.dot_dimension_numbers<[1], [0], [0], [1], [0, 0, 1, 1], [], []>} : vector<12x6xf32>, vector<6x3xf32>, vector<12x3xf32> -> vector<12x3xf32>
    %cst_127 = arith.constant dense<0.000000e+00> : vector<6x3xf32>
    %169 = tpu.matmul %165, %168, %cst_127 {dimension_numbers = #tpu.dot_dimension_numbers<[1], [0], [0], [1], [0, 0, 1, 1], [], []>} : vector<6x12xf32>, vector<12x3xf32>, vector<6x3xf32> -> vector<6x3xf32>
    %c0_128 = arith.constant 0 : index
    %c0_129 = arith.constant 0 : index
    %170 = vector.load %arg15[%c0_128, %c0_129] : memref<3x1xf32, #tpu.memory_space<vmem>>, vector<3x1xf32>
    %c0_130 = arith.constant 0 : index
    %c0_131 = arith.constant 0 : index
    %171 = vector.load %arg16[%c0_130, %c0_131] : memref<2x6xf32, #tpu.memory_space<vmem>>, vector<2x6xf32>
    %c0_132 = arith.constant 0 : index
    %c0_133 = arith.constant 0 : index
    %172 = vector.load %arg17[%c0_132, %c0_133] : memref<2x2xf32, #tpu.memory_space<vmem>>, vector<2x2xf32>
    %cst_134 = arith.constant dense<0.000000e+00> : vector<6x1xf32>
    %173 = tpu.matmul %167, %170, %cst_134 {dimension_numbers = #tpu.dot_dimension_numbers<[1], [0], [0], [1], [0, 0, 1, 1], [], []>} : vector<6x3xf32>, vector<3x1xf32>, vector<6x1xf32> -> vector<6x1xf32>
    %cst_135 = arith.constant dense<0.000000e+00> : vector<2x1xf32>
    %174 = tpu.matmul %171, %173, %cst_135 {dimension_numbers = #tpu.dot_dimension_numbers<[1], [0], [0], [1], [0, 0, 1, 1], [], []>} : vector<2x6xf32>, vector<6x1xf32>, vector<2x1xf32> -> vector<2x1xf32>
    %cst_136 = arith.constant dense<0.000000e+00> : vector<6x1xf32>
    %175 = tpu.matmul %169, %170, %cst_136 {dimension_numbers = #tpu.dot_dimension_numbers<[1], [0], [0], [1], [0, 0, 1, 1], [], []>} : vector<6x3xf32>, vector<3x1xf32>, vector<6x1xf32> -> vector<6x1xf32>
    %cst_137 = arith.constant dense<0.000000e+00> : vector<2x1xf32>
    %176 = tpu.matmul %171, %175, %cst_137 {dimension_numbers = #tpu.dot_dimension_numbers<[1], [0], [0], [1], [0, 0, 1, 1], [], []>} : vector<2x6xf32>, vector<6x1xf32>, vector<2x1xf32> -> vector<2x1xf32>
    %177 = arith.mulf %174, %174 : vector<2x1xf32>
    %178 = arith.mulf %176, %176 : vector<2x1xf32>
    %179 = arith.mulf %174, %176 : vector<2x1xf32>
    %180 = arith.mulf %167, %167 : vector<6x3xf32>
    %cst_138 = arith.constant dense<0.000000e+00> : vector<6x1xf32>
    %181 = tpu.matmul %180, %170, %cst_138 {dimension_numbers = #tpu.dot_dimension_numbers<[1], [0], [0], [1], [0, 0, 1, 1], [], []>} : vector<6x3xf32>, vector<3x1xf32>, vector<6x1xf32> -> vector<6x1xf32>
    %cst_139 = arith.constant dense<0.000000e+00> : vector<2x1xf32>
    %182 = tpu.matmul %171, %181, %cst_139 {dimension_numbers = #tpu.dot_dimension_numbers<[1], [0], [0], [1], [0, 0, 1, 1], [], []>} : vector<2x6xf32>, vector<6x1xf32>, vector<2x1xf32> -> vector<2x1xf32>
    %183 = arith.subf %182, %177 : vector<2x1xf32>
    %184 = arith.mulf %169, %169 : vector<6x3xf32>
    %cst_140 = arith.constant dense<0.000000e+00> : vector<6x1xf32>
    %185 = tpu.matmul %184, %170, %cst_140 {dimension_numbers = #tpu.dot_dimension_numbers<[1], [0], [0], [1], [0, 0, 1, 1], [], []>} : vector<6x3xf32>, vector<3x1xf32>, vector<6x1xf32> -> vector<6x1xf32>
    %cst_141 = arith.constant dense<0.000000e+00> : vector<2x1xf32>
    %186 = tpu.matmul %171, %185, %cst_141 {dimension_numbers = #tpu.dot_dimension_numbers<[1], [0], [0], [1], [0, 0, 1, 1], [], []>} : vector<2x6xf32>, vector<6x1xf32>, vector<2x1xf32> -> vector<2x1xf32>
    %187 = arith.subf %186, %178 : vector<2x1xf32>
    %188 = arith.mulf %167, %169 : vector<6x3xf32>
    %cst_142 = arith.constant dense<0.000000e+00> : vector<6x1xf32>
    %189 = tpu.matmul %188, %170, %cst_142 {dimension_numbers = #tpu.dot_dimension_numbers<[1], [0], [0], [1], [0, 0, 1, 1], [], []>} : vector<6x3xf32>, vector<3x1xf32>, vector<6x1xf32> -> vector<6x1xf32>
    %cst_143 = arith.constant dense<0.000000e+00> : vector<2x1xf32>
    %190 = tpu.matmul %171, %189, %cst_143 {dimension_numbers = #tpu.dot_dimension_numbers<[1], [0], [0], [1], [0, 0, 1, 1], [], []>} : vector<2x6xf32>, vector<6x1xf32>, vector<2x1xf32> -> vector<2x1xf32>
    %191 = arith.subf %190, %179 : vector<2x1xf32>
    %cst_144 = arith.constant 2.000000e+00 : f32
    %192 = vector.broadcast %cst_144 : f32 to vector<2x1xf32>
    %193 = arith.mulf %192, %191 : vector<2x1xf32>
    %cst_145 = arith.constant 8.99999984E-4 : f32
    %194 = vector.broadcast %cst_145 : f32 to vector<2x1xf32>
    %195 = arith.addf %193, %194 : vector<2x1xf32>
    %196 = arith.addf %183, %187 : vector<2x1xf32>
    %cst_146 = arith.constant 8.99999984E-4 : f32
    %197 = vector.broadcast %cst_146 : f32 to vector<2x1xf32>
    %198 = arith.addf %196, %197 : vector<2x1xf32>
    %199 = arith.divf %195, %198 : vector<2x1xf32>
    %cst_147 = arith.constant 2.000000e+00 : f32
    %200 = vector.broadcast %cst_147 : f32 to vector<2x1xf32>
    %201 = arith.mulf %200, %179 : vector<2x1xf32>
    %cst_148 = arith.constant 9.99999974E-5 : f32
    %202 = vector.broadcast %cst_148 : f32 to vector<2x1xf32>
    %203 = arith.addf %201, %202 : vector<2x1xf32>
    %204 = arith.addf %177, %178 : vector<2x1xf32>
    %cst_149 = arith.constant 9.99999974E-5 : f32
    %205 = vector.broadcast %cst_149 : f32 to vector<2x1xf32>
    %206 = arith.addf %204, %205 : vector<2x1xf32>
    %207 = arith.divf %203, %206 : vector<2x1xf32>
    %208 = arith.mulf %207, %199 : vector<2x1xf32>
    %cst_150 = arith.constant dense<0.000000e+00> : vector<2x1xf32>
    %209 = tpu.matmul %172, %208, %cst_150 {dimension_numbers = #tpu.dot_dimension_numbers<[1], [0], [0], [1], [0, 0, 1, 1], [], []>} : vector<2x2xf32>, vector<2x1xf32>, vector<2x1xf32> -> vector<2x1xf32>
    %cst_151 = arith.constant dense<0.000000e+00> : vector<2xf32>
    %210 = vector.multi_reduction <add>, %209, %cst_151 [1] : vector<2x1xf32> to vector<2xf32>
    %211 = vector.shape_cast %210 : vector<2xf32> to vector<2x1xf32>
    %c0_152 = arith.constant 0 : index
    %c4 = arith.constant 4 : index
    %212 = vector.load %arg26[%c0_152, %c4] : memref<2x6xf32, #tpu.memory_space<vmem>>, vector<2x1xf32>
    tpu.vector_store %arg26[%c0_152, %c4], %211 {strides = array<i32>} : memref<2x6xf32, #tpu.memory_space<vmem>>, vector<2x1xf32>,
    return
  }
  func.func @transform_0(%arg0: i32) -> (i32, i32) {
    %c0_i32 = arith.constant 0 : i32
    %c0_i32_0 = arith.constant 0 : i32
    return %arg0, %c0_i32 : i32, i32
  }
  func.func @transform_1(%arg0: i32) -> (i32, i32) {
    %c0_i32 = arith.constant 0 : i32
    %c0_i32_0 = arith.constant 0 : i32
    return %arg0, %c0_i32 : i32, i32
  }
  func.func @transform_2(%arg0: i32) -> (i32, i32) {
    %c0_i32 = arith.constant 0 : i32
    %c0_i32_0 = arith.constant 0 : i32
    %c0_i32_1 = arith.constant 0 : i32
    return %c0_i32, %c0_i32_0 : i32, i32
  }
  func.func @transform_3(%arg0: i32) -> (i32, i32) {
    %c0_i32 = arith.constant 0 : i32
    %c0_i32_0 = arith.constant 0 : i32
    %c0_i32_1 = arith.constant 0 : i32
    return %c0_i32, %c0_i32_0 : i32, i32
  }
  func.func @transform_4(%arg0: i32) -> (i32, i32) {
    %c0_i32 = arith.constant 0 : i32
    %c0_i32_0 = arith.constant 0 : i32
    %c0_i32_1 = arith.constant 0 : i32
    return %c0_i32, %c0_i32_0 : i32, i32
  }
  func.func @transform_5(%arg0: i32) -> (i32, i32) {
    %c0_i32 = arith.constant 0 : i32
    %c0_i32_0 = arith.constant 0 : i32
    %c0_i32_1 = arith.constant 0 : i32
    return %c0_i32, %c0_i32_0 : i32, i32
  }
  func.func @transform_6(%arg0: i32) -> (i32, i32) {
    %c0_i32 = arith.constant 0 : i32
    %c0_i32_0 = arith.constant 0 : i32
    %c0_i32_1 = arith.constant 0 : i32
    return %c0_i32, %c0_i32_0 : i32, i32
  }
  func.func @transform_7(%arg0: i32) -> (i32, i32) {
    %c0_i32 = arith.constant 0 : i32
    %c0_i32_0 = arith.constant 0 : i32
    %c0_i32_1 = arith.constant 0 : i32
    return %c0_i32, %c0_i32_0 : i32, i32
  }
  func.func @transform_8(%arg0: i32) -> (i32, i32) {
    %c0_i32 = arith.constant 0 : i32
    %c0_i32_0 = arith.constant 0 : i32
    %c0_i32_1 = arith.constant 0 : i32
    return %c0_i32, %c0_i32_0 : i32, i32
  }
  func.func @transform_9(%arg0: i32) -> (i32, i32) {
    %c0_i32 = arith.constant 0 : i32
    %c0_i32_0 = arith.constant 0 : i32
    %c0_i32_1 = arith.constant 0 : i32
    return %c0_i32, %c0_i32_0 : i32, i32
  }
  func.func @transform_10(%arg0: i32) -> (i32, i32) {
    %c0_i32 = arith.constant 0 : i32
    %c0_i32_0 = arith.constant 0 : i32
    %c0_i32_1 = arith.constant 0 : i32
    return %c0_i32, %c0_i32_0 : i32, i32
  }
  func.func @transform_11(%arg0: i32) -> (i32, i32) {
    %c0_i32 = arith.constant 0 : i32
    %c0_i32_0 = arith.constant 0 : i32
    %c0_i32_1 = arith.constant 0 : i32
    return %c0_i32, %c0_i32_0 : i32, i32
  }
  func.func @transform_12(%arg0: i32) -> (i32, i32) {
    %c0_i32 = arith.constant 0 : i32
    %c0_i32_0 = arith.constant 0 : i32
    %c0_i32_1 = arith.constant 0 : i32
    return %c0_i32, %c0_i32_0 : i32, i32
  }
  func.func @transform_13(%arg0: i32) -> (i32, i32) {
    %c0_i32 = arith.constant 0 : i32
    %c0_i32_0 = arith.constant 0 : i32
    %c0_i32_1 = arith.constant 0 : i32
    return %c0_i32, %c0_i32_0 : i32, i32
  }
  func.func @transform_14(%arg0: i32) -> (i32, i32) {
    %c0_i32 = arith.constant 0 : i32
    %c0_i32_0 = arith.constant 0 : i32
    %c0_i32_1 = arith.constant 0 : i32
    return %c0_i32, %c0_i32_0 : i32, i32
  }
  func.func @transform_15(%arg0: i32) -> (i32, i32) {
    %c0_i32 = arith.constant 0 : i32
    %c0_i32_0 = arith.constant 0 : i32
    %c0_i32_1 = arith.constant 0 : i32
    return %c0_i32, %c0_i32_0 : i32, i32
  }
  func.func @transform_16(%arg0: i32) -> (i32, i32) {
    %c0_i32 = arith.constant 0 : i32
    %c0_i32_0 = arith.constant 0 : i32
    %c0_i32_1 = arith.constant 0 : i32
    return %c0_i32, %c0_i32_0 : i32, i32
  }
  func.func @transform_17(%arg0: i32) -> (i32, i32) {
    %c0_i32 = arith.constant 0 : i32
    %c0_i32_0 = arith.constant 0 : i32
    %c0_i32_1 = arith.constant 0 : i32
    return %c0_i32, %c0_i32_0 : i32, i32
  }
  func.func @transform_18(%arg0: i32) -> (i32, i32) {
    %c0_i32 = arith.constant 0 : i32
    %c0_i32_0 = arith.constant 0 : i32
    %c0_i32_1 = arith.constant 0 : i32
    return %c0_i32, %c0_i32_0 : i32, i32
  }
  func.func @transform_19(%arg0: i32) -> (i32, i32) {
    %c0_i32 = arith.constant 0 : i32
    %c0_i32_0 = arith.constant 0 : i32
    %c0_i32_1 = arith.constant 0 : i32
    return %c0_i32, %c0_i32_0 : i32, i32
  }
  func.func @transform_20(%arg0: i32) -> (i32, i32) {
    %c0_i32 = arith.constant 0 : i32
    %c0_i32_0 = arith.constant 0 : i32
    %c0_i32_1 = arith.constant 0 : i32
    return %c0_i32, %c0_i32_0 : i32, i32
  }
  func.func @transform_21(%arg0: i32) -> (i32, i32) {
    %c0_i32 = arith.constant 0 : i32
    %c0_i32_0 = arith.constant 0 : i32
    %c0_i32_1 = arith.constant 0 : i32
    return %c0_i32, %c0_i32_0 : i32, i32
  }
  func.func @transform_22(%arg0: i32) -> (i32, i32) {
    %c0_i32 = arith.constant 0 : i32
    %c0_i32_0 = arith.constant 0 : i32
    %c0_i32_1 = arith.constant 0 : i32
    return %c0_i32, %c0_i32_0 : i32, i32
  }
  func.func @transform_23(%arg0: i32) -> (i32, i32) {
    %c0_i32 = arith.constant 0 : i32
    %c0_i32_0 = arith.constant 0 : i32
    %c0_i32_1 = arith.constant 0 : i32
    return %c0_i32, %c0_i32_0 : i32, i32
  }
  func.func @transform_24(%arg0: i32) -> (i32, i32) {
    %c0_i32 = arith.constant 0 : i32
    %c0_i32_0 = arith.constant 0 : i32
    %c0_i32_1 = arith.constant 0 : i32
    return %c0_i32, %c0_i32_0 : i32, i32
  }
  func.func @transform_25(%arg0: i32) -> (i32, i32) {
    %c0_i32 = arith.constant 0 : i32
    %c0_i32_0 = arith.constant 0 : i32
    return %arg0, %c0_i32 : i32, i32
  }
}

</mosaic_0001>

<bundles_post_ra>
// kernel: _forward.1
= control target key start
LH: loop header
LB: loop body
LE: loop exit
PB: predicated region body
PF: predicated region fallthrough
CT: control target
= control target key end

     0   :  { %s12982_s0 = inlined_call_operand.hbm [shape: f32[96,48], index: 0, kind: input, shape index: {}]   ;;  %s12983_s1 = inlined_call_operand.hbm [shape: f32[96,48], index: 1, kind: input, shape index: {}]   ;;  %s12984_s2 = inlined_call_operand.hbm [shape: f32[48,46], index: 2, kind: input, shape index: {}]   ;;  %s12985_s3 = inlined_call_operand.hbm [shape: f32[92,96], index: 3, kind: input, shape index: {}]   ;;  %s12986_s4 = inlined_call_operand.hbm [shape: f32[2,92], index: 4, kind: input, shape index: {}]   ;;  %s12987_s5 = inlined_call_operand.hbm [shape: f32[24,22], index: 5, kind: input, shape index: {}]   ;;  %s12988_s6 = inlined_call_operand.hbm [shape: f32[44,48], index: 6, kind: input, shape index: {}]   ;;  %s12989_s7 = inlined_call_operand.hbm [shape: f32[2,44], index: 7, kind: input, shape index: {}]   ;;  %s12990_s8 = inlined_call_operand.hbm [shape: f32[12,10], index: 8, kind: input, shape index: {}]   ;;  %s12991_s9 = inlined_call_operand.hbm [shape: f32[20,24], index: 9, kind: input, shape index: {}]   ;;  %s12992_s10 = inlined_call_operand.hbm [shape: f32[2,20], index: 10, kind: input, shape index: {}]   ;;  %s12993_s11 = inlined_call_operand.hbm [shape: f32[6,4], index: 11, kind: input, shape index: {}]   ;;  %s12994_s12 = inlined_call_operand.hbm [shape: f32[8,12], index: 12, kind: input, shape index: {}]   ;;  %s12995_s13 = inlined_call_operand.hbm [shape: f32[2,8], index: 13, kind: input, shape index: {}]   ;;  %s12996_s14 = inlined_call_operand.hbm [shape: f32[3,1], index: 14, kind: input, shape index: {}]   ;;  %s12997_s15 = inlined_call_operand.hbm [shape: f32[2,6], index: 15, kind: input, shape index: {}]   ;;  %s12998_s16 = inlined_call_operand.hbm [shape: f32[2,2], index: 16, kind: input, shape index: {}]   ;;  %s12999_s17 = inlined_call_operand.hbm [shape: f32[48,24], index: 17, kind: input, shape index: {}]   ;;  %s13000_s18 = inlined_call_operand.vmem [shape: f32[48,96], index: 18, kind: input, shape index: {}]   ;;  %s13001_s19 = inlined_call_operand.hbm [shape: f32[24,12], index: 19, kind: input, shape index: {}]   ;;  %s13002_s20 = inlined_call_operand.vmem [shape: f32[24,48], index: 20, kind: input, shape index: {}]   ;;  %s13003_s21 = inlined_call_operand.hbm [shape: f32[12,6], index: 21, kind: input, shape index: {}]   ;;  %s13004_s22 = inlined_call_operand.vmem [shape: f32[12,24], index: 22, kind: input, shape index: {}]   ;;  %s13005_s23 = inlined_call_operand.vmem [shape: f32[6,3], index: 23, kind: input, shape index: {}]   ;;  %s13006_s24 = inlined_call_operand.vmem [shape: f32[6,12], index: 24, kind: input, shape index: {}]   ;;  %s13007_s25 = inlined_call_operand.vmem [shape: f32[2,6], index: 25, kind: output, shape index: {}]  }
   0x1   :  { %13019 = sst [smem:[#allocation44_spill]] %s12982_s0 }
   0x2   :  { %13020 = sst [smem:[#allocation45_spill]] %s12983_s1 }
   0x3   :  { %13021 = sst [smem:[#allocation46_spill]] %s12984_s2 }
   0x4   :  { %13022 = sst [smem:[#allocation47_spill]] %s12985_s3 }
   0x5   :  { %13023 = sst [smem:[#allocation48_spill]] %s12986_s4 }
   0x6   :  { %13024 = sst [smem:[#allocation49_spill]] %s12987_s5 }
   0x7   :  { %13025 = sst [smem:[#allocation50_spill]] %s12988_s6 }
   0x8   :  { %13026 = sst [smem:[#allocation51_spill]] %s12989_s7 }
   0x9   :  { %13027 = sst [smem:[#allocation52_spill]] %s12990_s8 }
   0xa   :  { %13028 = sst [smem:[#allocation53_spill]] %s12991_s9 }
   0xb   :  { %13029 = sst [smem:[#allocation54_spill]] %s13004_s22 }
   0xc   :  { %13030 = sst [smem:[#allocation55_spill]] %s13005_s23 }
   0xd   :  { %13031 = sst [smem:[#allocation56_spill]] %s13006_s24 }
   0xe   :  { %30 = vsyncpa [#allocation3], 0 }
   0xf   :  { %31 = vsyncpa [#allocation5], 0 }
  0x10   :  { %32 = vsyncpa [#allocation8], 0 }
  0x11   :  { %33 = vsyncpa [#allocation11], 0 }
  0x12   :  { %34 = vsyncpa [#allocation14], 0 }
  0x13   :  { %35 = vsyncpa [#allocation17], 0 }
  0x14   :  { %36 = vsyncpa [#allocation20], 0 }
  0x15   :  { %37 = vsyncpa [#allocation23], 0 }
  0x16   :  { %38 = vsyncpa [#allocation26], 0 }
  0x17   :  { %39 = vsyncpa [#allocation29], 0 }
  0x18   :  { %40 = vsyncpa [#allocation32], 0  ;;  %s11249_s29 = smov [#allocation4]   ;;  %s11250_s6 = smov [#allocation7]  }
  0x19   :  { %s58_s2 = sshll.u32 %s11249_s29, 4  ;;  %s82_s30 = sshll.u32 %s11250_s6, 4  ;;  %s59_s2 = int_to_ptr.vmem [resolvable:$true] %s58_s2  ;;  %s11406_s30 = int_to_ptr.vmem [resolvable:$true] %s82_s30 }
  0x1a   :  { %s13032_s26 = sld [smem:[#allocation45_spill]] }
  0x20   :  { %s10787_s1 = scalar_lea.hbm %s13032_s26, 1536 }
  0x21   :  { %p10788_p0 = scmp.ne.s32.totalorder %s13032_s26, %s10787_s1  ;;  %p10791_p1 = scmp.lt.u32.totalorder %s10787_s1, %s13032_s26 }
  0x23   :  { %p10793_p2 = pnand %p10791_p1, %p10788_p0 }
  0x25   :  { %10796 = shalt.err (!%p10793_p2)
}
  0x26   :  { %s10797_s9 = scalar_lea.vmem %s59_s2, 1536  ;;  %p10802_p4 = scmp.lt.s32.totalorder %s59_s2, %s59_s2 }
  0x27   :  { %p10798_p3 = scmp.ne.s32.totalorder %s59_s2, %s10797_s9  ;;  %p10803_p5 = scmp.lt.s32.totalorder %s10797_s9, %s10797_s9 }
  0x29   :  { %p10804_p6 = por %p10803_p5, %p10802_p4 }
  0x2b   :  { %p10805_p7 = pnand %p10804_p6, %p10798_p3 }
  0x2d   :  { %10808 = shalt.err (!%p10805_p7)
}
  0x2e   :  { %s11251_s5 = smov 128   ;;  %s11252_s0 = smov 8  }
  0x2f   :  { %64 = dma.hbm_to_vmem [thread:$0]  %s13032_s26, 1536, %s59_s2, [#allocation5], %s11251_s5, %s11251_s5, %s11252_s0  }
  0x30   :  { %s13033_s1 = sld [smem:[#allocation47_spill]] }
  0x36   :  { %s10809_s8 = scalar_lea.hbm %s13033_s1, 1536 }
  0x37   :  { %p10810_p8 = scmp.ne.s32.totalorder %s13033_s1, %s10809_s8  ;;  %p10813_p9 = scmp.lt.u32.totalorder %s10809_s8, %s13033_s1 }
  0x39   :  { %p10815_p10 = pnand %p10813_p9, %p10810_p8 }
  0x3b   :  { %10818 = shalt.err (!%p10815_p10)
}
  0x3c   :  { %s10819_s24 = scalar_lea.vmem %s11406_s30, 1536  ;;  %p10824_p12 = scmp.lt.s32.totalorder %s11406_s30, %s11406_s30 }
  0x3d   :  { %p10820_p11 = scmp.ne.s32.totalorder %s11406_s30, %s10819_s24  ;;  %p10825_p13 = scmp.lt.s32.totalorder %s10819_s24, %s10819_s24 }
  0x3f   :  { %p10826_p0 = por %p10825_p13, %p10824_p12 }
  0x41   :  { %p10827_p1 = pnand %p10826_p0, %p10820_p11 }
  0x43   :  { %10830 = shalt.err (!%p10827_p1)
}
  0x44   :  { %88 = dma.hbm_to_vmem [thread:$0]  %s13033_s1, 1536, %s11406_s30, [#allocation8], %s11251_s5, %s11251_s5, %s11252_s0  }
  0x45   :  { %s11253_s29 = smov [#allocation10]   ;;  %s11254_s7 = smov [#allocation13]  }
  0x46   :  { %s104_s6 = sshll.u32 %s11253_s29, 4  ;;  %s129_s3 = sshll.u32 %s11254_s7, 4  ;;  %s105_s6 = int_to_ptr.vmem [resolvable:$true] %s104_s6  ;;  %s130_s3 = int_to_ptr.vmem [resolvable:$true] %s129_s3 }
  0x47   :  { %s13034_s24 = sld [smem:[#allocation49_spill]] }
  0x4d   :  { %s10831_s4 = scalar_lea.hbm %s13034_s24, 384 }
  0x4e   :  { %p10832_p2 = scmp.ne.s32.totalorder %s13034_s24, %s10831_s4  ;;  %p10835_p3 = scmp.lt.u32.totalorder %s10831_s4, %s13034_s24 }
  0x50   :  { %p10837_p4 = pnand %p10835_p3, %p10832_p2 }
  0x52   :  { %10840 = shalt.err (!%p10837_p4)
}
  0x53   :  { %s10841_s30 = scalar_lea.vmem %s105_s6, 384  ;;  %p10846_p6 = scmp.lt.s32.totalorder %s105_s6, %s105_s6 }
  0x54   :  { %p10842_p5 = scmp.ne.s32.totalorder %s105_s6, %s10841_s30  ;;  %p10847_p7 = scmp.lt.s32.totalorder %s10841_s30, %s10841_s30 }
  0x56   :  { %p10848_p8 = por %p10847_p7, %p10846_p6 }
  0x58   :  { %p10849_p9 = pnand %p10848_p8, %p10842_p5 }
  0x5a   :  { %10852 = shalt.err (!%p10849_p9)
}
  0x5b   :  { %110 = dma.hbm_to_vmem [thread:$0]  %s13034_s24, 384, %s105_s6, [#allocation11], %s11251_s5, %s11251_s5, %s11252_s0  }
  0x5c   :  { %s13035_s22 = sld [smem:[#allocation51_spill]] }
  0x62   :  { %s10853_s23 = scalar_lea.hbm %s13035_s22, 32 }
  0x63   :  { %p10854_p10 = scmp.ne.s32.totalorder %s13035_s22, %s10853_s23  ;;  %p10857_p11 = scmp.lt.u32.totalorder %s10853_s23, %s13035_s22 }
  0x65   :  { %p10859_p12 = pnand %p10857_p11, %p10854_p10 }
  0x67   :  { %10862 = shalt.err (!%p10859_p12)
}
  0x68   :  { %s10863_s28 = scalar_lea.vmem %s130_s3, 32  ;;  %p10868_p0 = scmp.lt.s32.totalorder %s130_s3, %s130_s3 }
  0x69   :  { %p10864_p13 = scmp.ne.s32.totalorder %s130_s3, %s10863_s28  ;;  %p10869_p1 = scmp.lt.s32.totalorder %s10863_s28, %s10863_s28 }
  0x6b   :  { %p10870_p2 = por %p10869_p1, %p10868_p0 }
  0x6d   :  { %p10871_p3 = pnand %p10870_p2, %p10864_p13 }
  0x6f   :  { %10874 = shalt.err (!%p10871_p3)
}
  0x70   :  { %132 = dma.hbm_to_vmem [thread:$0]  %s13035_s22, 32, %s130_s3, [#allocation14]  }
  0x71   :  { %s11255_s9 = smov [#allocation16]   ;;  %s11256_s1 = smov [#allocation19]  }
  0x72   :  { %s150_s30 = sshll.u32 %s11255_s9, 4  ;;  %s173_s2 = sshll.u32 %s11256_s1, 4  ;;  %s151_s30 = int_to_ptr.vmem [resolvable:$true] %s150_s30  ;;  %s174_s2 = int_to_ptr.vmem [resolvable:$true] %s173_s2 }
  0x73   :  { %s13036_s23 = sld [smem:[#allocation53_spill]] }
  0x79   :  { %s10875_s7 = scalar_lea.hbm %s13036_s23, 384 }
  0x7a   :  { %p10876_p4 = scmp.ne.s32.totalorder %s13036_s23, %s10875_s7  ;;  %p10879_p5 = scmp.lt.u32.totalorder %s10875_s7, %s13036_s23 }
  0x7c   :  { %p10881_p6 = pnand %p10879_p5, %p10876_p4 }
  0x7e   :  { %10884 = shalt.err (!%p10881_p6)
}
  0x7f   :  { %s10885_s3 = scalar_lea.vmem %s151_s30, 384  ;;  %p10890_p8 = scmp.lt.s32.totalorder %s151_s30, %s151_s30 }
  0x80   :  { %p10886_p7 = scmp.ne.s32.totalorder %s151_s30, %s10885_s3  ;;  %p10891_p9 = scmp.lt.s32.totalorder %s10885_s3, %s10885_s3 }
  0x82   :  { %p10892_p10 = por %p10891_p9, %p10890_p8 }
  0x84   :  { %p10893_p11 = pnand %p10892_p10, %p10886_p7 }
  0x86   :  { %10896 = shalt.err (!%p10893_p11)
}
  0x87   :  { %156 = dma.hbm_to_vmem [thread:$0]  %s13036_s23, 384, %s151_s30, [#allocation17], %s11251_s5, %s11251_s5, %s11252_s0  }
  0x88   :  { %s10897_s1 = scalar_lea.hbm %s12993_s11, 128 }
  0x89   :  { %p10898_p12 = scmp.ne.s32.totalorder %s12993_s11, %s10897_s1  ;;  %p10901_p13 = scmp.lt.u32.totalorder %s10897_s1, %s12993_s11 }
  0x8b   :  { %p10903_p0 = pnand %p10901_p13, %p10898_p12 }
  0x8d   :  { %10906 = shalt.err (!%p10903_p0)
}
  0x8e   :  { %s10907_s27 = scalar_lea.vmem %s174_s2, 128  ;;  %p10912_p2 = scmp.lt.s32.totalorder %s174_s2, %s174_s2 }
  0x8f   :  { %p10908_p1 = scmp.ne.s32.totalorder %s174_s2, %s10907_s27  ;;  %p10913_p3 = scmp.lt.s32.totalorder %s10907_s27, %s10907_s27 }
  0x91   :  { %p10914_p4 = por %p10913_p3, %p10912_p2 }
  0x93   :  { %p10915_p5 = pnand %p10914_p4, %p10908_p1 }
  0x95   :  { %10918 = shalt.err (!%p10915_p5)
}
  0x96   :  { %176 = dma.hbm_to_vmem [thread:$0]  %s12993_s11, 128, %s174_s2, [#allocation20]  }
  0x97   :  { %s11257_s4 = smov [#allocation22]   ;;  %s11258_s3 = smov [#allocation25]  }
  0x98   :  { %s193_s28 = sshll.u32 %s11257_s4, 4  ;;  %s213_s22 = sshll.u32 %s11258_s3, 4  ;;  %s194_s28 = int_to_ptr.vmem [resolvable:$true] %s193_s28  ;;  %s214_s22 = int_to_ptr.vmem [resolvable:$true] %s213_s22 }
  0x99   :  { %s10919_s9 = scalar_lea.hbm %s12995_s13, 32 }
  0x9a   :  { %p10920_p6 = scmp.ne.s32.totalorder %s12995_s13, %s10919_s9  ;;  %p10923_p7 = scmp.lt.u32.totalorder %s10919_s9, %s12995_s13 }
  0x9c   :  { %p10925_p8 = pnand %p10923_p7, %p10920_p6 }
  0x9e   :  { %10928 = shalt.err (!%p10925_p8)
}
  0x9f   :  { %s10929_s11 = scalar_lea.vmem %s194_s28, 32  ;;  %p10934_p10 = scmp.lt.s32.totalorder %s194_s28, %s194_s28 }
  0xa0   :  { %p10930_p9 = scmp.ne.s32.totalorder %s194_s28, %s10929_s11  ;;  %p10935_p11 = scmp.lt.s32.totalorder %s10929_s11, %s10929_s11 }
  0xa2   :  { %p10936_p12 = por %p10935_p11, %p10934_p10 }
  0xa4   :  { %p10937_p13 = pnand %p10936_p12, %p10930_p9 }
  0xa6   :  { %10940 = shalt.err (!%p10937_p13)
}
  0xa7   :  { %196 = dma.hbm_to_vmem [thread:$0]  %s12995_s13, 32, %s194_s28, [#allocation23]  }
  0xa8   :  { %s10941_s23 = scalar_lea.hbm %s12997_s15, 32 }
  0xa9   :  { %p10942_p0 = scmp.ne.s32.totalorder %s12997_s15, %s10941_s23  ;;  %p10945_p1 = scmp.lt.u32.totalorder %s10941_s23, %s12997_s15 }
  0xab   :  { %p10947_p2 = pnand %p10945_p1, %p10942_p0 }
  0xad   :  { %10950 = shalt.err (!%p10947_p2)
}
  0xae   :  { %s10951_s9 = scalar_lea.vmem %s214_s22, 32  ;;  %p10956_p4 = scmp.lt.s32.totalorder %s214_s22, %s214_s22 }
  0xaf   :  { %p10952_p3 = scmp.ne.s32.totalorder %s214_s22, %s10951_s9  ;;  %p10957_p5 = scmp.lt.s32.totalorder %s10951_s9, %s10951_s9 }
  0xb1   :  { %p10958_p6 = por %p10957_p5, %p10956_p4 }
  0xb3   :  { %p10959_p7 = pnand %p10958_p6, %p10952_p3 }
  0xb5   :  { %10962 = shalt.err (!%p10959_p7)
}
  0xb6   :  { %216 = dma.hbm_to_vmem [thread:$0]  %s12997_s15, 32, %s214_s22, [#allocation26]  }
  0xb7   :  { %s11259_s1 = smov [#allocation28]   ;;  %s11260_s29 = smov [#allocation2]  }
  0xb8   :  { %s232_s26 = sshll.u32 %s11259_s1, 4  ;;  %s46_s7 = sshll.u32 %s11260_s29, 4  ;;  %s233_s26 = int_to_ptr.vmem [resolvable:$true] %s232_s26  ;;  %s11521_s7 = int_to_ptr.vmem [resolvable:$true] %s46_s7 }
  0xb9   :  { %s10963_s8 = scalar_lea.hbm %s12999_s17, 768 }
  0xba   :  { %p10964_p8 = scmp.ne.s32.totalorder %s12999_s17, %s10963_s8  ;;  %p10967_p9 = scmp.lt.u32.totalorder %s10963_s8, %s12999_s17 }
  0xbc   :  { %p10969_p10 = pnand %p10967_p9, %p10964_p8 }
  0xbe   :  { %10972 = shalt.err (!%p10969_p10)
}
  0xbf   :  { %s10973_s15 = scalar_lea.vmem %s233_s26, 768  ;;  %p10978_p12 = scmp.lt.s32.totalorder %s233_s26, %s233_s26 }
  0xc0   :  { %p10974_p11 = scmp.ne.s32.totalorder %s233_s26, %s10973_s15  ;;  %p10979_p13 = scmp.lt.s32.totalorder %s10973_s15, %s10973_s15 }
  0xc2   :  { %p10980_p0 = por %p10979_p13, %p10978_p12 }
  0xc4   :  { %p10981_p1 = pnand %p10980_p0, %p10974_p11 }
  0xc6   :  { %10984 = shalt.err (!%p10981_p1)
}
  0xc7   :  { %238 = dma.hbm_to_vmem [thread:$0]  %s12999_s17, 768, %s233_s26, [#allocation29], %s11251_s5, %s11251_s5, %s11252_s0  }
  0xc8   :  { %s13037_s9 = sld [smem:[#allocation44_spill]] }
  0xce   :  { %s10985_s13 = scalar_lea.hbm %s13037_s9, 1536 }
  0xcf   :  { %p10986_p2 = scmp.ne.s32.totalorder %s13037_s9, %s10985_s13  ;;  %p10989_p3 = scmp.lt.u32.totalorder %s10985_s13, %s13037_s9 }
  0xd1   :  { %p10991_p4 = pnand %p10989_p3, %p10986_p2 }
  0xd3   :  { %10994 = shalt.err (!%p10991_p4)
}
  0xd4   :  { %s10995_s2 = scalar_lea.vmem %s11521_s7, 1536  ;;  %p11000_p6 = scmp.lt.s32.totalorder %s11521_s7, %s11521_s7 }
  0xd5   :  { %p10996_p5 = scmp.ne.s32.totalorder %s11521_s7, %s10995_s2  ;;  %p11001_p7 = scmp.lt.s32.totalorder %s10995_s2, %s10995_s2 }
  0xd7   :  { %p11002_p8 = por %p11001_p7, %p11000_p6 }
  0xd9   :  { %p11003_p9 = pnand %p11002_p8, %p10996_p5 }
  0xdb   :  { %11006 = shalt.err (!%p11003_p9)
}
  0xdc   :  { %52 = dma.hbm_to_vmem [thread:$0]  %s13037_s9, 1536, %s11521_s7, [#allocation3], %s11251_s5, %s11251_s5, %s11252_s0  }
  0xdd   :  { %s11261_s8 = smov [#allocation6]   ;;  %s11262_s30 = smov [#allocation9]  }
  0xde   :  { %s70_s27 = sshll.u32 %s11261_s8, 4  ;;  %s95_s23 = sshll.u32 %s11262_s30, 4  ;;  %s71_s27 = int_to_ptr.vmem [resolvable:$true] %s70_s27  ;;  %s96_s23 = int_to_ptr.vmem [resolvable:$true] %s95_s23 }
  0xdf   :  { %s13038_s22 = sld [smem:[#allocation46_spill]] }
  0xe5   :  { %s11007_s3 = scalar_lea.hbm %s13038_s22, 768 }
  0xe6   :  { %p11008_p10 = scmp.ne.s32.totalorder %s13038_s22, %s11007_s3  ;;  %p11011_p11 = scmp.lt.u32.totalorder %s11007_s3, %s13038_s22 }
  0xe8   :  { %p11013_p12 = pnand %p11011_p11, %p11008_p10 }
  0xea   :  { %11016 = shalt.err (!%p11013_p12)
}
  0xeb   :  { %s11017_s7 = scalar_lea.vmem %s71_s27, 768  ;;  %p11022_p0 = scmp.lt.s32.totalorder %s71_s27, %s71_s27 }
  0xec   :  { %p11018_p13 = scmp.ne.s32.totalorder %s71_s27, %s11017_s7  ;;  %p11023_p1 = scmp.lt.s32.totalorder %s11017_s7, %s11017_s7 }
  0xee   :  { %p11024_p2 = por %p11023_p1, %p11022_p0 }
  0xf0   :  { %p11025_p3 = pnand %p11024_p2, %p11018_p13 }
  0xf2   :  { %11028 = shalt.err (!%p11025_p3)
}
  0xf3   :  { %76 = dma.hbm_to_vmem [thread:$0]  %s13038_s22, 768, %s71_s27, [#allocation5], %s11251_s5, %s11251_s5, %s11252_s0  }
  0xf4   :  { %s13039_s2 = sld [smem:[#allocation48_spill]] }
  0xfa   :  { %s11029_s17 = scalar_lea.hbm %s13039_s2, 32 }
  0xfb   :  { %p11030_p4 = scmp.ne.s32.totalorder %s13039_s2, %s11029_s17  ;;  %p11033_p5 = scmp.lt.u32.totalorder %s11029_s17, %s13039_s2 }
  0xfd   :  { %p11035_p6 = pnand %p11033_p5, %p11030_p4 }
  0xff   :  { %11038 = shalt.err (!%p11035_p6)
}
 0x100   :  { %s11039_s15 = scalar_lea.vmem %s96_s23, 32  ;;  %p11044_p8 = scmp.lt.s32.totalorder %s96_s23, %s96_s23 }
 0x101   :  { %p11040_p7 = scmp.ne.s32.totalorder %s96_s23, %s11039_s15  ;;  %p11045_p9 = scmp.lt.s32.totalorder %s11039_s15, %s11039_s15 }
 0x103   :  { %p11046_p10 = por %p11045_p9, %p11044_p8 }
 0x105   :  { %p11047_p11 = pnand %p11046_p10, %p11040_p7 }
 0x107   :  { %11050 = shalt.err (!%p11047_p11)
}
 0x108   :  { %98 = dma.hbm_to_vmem [thread:$0]  %s13039_s2, 32, %s96_s23, [#allocation8]  }
 0x109   :  { %s11263_s3 = smov [#allocation12]   ;;  %s11264_s24 = smov [#allocation15]  }
 0x10a   :  { %s116_s6 = sshll.u32 %s11263_s3, 4  ;;  %s138_s13 = sshll.u32 %s11264_s24, 4  ;;  %s117_s6 = int_to_ptr.vmem [resolvable:$true] %s116_s6  ;;  %s11585_s13 = int_to_ptr.vmem [resolvable:$true] %s138_s13 }
 0x10b   :  { %s13040_s9 = sld [smem:[#allocation50_spill]] }
 0x111   :  { %s11051_s1 = scalar_lea.hbm %s13040_s9, 768 }
 0x112   :  { %p11052_p12 = scmp.ne.s32.totalorder %s13040_s9, %s11051_s1  ;;  %p11055_p13 = scmp.lt.u32.totalorder %s11051_s1, %s13040_s9 }
 0x114   :  { %p11057_p0 = pnand %p11055_p13, %p11052_p12 }
 0x116   :  { %11060 = shalt.err (!%p11057_p0)
}
 0x117   :  { %s11061_s23 = scalar_lea.vmem %s117_s6, 768  ;;  %p11066_p2 = scmp.lt.s32.totalorder %s117_s6, %s117_s6 }
 0x118   :  { %p11062_p1 = scmp.ne.s32.totalorder %s117_s6, %s11061_s23  ;;  %p11067_p3 = scmp.lt.s32.totalorder %s11061_s23, %s11061_s23 }
 0x11a   :  { %p11068_p4 = por %p11067_p3, %p11066_p2 }
 0x11c   :  { %p11069_p5 = pnand %p11068_p4, %p11062_p1 }
 0x11e   :  { %11072 = shalt.err (!%p11069_p5)
}
 0x11f   :  { %122 = dma.hbm_to_vmem [thread:$0]  %s13040_s9, 768, %s117_s6, [#allocation11], %s11251_s5, %s11251_s5, %s11252_s0  }
 0x120   :  { %s13041_s15 = sld [smem:[#allocation52_spill]] }
 0x126   :  { %s11073_s27 = scalar_lea.hbm %s13041_s15, 256 }
 0x127   :  { %p11074_p6 = scmp.ne.s32.totalorder %s13041_s15, %s11073_s27  ;;  %p11077_p7 = scmp.lt.u32.totalorder %s11073_s27, %s13041_s15 }
 0x129   :  { %p11079_p8 = pnand %p11077_p7, %p11074_p6 }
 0x12b   :  { %11082 = shalt.err (!%p11079_p8)
}
 0x12c   :  { %s11083_s7 = scalar_lea.vmem %s11585_s13, 256  ;;  %p11088_p10 = scmp.lt.s32.totalorder %s11585_s13, %s11585_s13 }
 0x12d   :  { %p11084_p9 = scmp.ne.s32.totalorder %s11585_s13, %s11083_s7  ;;  %p11089_p11 = scmp.lt.s32.totalorder %s11083_s7, %s11083_s7 }
 0x12f   :  { %p11090_p12 = por %p11089_p11, %p11088_p10 }
 0x131   :  { %p11091_p13 = pnand %p11090_p12, %p11084_p9 }
 0x133   :  { %11094 = shalt.err (!%p11091_p13)
}
 0x134   :  { %144 = dma.hbm_to_vmem [thread:$0]  %s13041_s15, 256, %s11585_s13, [#allocation14], %s11251_s5, %s11251_s5, %s11252_s0  }
 0x135   :  { %s11265_s1 = smov [#allocation18]   ;;  %s11266_s11 = smov [#allocation21]  }
 0x136   :  { %s163_s29 = sshll.u32 %s11265_s1, 4  ;;  %s183_s17 = sshll.u32 %s11266_s11, 4  ;;  %s164_s29 = int_to_ptr.vmem [resolvable:$true] %s163_s29  ;;  %s184_s17 = int_to_ptr.vmem [resolvable:$true] %s183_s17 }
 0x137   :  { %s11095_s2 = scalar_lea.hbm %s12992_s10, 32 }
 0x138   :  { %p11096_p0 = scmp.ne.s32.totalorder %s12992_s10, %s11095_s2  ;;  %p11099_p1 = scmp.lt.u32.totalorder %s11095_s2, %s12992_s10 }
 0x13a   :  { %p11101_p2 = pnand %p11099_p1, %p11096_p0 }
 0x13c   :  { %11104 = shalt.err (!%p11101_p2)
}
 0x13d   :  { %s11105_s13 = scalar_lea.vmem %s164_s29, 32  ;;  %p11110_p4 = scmp.lt.s32.totalorder %s164_s29, %s164_s29 }
 0x13e   :  { %p11106_p3 = scmp.ne.s32.totalorder %s164_s29, %s11105_s13  ;;  %p11111_p5 = scmp.lt.s32.totalorder %s11105_s13, %s11105_s13 }
 0x140   :  { %p11112_p6 = por %p11111_p5, %p11110_p4 }
 0x142   :  { %p11113_p7 = pnand %p11112_p6, %p11106_p3 }
 0x144   :  { %11116 = shalt.err (!%p11113_p7)
}
 0x145   :  { %166 = dma.hbm_to_vmem [thread:$0]  %s12992_s10, 32, %s164_s29, [#allocation17]  }
 0x146   :  { %s11117_s28 = scalar_lea.hbm %s12994_s12, 128 }
 0x147   :  { %p11118_p8 = scmp.ne.s32.totalorder %s12994_s12, %s11117_s28  ;;  %p11121_p9 = scmp.lt.u32.totalorder %s11117_s28, %s12994_s12 }
 0x149   :  { %p11123_p10 = pnand %p11121_p9, %p11118_p8 }
 0x14b   :  { %11126 = shalt.err (!%p11123_p10)
}
 0x14c   :  { %s11127_s11 = scalar_lea.vmem %s184_s17, 128  ;;  %p11132_p12 = scmp.lt.s32.totalorder %s184_s17, %s184_s17 }
 0x14d   :  { %p11128_p11 = scmp.ne.s32.totalorder %s184_s17, %s11127_s11  ;;  %p11133_p13 = scmp.lt.s32.totalorder %s11127_s11, %s11127_s11 }
 0x14f   :  { %p11134_p0 = por %p11133_p13, %p11132_p12 }
 0x151   :  { %p11135_p1 = pnand %p11134_p0, %p11128_p11 }
 0x153   :  { %11138 = shalt.err (!%p11135_p1)
}
 0x154   :  { %186 = dma.hbm_to_vmem [thread:$0]  %s12994_s12, 128, %s184_s17, [#allocation20]  }
 0x155   :  { %s11267_s26 = smov [#allocation24]   ;;  %s11268_s2 = smov [#allocation27]  }
 0x156   :  { %s203_s23 = sshll.u32 %s11267_s26, 4  ;;  %s223_s8 = sshll.u32 %s11268_s2, 4  ;;  %s204_s23 = int_to_ptr.vmem [resolvable:$true] %s203_s23  ;;  %s224_s8 = int_to_ptr.vmem [resolvable:$true] %s223_s8 }
 0x157   :  { %s11139_s27 = scalar_lea.hbm %s12996_s14, 64 }
 0x158   :  { %p11140_p2 = scmp.ne.s32.totalorder %s12996_s14, %s11139_s27  ;;  %p11143_p3 = scmp.lt.u32.totalorder %s11139_s27, %s12996_s14 }
 0x15a   :  { %p11145_p4 = pnand %p11143_p3, %p11140_p2 }
 0x15c   :  { %11148 = shalt.err (!%p11145_p4)
}
 0x15d   :  { %s11149_s12 = scalar_lea.vmem %s204_s23, 64  ;;  %p11154_p6 = scmp.lt.s32.totalorder %s204_s23, %s204_s23 }
 0x15e   :  { %p11150_p5 = scmp.ne.s32.totalorder %s204_s23, %s11149_s12  ;;  %p11155_p7 = scmp.lt.s32.totalorder %s11149_s12, %s11149_s12 }
 0x160   :  { %p11156_p8 = por %p11155_p7, %p11154_p6 }
 0x162   :  { %p11157_p9 = pnand %p11156_p8, %p11150_p5 }
 0x164   :  { %11160 = shalt.err (!%p11157_p9)
}
 0x165   :  { %206 = dma.hbm_to_vmem [thread:$0]  %s12996_s14, 64, %s204_s23, [#allocation23]  }
 0x166   :  { %s11161_s6 = scalar_lea.hbm %s12998_s16, 32 }
 0x167   :  { %p11162_p10 = scmp.ne.s32.totalorder %s12998_s16, %s11161_s6  ;;  %p11165_p11 = scmp.lt.u32.totalorder %s11161_s6, %s12998_s16 }
 0x169   :  { %p11167_p12 = pnand %p11165_p11, %p11162_p10 }
 0x16b   :  { %11170 = shalt.err (!%p11167_p12)
}
 0x16c   :  { %s11171_s29 = scalar_lea.vmem %s224_s8, 32  ;;  %p11176_p0 = scmp.lt.s32.totalorder %s224_s8, %s224_s8 }
 0x16d   :  { %p11172_p13 = scmp.ne.s32.totalorder %s224_s8, %s11171_s29  ;;  %p11177_p1 = scmp.lt.s32.totalorder %s11171_s29, %s11171_s29 }
 0x16f   :  { %p11178_p2 = por %p11177_p1, %p11176_p0 }
 0x171   :  { %p11179_p3 = pnand %p11178_p2, %p11172_p13 }
 0x173   :  { %11182 = shalt.err (!%p11179_p3)
}
 0x174   :  { %226 = dma.hbm_to_vmem [thread:$0]  %s12998_s16, 32, %s224_s8, [#allocation26]  }
 0x175   :  { %s11269_s23 = smov [#allocation30]   ;;  %s11270_s30 = smov [#allocation31]  }
 0x176   :  { %s246_s2 = sshll.u32 %s11269_s23, 4  ;;  %s260_s4 = sshll.u32 %s11270_s30, 4  ;;  %s247_s2 = int_to_ptr.vmem [resolvable:$true] %s246_s2  ;;  %s11670_s4 = int_to_ptr.vmem [resolvable:$true] %s260_s4 }
 0x177   :  { %s11183_s15 = scalar_lea.hbm %s13001_s19, 384 }
 0x178   :  { %p11184_p4 = scmp.ne.s32.totalorder %s13001_s19, %s11183_s15  ;;  %p11187_p5 = scmp.lt.u32.totalorder %s11183_s15, %s13001_s19 }
 0x17a   :  { %p11189_p6 = pnand %p11187_p5, %p11184_p4 }
 0x17c   :  { %11192 = shalt.err (!%p11189_p6)
}
 0x17d   :  { %s11193_s16 = scalar_lea.vmem %s247_s2, 384  ;;  %p11198_p8 = scmp.lt.s32.totalorder %s247_s2, %s247_s2 }
 0x17e   :  { %p11194_p7 = scmp.ne.s32.totalorder %s247_s2, %s11193_s16  ;;  %p11199_p9 = scmp.lt.s32.totalorder %s11193_s16, %s11193_s16 }
 0x180   :  { %p11200_p10 = por %p11199_p9, %p11198_p8 }
 0x182   :  { %p11201_p11 = pnand %p11200_p10, %p11194_p7 }
 0x184   :  { %11204 = shalt.err (!%p11201_p11)
}
 0x185   :  { %252 = dma.hbm_to_vmem [thread:$0]  %s13001_s19, 384, %s247_s2, [#allocation29], %s11251_s5, %s11251_s5, %s11252_s0  }
 0x186   :  { %s11205_s6 = scalar_lea.hbm %s13003_s21, 256 }
 0x187   :  { %p11206_p12 = scmp.ne.s32.totalorder %s13003_s21, %s11205_s6  ;;  %p11209_p13 = scmp.lt.u32.totalorder %s11205_s6, %s13003_s21 }
 0x189   :  { %p11211_p0 = pnand %p11209_p13, %p11206_p12 }
 0x18b   :  { %11214 = shalt.err (!%p11211_p0)
}
 0x18c   :  { %s11215_s29 = scalar_lea.vmem %s11670_s4, 256  ;;  %p11220_p2 = scmp.lt.s32.totalorder %s11670_s4, %s11670_s4 }
 0x18d   :  { %p11216_p1 = scmp.ne.s32.totalorder %s11670_s4, %s11215_s29  ;;  %p11221_p3 = scmp.lt.s32.totalorder %s11215_s29, %s11215_s29 }
 0x18f   :  { %p11222_p4 = por %p11221_p3, %p11220_p2 }
 0x191   :  { %p11223_p5 = pnand %p11222_p4, %p11216_p1 }
 0x193   :  { %11226 = shalt.err (!%p11223_p5)
}
 0x194   :  { %266 = dma.hbm_to_vmem [thread:$0]  %s13003_s21, 256, %s11670_s4, [#allocation32], %s11251_s5, %s11251_s5, %s11252_s0  }
 0x195   :  { %11227 = dma.done.wait [#allocation3], 1536  }
 0x196   :  { %11228 = vsyncadd [#allocation3], 4294965760 }
 0x197   :  { %11229 = dma.done.wait [#allocation5], 2304  }
 0x198   :  { %11230 = vsyncadd [#allocation5], 4294964992 }
 0x199   :  { %11231 = dma.done.wait [#allocation8], 1568  }
 0x19a   :  { %11232 = vsyncadd [#allocation8], 4294965728 }
 0x19b   :  { %11233 = dma.done.wait [#allocation11], 1152  }
 0x19c   :  { %11234 = vsyncadd [#allocation11], 4294966144 }
 0x19d   :  { %11235 = dma.done.wait [#allocation14], 288  }
 0x19e   :  { %11236 = vsyncadd [#allocation14], 4294967008 }
 0x19f   :  { %11237 = dma.done.wait [#allocation17], 416  }
 0x1a0   :  { %11238 = vsyncadd [#allocation17], 4294966880 }
 0x1a1   :  { %11239 = dma.done.wait [#allocation20], 256  }
 0x1a2   :  { %11240 = vsyncadd [#allocation20], 4294967040 }
 0x1a3   :  { %11241 = dma.done.wait [#allocation23], 96  }
 0x1a4   :  { %11242 = vsyncadd [#allocation23], 4294967200 }
 0x1a5   :  { %11243 = dma.done.wait [#allocation26], 64  }
 0x1a6   :  { %11244 = vsyncadd [#allocation26], 4294967232 }
 0x1a7   :  { %11245 = dma.done.wait [#allocation29], 1152  }
 0x1a8   :  { %11246 = vsyncadd [#allocation29], 4294966144 }
 0x1a9   :  { %11247 = dma.done.wait [#allocation32], 256  }
 0x1aa   :  { %11248 = vsyncadd [#allocation32], 4294967040  ;;  %v357_v0 = vld [vmem:[#allocation6] sm:$0xff]  ;;  %v358_v1 = vld [vmem:[#allocation6 + $0x8] sm:$0xff]  ;;  %vm376_vm0 = vcmask 392192   ;;  %vm538_vm1 = vcmask 785408  }
 0x1ab   :  { %v359_v2 = vld [vmem:[#allocation6 + $0x10] sm:$0xff]  ;;  %v11707_v3 = vpack.c.bf16 %v358_v1, %v357_v0  ;;  %v360_v4 = vld [vmem:[#allocation6 + $0x18] sm:$0xff]  ;;  %v361_v6 = vld [vmem:[#allocation6 + $0x20] sm:$0xff]  ;;  %vm11272_vm2 = vmmov 0   ;;  %vm2338_vm3 = vcmask 1043456   ;;  %vm11274_vm4 = vmmov 1  }
 0x1ac   :  { %v11709_v5 = vpack.c.bf16 %v360_v4, %v359_v2  ;;  %v362_v7 = vld [vmem:[#allocation6 + $0x28] sm:$0xff]  ;;  %v11711_v8 = vld [vmem:[#allocation2] sm:$0xff]  ;;  %v11725_v11 = vld [vmem:[#allocation2 + $0x10] sm:$0xff]  ;;  %vm2334_vm6 = vcmask 752640   ;;  %vm2412_vm7 = vcmask 369664   ;;  %vm2416_vm8 = vcmask 42024  }
 0x1ad   :  { %10165 = vmatprep.subr.bf16.mxu0 %v11707_v3  ;;  %8960 = vmatprep.mubr.msk.f32.mxu0 %vm376_vm0, %v11711_v8  ;;  %v11718_v9 = vpack.c.bf16 %v362_v7, %v361_v6  ;;  %v11723_v10 = vld [vmem:[#allocation2 + $0x8] sm:$0xff]  ;;  %v11732_v12 = vld [vmem:[#allocation2 + $0x18] sm:$0xff]  ;;  %v11735_v13 = vld [vmem:[#allocation2 + $0x20] sm:$0xff]  ;;  %v1022_v33 = vmul.f32 %v11711_v8, %v11711_v8  ;;  %v1024_v35 = vmul.f32 %v11725_v11, %v11725_v11  ;;  %vm2494_vm9 = vcmask 1024   ;;  %s13044_s10 = sld [smem:[#allocation54_spill]]  ;;  %s13045_s26 = sld [smem:[#allocation55_spill]] }
 0x1ae   :  { %10167 = vmatpush3.bf16.msra.mxu0 %v11707_v3  ;;  %v11742_v14 = vld [vmem:[#allocation2 + $0x28] sm:$0xff]  ;;  %v11745_v15 = vld [vmem:[#allocation2 + $0x30] sm:$0xff]  ;;  %v11752_v16 = vld [vmem:[#allocation2 + $0x38] sm:$0xff]  ;;  %v1023_v34 = vmul.f32 %v11723_v10, %v11723_v10  ;;  %v1025_v36 = vmul.f32 %v11732_v12, %v11732_v12  ;;  %v1026_v37 = vmul.f32 %v11735_v13, %v11735_v13  ;;  %vm2976_vm10 = vcmask 195584   ;;  %s13046_s30 = sld [smem:[#allocation56_spill]]  ;;  %s11275_s13 = smov 4  }
 0x1af   :  { %10169 = vmatprep.subr.bf16.mxu0 %v11709_v5  ;;  %v11755_v17 = vld [vmem:[#allocation2 + $0x40] sm:$0xff]  ;;  %v11762_v18 = vld [vmem:[#allocation2 + $0x48] sm:$0xff]  ;;  %v11764_v19 = vld [vmem:[#allocation2 + $0x50] sm:$0xff]  ;;  %v1027_v38 = vmul.f32 %v11742_v14, %v11742_v14  ;;  %v1028_v39 = vmul.f32 %v11745_v15, %v11745_v15  ;;  %v1029_v40 = vmul.f32 %v11752_v16, %v11752_v16  ;;  %vm4125_vm11 = vcmask 359424  }
 0x1b0   :  { %v11770_v20 = vld [vmem:[#allocation2 + $0x58] sm:$0xff]  ;;  %v11772_v21 = vld [vmem:[#allocation4] sm:$0xff]  ;;  %v11778_v22 = vld [vmem:[#allocation4 + $0x8] sm:$0xff]  ;;  %v1030_v41 = vmul.f32 %v11755_v17, %v11755_v17  ;;  %v1031_v42 = vmul.f32 %v11762_v18, %v11762_v18  ;;  %v1032_v43 = vmul.f32 %v11764_v19, %v11764_v19  ;;  %vm4202_vm12 = vcmask 173056  }
 0x1b1   :  { %v11780_v23 = vld [vmem:[#allocation4 + $0x10] sm:$0xff]  ;;  %v11786_v24 = vld [vmem:[#allocation4 + $0x18] sm:$0xff]  ;;  %v11789_v25 = vld [vmem:[#allocation4 + $0x20] sm:$0xff]  ;;  %v1033_v44 = vmul.f32 %v11770_v20, %v11770_v20  ;;  %v1332_v45 = vmul.f32 %v11772_v21, %v11772_v21  ;;  %v1333_v46 = vmul.f32 %v11778_v22, %v11778_v22  ;;  %v1642_v57 = vmul.f32 %v11772_v21, %v11711_v8 }
 0x1b2   :  { %10171 = vmatpush3.bf16.msra.mxu0 %v11709_v5  ;;  %v11796_v26 = vld [vmem:[#allocation4 + $0x28] sm:$0xff]  ;;  %v11799_v27 = vld [vmem:[#allocation4 + $0x30] sm:$0xff]  ;;  %v11806_v28 = vld [vmem:[#allocation4 + $0x38] sm:$0xff]  ;;  %v1334_v47 = vmul.f32 %v11780_v23, %v11780_v23  ;;  %v1335_v48 = vmul.f32 %v11786_v24, %v11786_v24  ;;  %v1336_v49 = vmul.f32 %v11789_v25, %v11789_v25  ;;  %v1643_v58 = vmul.f32 %v11778_v22, %v11723_v10 }
 0x1b3   :  { %10173 = vmatprep.subr.bf16.mxu0 %v11718_v9  ;;  %v11809_v29 = vld [vmem:[#allocation4 + $0x40] sm:$0xff]  ;;  %v11816_v30 = vld [vmem:[#allocation4 + $0x48] sm:$0xff]  ;;  %v11818_v31 = vld [vmem:[#allocation4 + $0x50] sm:$0xff]  ;;  %v1337_v50 = vmul.f32 %v11796_v26, %v11796_v26  ;;  %v1338_v51 = vmul.f32 %v11799_v27, %v11799_v27  ;;  %v1339_v52 = vmul.f32 %v11806_v28, %v11806_v28  ;;  %v1644_v59 = vmul.f32 %v11780_v23, %v11725_v11 }
 0x1b4   :  { %v11824_v32 = vld [vmem:[#allocation4 + $0x58] sm:$0xff]  ;;  %v1340_v53 = vmul.f32 %v11809_v29, %v11809_v29  ;;  %v1341_v54 = vmul.f32 %v11816_v30, %v11816_v30  ;;  %v1342_v55 = vmul.f32 %v11818_v31, %v11818_v31  ;;  %v1645_v60 = vmul.f32 %v11786_v24, %v11732_v12  ;;  %vm12246_vm5 = vmpackc.low %vm2338_vm3, %vm11274_vm4 }
 0x1b5   :  { %v1343_v56 = vmul.f32 %v11824_v32, %v11824_v32  ;;  %v1646_v61 = vmul.f32 %v11789_v25, %v11735_v13  ;;  %v1647_v62 = vmul.f32 %v11796_v26, %v11742_v14  ;;  %v1648_v63 = vmul.f32 %v11799_v27, %v11745_v15 }
 0x1b6   :  { %10175 = vmatpush3.bf16.msra.mxu0 %v11718_v9  ;;  %v1649_v0 = vmul.f32 %v11806_v28, %v11752_v16  ;;  %v1650_v1 = vmul.f32 %v11809_v29, %v11755_v17  ;;  %v1651_v2 = vmul.f32 %v11816_v30, %v11762_v18  ;;  %v2024_v4 = vsub.f32 %v11711_v8, %v11772_v21 }
 0x1b7   :  { %10201 = vmatprep.subr.bf16.mxu0 %v11707_v3  ;;  %v2025_v6 = vsub.f32 %v11723_v10, %v11778_v22  ;;  %v1653_v7 = vmul.f32 %v11824_v32, %v11770_v20  ;;  %v2026_v8 = vsub.f32 %v11725_v11, %v11780_v23  ;;  %vm4206_vm13 = vcmask 9224  }
 0x1b8   :  { %vm4579_vm14 = vcmask 97280   ;;  %vm5482_vm15 = vcmask 162816   ;;  %vm5891_vm4 = vcmask 48128  }
 0x1b9   :  { %8961 = vmatmul.mubr.msk.f32.vlgmr.msra.gmra.mrb[0].mxu0 %vm376_vm0, %v11723_v10  ;;  %v2038_v10 = vand.u32 2147483647, %v2026_v8  ;;  %v12027_v8 = vld [vmem:[#allocation7 + $0x50] sm:$0xff] }
 0x1ba   :  { %8963 = vmatprep.mubr.msk.f32.mxu0 %vm376_vm0, %v11725_v11  ;;  %10203 = vmatpush3.bf16.msra.mxu0 %v11707_v3 }
 0x1bb   :  { %10205 = vmatprep.subr.bf16.mxu0 %v11709_v5 }
 0x1bd   :  { %8964 = vmatmul.mubr.msk.f32.gmra.mrb[2].mxu0 %vm376_vm0, %v11732_v12 }
 0x1be   :  { %8966 = vmatprep.mubr.msk.f32.mxu0 %vm376_vm0, %v11735_v13  ;;  %10207 = vmatpush3.bf16.msra.mxu0 %v11709_v5 }
 0x1bf   :  { %10209 = vmatprep.subr.bf16.mxu0 %v11718_v9 }
 0x1c1   :  { %8967 = vmatmul.mubr.msk.f32.gmra.mrb[4].mxu0 %vm376_vm0, %v11742_v14 }
 0x1c2   :  { %8969 = vmatprep.mubr.msk.f32.mxu0 %vm376_vm0, %v11745_v15  ;;  %10211 = vmatpush3.bf16.msra.mxu0 %v11718_v9 }
 0x1c3   :  { %10237 = vmatprep.subr.bf16.mxu0 %v11707_v3 }
 0x1c5   :  { %8970 = vmatmul.mubr.msk.f32.gmra.mrb[6].mxu0 %vm376_vm0, %v11752_v16 }
 0x1c6   :  { %8972 = vmatprep.mubr.msk.f32.mxu0 %vm376_vm0, %v11755_v17 }
 0x1c9   :  { %8973 = vmatmul.mubr.msk.f32.gmra.mrb[8].mxu0 %vm376_vm0, %v11762_v18 }
 0x1ca   :  { %8975 = vmatprep.mubr.msk.f32.mxu0 %vm376_vm0, %v11764_v19 }
 0x1cd   :  { %8976 = vmatmul.mubr.msk.f32.gmra.mrb[10].mxu0 %vm376_vm0, %v11770_v20 }
 0x1ce   :  { %9032 = vmatprep.mubr.msk.f32.mxu0 %vm376_vm0, %v11772_v21  ;;  %v2037_v21 = vand.u32 2147483647, %v2025_v6 }
 0x1d1   :  { %9033 = vmatmul.mubr.msk.f32.vlgmr.msra.gmra.mrb[12].mxu0 %vm376_vm0, %v11778_v22  ;;  %v2028_v22 = vsub.f32 %v11735_v13, %v11789_v25 }
 0x1d2   :  { %9035 = vmatprep.mubr.msk.f32.mxu0 %vm376_vm0, %v11780_v23  ;;  %10239 = vmatpush3.bf16.msra.mxu0 %v11707_v3  ;;  %v2030_v23 = vsub.f32 %v11745_v15, %v11799_v27 }
 0x1d3   :  { %10241 = vmatprep.subr.bf16.mxu0 %v11709_v5  ;;  %v2040_v11 = vand.u32 2147483647, %v2028_v22 }
 0x1d4   :  { %v2042_v13 = vand.u32 2147483647, %v2030_v23 }
 0x1d5   :  { %9036 = vmatmul.mubr.msk.f32.gmra.mrb[14].mxu0 %vm376_vm0, %v11786_v24 }
 0x1d6   :  { %9038 = vmatprep.mubr.msk.f32.mxu0 %vm376_vm0, %v11789_v25  ;;  %10243 = vmatpush3.bf16.msra.mxu0 %v11709_v5  ;;  %v2032_v25 = vsub.f32 %v11755_v17, %v11809_v29 }
 0x1d7   :  { %10245 = vmatprep.subr.bf16.mxu0 %v11718_v9 }
 0x1d8   :  { %v2044_v15 = vand.u32 2147483647, %v2032_v25 }
 0x1d9   :  { %9039 = vmatmul.mubr.msk.f32.gmra.mrb[16].mxu0 %vm376_vm0, %v11796_v26 }
 0x1da   :  { %9041 = vmatprep.mubr.msk.f32.mxu0 %vm376_vm0, %v11799_v27  ;;  %10247 = vmatpush3.bf16.msra.mxu0 %v11718_v9  ;;  %v2034_v27 = vsub.f32 %v11764_v19, %v11818_v31 }
 0x1db   :  { %10273 = vmatprep.subr.bf16.mxu0 %v11707_v3 }
 0x1dc   :  { %v2046_v17 = vand.u32 2147483647, %v2034_v27 }
 0x1dd   :  { %9042 = vmatmul.mubr.msk.f32.gmra.mrb[18].mxu0 %vm376_vm0, %v11806_v28 }
 0x1de   :  { %9044 = vmatprep.mubr.msk.f32.mxu0 %vm376_vm0, %v11809_v29 }
 0x1e1   :  { %9045 = vmatmul.mubr.msk.f32.gmra.mrb[20].mxu0 %vm376_vm0, %v11816_v30 }
 0x1e2   :  { %9047 = vmatprep.mubr.msk.f32.mxu0 %vm376_vm0, %v11818_v31 }
 0x1e5   :  { %9048 = vmatmul.mubr.msk.f32.gmra.mrb[22].mxu0 %vm376_vm0, %v11824_v32 }
 0x1e6   :  { %9104 = vmatprep.mubr.msk.f32.mxu0 %vm376_vm0, %v1022_v33  ;;  %v2027_v33 = vsub.f32 %v11732_v12, %v11786_v24  ;;  %v2031_v24 = vsub.f32 %v11752_v16, %v11806_v28  ;;  %v2035_v28 = vsub.f32 %v11770_v20, %v11824_v32 }
 0x1e8   :  { %v2047_v29 = vand.u32 2147483647, %v2035_v28 }
 0x1e9   :  { %9105 = vmatmul.mubr.msk.f32.vlgmr.msra.gmra.mrb[24].mxu0 %vm376_vm0, %v1023_v34  ;;  %v2039_v34 = vand.u32 2147483647, %v2027_v33 }
 0x1ea   :  { %9107 = vmatprep.mubr.msk.f32.mxu0 %vm376_vm0, %v1024_v35  ;;  %10275 = vmatpush3.bf16.msra.mxu0 %v11707_v3  ;;  %v2029_v35 = vsub.f32 %v11742_v14, %v11796_v26  ;;  %v2043_v14 = vand.u32 2147483647, %v2031_v24  ;;  %v2033_v26 = vsub.f32 %v11762_v18, %v11816_v30 }
 0x1eb   :  { %10277 = vmatprep.subr.bf16.mxu0 %v11709_v5 }
 0x1ec   :  { %v2041_v12 = vand.u32 2147483647, %v2029_v35  ;;  %v2045_v16 = vand.u32 2147483647, %v2033_v26 }
 0x1ed   :  { %9108 = vmatmul.mubr.msk.f32.gmra.mrb[26].mxu0 %vm376_vm0, %v1025_v36 }
 0x1ee   :  { %9110 = vmatprep.mubr.msk.f32.mxu0 %vm376_vm0, %v1026_v37  ;;  %10279 = vmatpush3.bf16.msra.mxu0 %v11709_v5 }
 0x1ef   :  { %10281 = vmatprep.subr.bf16.mxu0 %v11718_v9 }
 0x1f1   :  { %9111 = vmatmul.mubr.msk.f32.gmra.mrb[28].mxu0 %vm376_vm0, %v1027_v38 }
 0x1f2   :  { %9113 = vmatprep.mubr.msk.f32.mxu0 %vm376_vm0, %v1028_v39  ;;  %10283 = vmatpush3.bf16.msra.mxu0 %v11718_v9 }
 0x1f3   :  { %10309 = vmatprep.subr.bf16.mxu0 %v11707_v3 }
 0x1f5   :  { %9114 = vmatmul.mubr.msk.f32.gmra.mrb[30].mxu0 %vm376_vm0, %v1029_v40 }
 0x1f6   :  { %9116 = vmatprep.mubr.msk.f32.mxu0 %vm376_vm0, %v1030_v41 }
 0x1f9   :  { %9117 = vmatmul.mubr.msk.f32.gmra.mrb[32].mxu0 %vm376_vm0, %v1031_v42 }
 0x1fa   :  { %9119 = vmatprep.mubr.msk.f32.mxu0 %vm376_vm0, %v1032_v43 }
 0x1fd   :  { %9120 = vmatmul.mubr.msk.f32.gmra.mrb[34].mxu0 %vm376_vm0, %v1033_v44 }
 0x1fe   :  { %9176 = vmatprep.mubr.msk.f32.mxu0 %vm376_vm0, %v1332_v45 }
 0x201   :  { %9177 = vmatmul.mubr.msk.f32.vlgmr.msra.gmra.mrb[36].mxu0 %vm376_vm0, %v1333_v46 }
 0x202   :  { %9179 = vmatprep.mubr.msk.f32.mxu0 %vm376_vm0, %v1334_v47  ;;  %10311 = vmatpush3.bf16.msra.mxu0 %v11707_v3 }
 0x203   :  { %10313 = vmatprep.subr.bf16.mxu0 %v11709_v5 }
 0x205   :  { %9180 = vmatmul.mubr.msk.f32.gmra.mrb[38].mxu0 %vm376_vm0, %v1335_v48 }
 0x206   :  { %9182 = vmatprep.mubr.msk.f32.mxu0 %vm376_vm0, %v1336_v49  ;;  %10315 = vmatpush3.bf16.msra.mxu0 %v11709_v5 }
 0x207   :  { %10317 = vmatprep.subr.bf16.mxu0 %v11718_v9 }
 0x209   :  { %9183 = vmatmul.mubr.msk.f32.gmra.mrb[40].mxu0 %vm376_vm0, %v1337_v50  ;;  %v11993_v50 = vld [vmem:[#allocation7 + $0x8] sm:$0xff] }
 0x20a   :  { %9185 = vmatprep.mubr.msk.f32.mxu0 %vm376_vm0, %v1338_v51  ;;  %10319 = vmatpush3.bf16.msra.mxu0 %v11718_v9 }
 0x20b   :  { %10345 = vmatprep.subr.bf16.mxu0 %v11707_v3 }
 0x20d   :  { %9186 = vmatmul.mubr.msk.f32.gmra.mrb[42].mxu0 %vm376_vm0, %v1339_v52  ;;  %v11995_v52 = vld [vmem:[#allocation7 + $0x10] sm:$0xff] }
 0x20e   :  { %9188 = vmatprep.mubr.msk.f32.mxu0 %vm376_vm0, %v1340_v53 }
 0x211   :  { %9189 = vmatmul.mubr.msk.f32.gmra.mrb[44].mxu0 %vm376_vm0, %v1341_v54 }
 0x212   :  { %9191 = vmatprep.mubr.msk.f32.mxu0 %vm376_vm0, %v1342_v55  ;;  %v12001_v55 = vld [vmem:[#allocation7 + $0x18] sm:$0xff] }
 0x215   :  { %9192 = vmatmul.mubr.msk.f32.gmra.mrb[46].mxu0 %vm376_vm0, %v1343_v56 }
 0x216   :  { %9248 = vmatprep.mubr.msk.f32.mxu0 %vm376_vm0, %v1642_v57  ;;  %v12003_v57 = vld [vmem:[#allocation7 + $0x20] sm:$0xff] }
 0x219   :  { %9249 = vmatmul.mubr.msk.f32.vlgmr.msra.gmra.mrb[48].mxu0 %vm376_vm0, %v1643_v58 }
 0x21a   :  { %9251 = vmatprep.mubr.msk.f32.mxu0 %vm376_vm0, %v1644_v59  ;;  %10347 = vmatpush3.bf16.msra.mxu0 %v11707_v3  ;;  %v1652_v3 = vmul.f32 %v11818_v31, %v11764_v19 }
 0x21b   :  { %10349 = vmatprep.subr.bf16.mxu0 %v11709_v5 }
 0x21d   :  { %9252 = vmatmul.mubr.msk.f32.gmra.mrb[50].mxu0 %vm376_vm0, %v1645_v60  ;;  %v12009_v60 = vld [vmem:[#allocation7 + $0x28] sm:$0xff] }
 0x21e   :  { %9254 = vmatprep.mubr.msk.f32.mxu0 %vm376_vm0, %v1646_v61  ;;  %10351 = vmatpush3.bf16.msra.mxu0 %v11709_v5  ;;  %v11950_v5 = vld [vmem:[#allocation7] sm:$0xff] }
 0x21f   :  { %10353 = vmatprep.subr.bf16.mxu0 %v11718_v9  ;;  %9002 = vmatprep.mubr.msk.f32.mxu1 %vm538_vm1, %v11950_v5 }
 0x221   :  { %9255 = vmatmul.mubr.msk.f32.gmra.mrb[52].mxu0 %vm376_vm0, %v1647_v62  ;;  %v12011_v62 = vld [vmem:[#allocation7 + $0x30] sm:$0xff] }
 0x222   :  { %9257 = vmatprep.mubr.msk.f32.mxu0 %vm376_vm0, %v1648_v63  ;;  %10355 = vmatpush3.bf16.msra.mxu0 %v11718_v9  ;;  %v2036_v9 = vand.u32 2147483647, %v2024_v4 }
 0x225   :  { %9258 = vmatmul.mubr.msk.f32.gmra.mrb[54].mxu0 %vm376_vm0, %v1649_v0 }
 0x226   :  { %9260 = vmatprep.mubr.msk.f32.mxu0 %vm376_vm0, %v1650_v1  ;;  %v12017_v1 = vld [vmem:[#allocation7 + $0x38] sm:$0xff] }
 0x229   :  { %9261 = vmatmul.mubr.msk.f32.gmra.mrb[56].mxu0 %vm376_vm0, %v1651_v2 }
 0x22a   :  { %9263 = vmatprep.mubr.msk.f32.mxu0 %vm376_vm0, %v1652_v3  ;;  %v12019_v3 = vld [vmem:[#allocation7 + $0x40] sm:$0xff] }
 0x22d   :  { %9264 = vmatmul.mubr.msk.f32.gmra.mrb[58].mxu0 %vm376_vm0, %v1653_v7  ;;  %v12025_v7 = vld [vmem:[#allocation7 + $0x48] sm:$0xff] }
 0x22e   :  { %9320 = vmatprep.mubr.msk.f32.mxu0 %vm376_vm0, %v2036_v9 }
 0x231   :  { %9321 = vmatmul.mubr.msk.f32.vlgmr.msra.gmra.mrb[60].mxu0 %vm376_vm0, %v2037_v21 }
 0x232   :  { %9323 = vmatprep.mubr.msk.f32.mxu0 %vm376_vm0, %v2038_v10  ;;  %v12033_v10 = vld [vmem:[#allocation7 + $0x58] sm:$0xf] }
 0x235   :  { %9324 = vmatmul.mubr.msk.f32.gmra.mrb[62].mxu0 %vm376_vm0, %v2039_v34 }
 0x236   :  { %9326 = vmatprep.mubr.msk.f32.mxu0 %vm376_vm0, %v2040_v11 }
 0x239   :  { %9327 = vmatmul.mubr.msk.f32.gmra.mrb[64].mxu0 %vm376_vm0, %v2041_v12 }
 0x23a   :  { %9329 = vmatprep.mubr.msk.f32.mxu0 %vm376_vm0, %v2042_v13 }
 0x23d   :  { %9330 = vmatmul.mubr.msk.f32.gmra.mrb[66].mxu0 %vm376_vm0, %v2043_v14 }
 0x23e   :  { %9332 = vmatprep.mubr.msk.f32.mxu0 %vm376_vm0, %v2044_v15 }
 0x241   :  { %9333 = vmatmul.mubr.msk.f32.gmra.mrb[68].mxu0 %vm376_vm0, %v2045_v16 }
 0x242   :  { %9335 = vmatprep.mubr.msk.f32.mxu0 %vm376_vm0, %v2046_v17 }
 0x245   :  { %9336 = vmatmul.mubr.msk.f32.gmra.mrb[70].mxu0 %vm376_vm0, %v2047_v29 }
 0x28c   :  { %v8962_v18 = vpop.f32.mrb[0].mxu0 }
 0x28d   :  { %v479_v30 = vpop.f32.mrb[1].mxu0 }
 0x28e   :  { %v10176_v36 = vpack.c.bf16 %v8962_v18, %v479_v30 }
 0x290   :  { %v8965_v19 = vpop.f32.mrb[2].mxu0  ;;  %10177 = vmatprep.subr.bf16.mxu1 %v10176_v36 }
 0x291   :  { %v489_v31 = vpop.f32.mrb[3].mxu0  ;;  %10179 = vmatpush3.bf16.msra.mxu1 %v10176_v36 }
 0x292   :  { %v10180_v37 = vpack.c.bf16 %v8965_v19, %v489_v31 }
 0x294   :  { %v8968_v38 = vpop.f32.mrb[4].mxu0  ;;  %10181 = vmatprep.subr.bf16.mxu1 %v10180_v37 }
 0x295   :  { %v499_v20 = vpop.f32.mrb[5].mxu0  ;;  %10183 = vmatpush3.bf16.msra.mxu1 %v10180_v37 }
 0x296   :  { %v10184_v32 = vpack.c.bf16 %v8968_v38, %v499_v20 }
 0x298   :  { %v8971_v39 = vpop.f32.mrb[6].mxu0  ;;  %10185 = vmatprep.subr.bf16.mxu1 %v10184_v32 }
 0x299   :  { %v509_v40 = vpop.f32.mrb[7].mxu0  ;;  %10187 = vmatpush3.bf16.msra.mxu1 %v10184_v32 }
 0x29a   :  { %v10188_v41 = vpack.c.bf16 %v8971_v39, %v509_v40 }
 0x29c   :  { %v8974_v42 = vpop.f32.mrb[8].mxu0  ;;  %10189 = vmatprep.subr.bf16.mxu1 %v10188_v41 }
 0x29d   :  { %v519_v43 = vpop.f32.mrb[9].mxu0  ;;  %10191 = vmatpush3.bf16.msra.mxu1 %v10188_v41 }
 0x29e   :  { %v10192_v44 = vpack.c.bf16 %v8974_v42, %v519_v43 }
 0x2a0   :  { %v8977_v45 = vpop.f32.mrb[10].mxu0  ;;  %10193 = vmatprep.subr.bf16.mxu1 %v10192_v44 }
 0x2a1   :  { %v529_v46 = vpop.f32.mrb[11].mxu0  ;;  %10195 = vmatpush3.bf16.msra.mxu1 %v10192_v44 }
 0x2a2   :  { %v10196_v47 = vpack.c.bf16 %v8977_v45, %v529_v46 }
 0x2a4   :  { %10197 = vmatprep.subr.bf16.mxu1 %v10196_v47  ;;  %v9034_v48 = vpop.f32.mrb[12].mxu0 }
 0x2a5   :  { %10199 = vmatpush3.bf16.msra.mxu1 %v10196_v47  ;;  %v802_v49 = vpop.f32.mrb[13].mxu0 }
 0x2a6   :  { %v10212_v51 = vpack.c.bf16 %v9034_v48, %v802_v49 }
 0x2a8   :  { %9003 = vmatmul.mubr.msk.f32.vlgmr.msra.gmra.mrb[0].mxu1 %vm538_vm1, %v11993_v50  ;;  %v9037_v53 = vpop.f32.mrb[14].mxu0  ;;  %10213 = vmatprep.subr.bf16.mxu1 %v10212_v51 }
 0x2a9   :  { %v812_v54 = vpop.f32.mrb[15].mxu0  ;;  %10215 = vmatpush3.bf16.msra.mxu1 %v10212_v51  ;;  %9005 = vmatprep.mubr.msk.f32.mxu1 %vm538_vm1, %v11995_v52 }
 0x2aa   :  { %v10216_v56 = vpack.c.bf16 %v9037_v53, %v812_v54 }
 0x2ac   :  { %9006 = vmatmul.mubr.msk.f32.gmra.mrb[2].mxu1 %vm538_vm1, %v12001_v55  ;;  %v9040_v58 = vpop.f32.mrb[16].mxu0  ;;  %10217 = vmatprep.subr.bf16.mxu1 %v10216_v56 }
 0x2ad   :  { %v822_v59 = vpop.f32.mrb[17].mxu0  ;;  %10219 = vmatpush3.bf16.msra.mxu1 %v10216_v56  ;;  %9008 = vmatprep.mubr.msk.f32.mxu1 %vm538_vm1, %v12003_v57 }
 0x2ae   :  { %v10220_v61 = vpack.c.bf16 %v9040_v58, %v822_v59 }
 0x2b0   :  { %9009 = vmatmul.mubr.msk.f32.gmra.mrb[4].mxu1 %vm538_vm1, %v12009_v60  ;;  %v9043_v63 = vpop.f32.mrb[18].mxu0  ;;  %10221 = vmatprep.subr.bf16.mxu1 %v10220_v61 }
 0x2b1   :  { %v832_v0 = vpop.f32.mrb[19].mxu0  ;;  %10223 = vmatpush3.bf16.msra.mxu1 %v10220_v61  ;;  %9011 = vmatprep.mubr.msk.f32.mxu1 %vm538_vm1, %v12011_v62 }
 0x2b2   :  { %v10224_v2 = vpack.c.bf16 %v9043_v63, %v832_v0 }
 0x2b4   :  { %9012 = vmatmul.mubr.msk.f32.gmra.mrb[6].mxu1 %vm538_vm1, %v12017_v1  ;;  %v9046_v4 = vpop.f32.mrb[20].mxu0  ;;  %10225 = vmatprep.subr.bf16.mxu1 %v10224_v2 }
 0x2b5   :  { %v842_v6 = vpop.f32.mrb[21].mxu0  ;;  %10227 = vmatpush3.bf16.msra.mxu1 %v10224_v2  ;;  %9014 = vmatprep.mubr.msk.f32.mxu1 %vm538_vm1, %v12019_v3 }
 0x2b6   :  { %v10228_v9 = vpack.c.bf16 %v9046_v4, %v842_v6 }
 0x2b8   :  { %9015 = vmatmul.mubr.msk.f32.gmra.mrb[8].mxu1 %vm538_vm1, %v12025_v7  ;;  %v9049_v21 = vpop.f32.mrb[22].mxu0  ;;  %10229 = vmatprep.subr.bf16.mxu1 %v10228_v9 }
 0x2b9   :  { %v852_v33 = vpop.f32.mrb[23].mxu0  ;;  %10231 = vmatpush3.bf16.msra.mxu1 %v10228_v9  ;;  %9017 = vmatprep.mubr.msk.f32.mxu1 %vm538_vm1, %v12027_v8 }
 0x2ba   :  { %v10232_v22 = vpack.c.bf16 %v9049_v21, %v852_v33 }
 0x2bc   :  { %9018 = vmatmul.mubr.msk.f32.gmra.mrb[10].mxu1 %vm538_vm1, %v12033_v10  ;;  %10233 = vmatprep.subr.bf16.mxu1 %v10232_v22  ;;  %v9106_v34 = vpop.f32.mrb[24].mxu0 }
 0x2bd   :  { %10235 = vmatpush3.bf16.msra.mxu1 %v10232_v22  ;;  %v1136_v35 = vpop.f32.mrb[25].mxu0  ;;  %9074 = vmatprep.mubr.msk.f32.mxu1 %vm538_vm1, %v11950_v5 }
 0x2be   :  { %v10248_v11 = vpack.c.bf16 %v9106_v34, %v1136_v35 }
 0x2c0   :  { %9075 = vmatmul.mubr.msk.f32.vlgmr.msra.gmra.mrb[12].mxu1 %vm538_vm1, %v11993_v50  ;;  %v9109_v23 = vpop.f32.mrb[26].mxu0  ;;  %10249 = vmatprep.subr.bf16.mxu1 %v10248_v11 }
 0x2c1   :  { %v1146_v12 = vpop.f32.mrb[27].mxu0  ;;  %10251 = vmatpush3.bf16.msra.mxu1 %v10248_v11  ;;  %9077 = vmatprep.mubr.msk.f32.mxu1 %vm538_vm1, %v11995_v52 }
 0x2c2   :  { %v10252_v24 = vpack.c.bf16 %v9109_v23, %v1146_v12 }
 0x2c4   :  { %9078 = vmatmul.mubr.msk.f32.gmra.mrb[14].mxu1 %vm538_vm1, %v12001_v55  ;;  %v9112_v13 = vpop.f32.mrb[28].mxu0  ;;  %10253 = vmatprep.subr.bf16.mxu1 %v10252_v24 }
 0x2c5   :  { %v1156_v25 = vpop.f32.mrb[29].mxu0  ;;  %10255 = vmatpush3.bf16.msra.mxu1 %v10252_v24  ;;  %9080 = vmatprep.mubr.msk.f32.mxu1 %vm538_vm1, %v12003_v57 }
 0x2c6   :  { %v10256_v14 = vpack.c.bf16 %v9112_v13, %v1156_v25 }
 0x2c8   :  { %9081 = vmatmul.mubr.msk.f32.gmra.mrb[16].mxu1 %vm538_vm1, %v12009_v60  ;;  %v9115_v26 = vpop.f32.mrb[30].mxu0  ;;  %10257 = vmatprep.subr.bf16.mxu1 %v10256_v14 }
 0x2c9   :  { %v1166_v15 = vpop.f32.mrb[31].mxu0  ;;  %10259 = vmatpush3.bf16.msra.mxu1 %v10256_v14  ;;  %9083 = vmatprep.mubr.msk.f32.mxu1 %vm538_vm1, %v12011_v62 }
 0x2ca   :  { %v10260_v27 = vpack.c.bf16 %v9115_v26, %v1166_v15 }
 0x2cc   :  { %9084 = vmatmul.mubr.msk.f32.gmra.mrb[18].mxu1 %vm538_vm1, %v12017_v1  ;;  %v9118_v16 = vpop.f32.mrb[32].mxu0  ;;  %10261 = vmatprep.subr.bf16.mxu1 %v10260_v27 }
 0x2cd   :  { %v1176_v28 = vpop.f32.mrb[33].mxu0  ;;  %10263 = vmatpush3.bf16.msra.mxu1 %v10260_v27  ;;  %9086 = vmatprep.mubr.msk.f32.mxu1 %vm538_vm1, %v12019_v3 }
 0x2ce   :  { %v10264_v17 = vpack.c.bf16 %v9118_v16, %v1176_v28 }
 0x2d0   :  { %9087 = vmatmul.mubr.msk.f32.gmra.mrb[20].mxu1 %vm538_vm1, %v12025_v7  ;;  %v9121_v29 = vpop.f32.mrb[34].mxu0  ;;  %10265 = vmatprep.subr.bf16.mxu1 %v10264_v17 }
 0x2d1   :  { %v1186_v18 = vpop.f32.mrb[35].mxu0  ;;  %10267 = vmatpush3.bf16.msra.mxu1 %v10264_v17  ;;  %9089 = vmatprep.mubr.msk.f32.mxu1 %vm538_vm1, %v12027_v8 }
 0x2d2   :  { %v10268_v30 = vpack.c.bf16 %v9121_v29, %v1186_v18 }
 0x2d4   :  { %9090 = vmatmul.mubr.msk.f32.gmra.mrb[22].mxu1 %vm538_vm1, %v12033_v10  ;;  %10269 = vmatprep.subr.bf16.mxu1 %v10268_v30  ;;  %v9178_v36 = vpop.f32.mrb[36].mxu0 }
 0x2d5   :  { %10271 = vmatpush3.bf16.msra.mxu1 %v10268_v30  ;;  %v1446_v19 = vpop.f32.mrb[37].mxu0  ;;  %9146 = vmatprep.mubr.msk.f32.mxu1 %vm538_vm1, %v11950_v5 }
 0x2d6   :  { %v10284_v31 = vpack.c.bf16 %v9178_v36, %v1446_v19 }
 0x2d8   :  { %9147 = vmatmul.mubr.msk.f32.vlgmr.msra.gmra.mrb[24].mxu1 %vm538_vm1, %v11993_v50  ;;  %v9181_v37 = vpop.f32.mrb[38].mxu0  ;;  %10285 = vmatprep.subr.bf16.mxu1 %v10284_v31 }
 0x2d9   :  { %v1456_v38 = vpop.f32.mrb[39].mxu0  ;;  %10287 = vmatpush3.bf16.msra.mxu1 %v10284_v31  ;;  %9149 = vmatprep.mubr.msk.f32.mxu1 %vm538_vm1, %v11995_v52 }
 0x2da   :  { %v10288_v20 = vpack.c.bf16 %v9181_v37, %v1456_v38 }
 0x2dc   :  { %9150 = vmatmul.mubr.msk.f32.gmra.mrb[26].mxu1 %vm538_vm1, %v12001_v55  ;;  %v9184_v32 = vpop.f32.mrb[40].mxu0  ;;  %10289 = vmatprep.subr.bf16.mxu1 %v10288_v20 }
 0x2dd   :  { %v1466_v39 = vpop.f32.mrb[41].mxu0  ;;  %10291 = vmatpush3.bf16.msra.mxu1 %v10288_v20  ;;  %9152 = vmatprep.mubr.msk.f32.mxu1 %vm538_vm1, %v12003_v57 }
 0x2de   :  { %v10292_v40 = vpack.c.bf16 %v9184_v32, %v1466_v39 }
 0x2e0   :  { %9153 = vmatmul.mubr.msk.f32.gmra.mrb[28].mxu1 %vm538_vm1, %v12009_v60  ;;  %v9187_v41 = vpop.f32.mrb[42].mxu0  ;;  %10293 = vmatprep.subr.bf16.mxu1 %v10292_v40 }
 0x2e1   :  { %v1476_v42 = vpop.f32.mrb[43].mxu0  ;;  %10295 = vmatpush3.bf16.msra.mxu1 %v10292_v40  ;;  %9155 = vmatprep.mubr.msk.f32.mxu1 %vm538_vm1, %v12011_v62 }
 0x2e2   :  { %v10296_v43 = vpack.c.bf16 %v9187_v41, %v1476_v42 }
 0x2e4   :  { %9156 = vmatmul.mubr.msk.f32.gmra.mrb[30].mxu1 %vm538_vm1, %v12017_v1  ;;  %v9190_v44 = vpop.f32.mrb[44].mxu0  ;;  %10297 = vmatprep.subr.bf16.mxu1 %v10296_v43 }
 0x2e5   :  { %v1486_v45 = vpop.f32.mrb[45].mxu0  ;;  %10299 = vmatpush3.bf16.msra.mxu1 %v10296_v43  ;;  %9158 = vmatprep.mubr.msk.f32.mxu1 %vm538_vm1, %v12019_v3 }
 0x2e6   :  { %v10300_v46 = vpack.c.bf16 %v9190_v44, %v1486_v45 }
 0x2e8   :  { %9159 = vmatmul.mubr.msk.f32.gmra.mrb[32].mxu1 %vm538_vm1, %v12025_v7  ;;  %v9193_v47 = vpop.f32.mrb[46].mxu0  ;;  %10301 = vmatprep.subr.bf16.mxu1 %v10300_v46 }
 0x2e9   :  { %v1496_v48 = vpop.f32.mrb[47].mxu0  ;;  %10303 = vmatpush3.bf16.msra.mxu1 %v10300_v46  ;;  %9161 = vmatprep.mubr.msk.f32.mxu1 %vm538_vm1, %v12027_v8 }
 0x2ea   :  { %v10304_v49 = vpack.c.bf16 %v9193_v47, %v1496_v48 }
 0x2ec   :  { %9162 = vmatmul.mubr.msk.f32.gmra.mrb[34].mxu1 %vm538_vm1, %v12033_v10  ;;  %10305 = vmatprep.subr.bf16.mxu1 %v10304_v49  ;;  %v9250_v51 = vpop.f32.mrb[48].mxu0 }
 0x2ed   :  { %10307 = vmatpush3.bf16.msra.mxu1 %v10304_v49  ;;  %v1756_v53 = vpop.f32.mrb[49].mxu0  ;;  %9218 = vmatprep.mubr.msk.f32.mxu1 %vm538_vm1, %v11950_v5 }
 0x2ee   :  { %v10320_v54 = vpack.c.bf16 %v9250_v51, %v1756_v53 }
 0x2f0   :  { %9219 = vmatmul.mubr.msk.f32.vlgmr.msra.gmra.mrb[36].mxu1 %vm538_vm1, %v11993_v50  ;;  %v9253_v56 = vpop.f32.mrb[50].mxu0  ;;  %10321 = vmatprep.subr.bf16.mxu1 %v10320_v54 }
 0x2f1   :  { %v1766_v58 = vpop.f32.mrb[51].mxu0  ;;  %10323 = vmatpush3.bf16.msra.mxu1 %v10320_v54  ;;  %9221 = vmatprep.mubr.msk.f32.mxu1 %vm538_vm1, %v11995_v52 }
 0x2f2   :  { %v10324_v59 = vpack.c.bf16 %v9253_v56, %v1766_v58 }
 0x2f4   :  { %9222 = vmatmul.mubr.msk.f32.gmra.mrb[38].mxu1 %vm538_vm1, %v12001_v55  ;;  %v9256_v61 = vpop.f32.mrb[52].mxu0  ;;  %10325 = vmatprep.subr.bf16.mxu1 %v10324_v59 }
 0x2f5   :  { %v1776_v63 = vpop.f32.mrb[53].mxu0  ;;  %10327 = vmatpush3.bf16.msra.mxu1 %v10324_v59  ;;  %9224 = vmatprep.mubr.msk.f32.mxu1 %vm538_vm1, %v12003_v57 }
 0x2f6   :  { %v10328_v0 = vpack.c.bf16 %v9256_v61, %v1776_v63 }
 0x2f8   :  { %9225 = vmatmul.mubr.msk.f32.gmra.mrb[40].mxu1 %vm538_vm1, %v12009_v60  ;;  %v9259_v2 = vpop.f32.mrb[54].mxu0  ;;  %10329 = vmatprep.subr.bf16.mxu1 %v10328_v0 }
 0x2f9   :  { %v1786_v4 = vpop.f32.mrb[55].mxu0  ;;  %10331 = vmatpush3.bf16.msra.mxu1 %v10328_v0  ;;  %9227 = vmatprep.mubr.msk.f32.mxu1 %vm538_vm1, %v12011_v62 }
 0x2fa   :  { %v10332_v6 = vpack.c.bf16 %v9259_v2, %v1786_v4 }
 0x2fc   :  { %9228 = vmatmul.mubr.msk.f32.gmra.mrb[42].mxu1 %vm538_vm1, %v12017_v1  ;;  %v9262_v9 = vpop.f32.mrb[56].mxu0  ;;  %10333 = vmatprep.subr.bf16.mxu1 %v10332_v6 }
 0x2fd   :  { %v1796_v21 = vpop.f32.mrb[57].mxu0  ;;  %10335 = vmatpush3.bf16.msra.mxu1 %v10332_v6  ;;  %9230 = vmatprep.mubr.msk.f32.mxu1 %vm538_vm1, %v12019_v3 }
 0x2fe   :  { %v10336_v33 = vpack.c.bf16 %v9262_v9, %v1796_v21 }
 0x300   :  { %9231 = vmatmul.mubr.msk.f32.gmra.mrb[44].mxu1 %vm538_vm1, %v12025_v7  ;;  %v9265_v22 = vpop.f32.mrb[58].mxu0  ;;  %10337 = vmatprep.subr.bf16.mxu1 %v10336_v33 }
 0x301   :  { %v1806_v34 = vpop.f32.mrb[59].mxu0  ;;  %10339 = vmatpush3.bf16.msra.mxu1 %v10336_v33  ;;  %9233 = vmatprep.mubr.msk.f32.mxu1 %vm538_vm1, %v12027_v8 }
 0x302   :  { %v10340_v35 = vpack.c.bf16 %v9265_v22, %v1806_v34 }
 0x304   :  { %9234 = vmatmul.mubr.msk.f32.gmra.mrb[46].mxu1 %vm538_vm1, %v12033_v10  ;;  %10341 = vmatprep.subr.bf16.mxu1 %v10340_v35  ;;  %v9322_v11 = vpop.f32.mrb[60].mxu0 }
 0x305   :  { %10343 = vmatpush3.bf16.msra.mxu1 %v10340_v35  ;;  %v2150_v23 = vpop.f32.mrb[61].mxu0  ;;  %9290 = vmatprep.mubr.msk.f32.mxu1 %vm538_vm1, %v11950_v5 }
 0x306   :  { %v10356_v12 = vpack.c.bf16 %v9322_v11, %v2150_v23 }
 0x308   :  { %9291 = vmatmul.mubr.msk.f32.vlgmr.msra.gmra.mrb[48].mxu1 %vm538_vm1, %v11993_v50  ;;  %v9325_v24 = vpop.f32.mrb[62].mxu0  ;;  %10357 = vmatprep.subr.bf16.mxu1 %v10356_v12 }
 0x309   :  { %v2160_v13 = vpop.f32.mrb[63].mxu0  ;;  %10359 = vmatpush3.bf16.msra.mxu1 %v10356_v12  ;;  %9293 = vmatprep.mubr.msk.f32.mxu1 %vm538_vm1, %v11995_v52 }
 0x30a   :  { %v10360_v25 = vpack.c.bf16 %v9325_v24, %v2160_v13 }
 0x30c   :  { %9294 = vmatmul.mubr.msk.f32.gmra.mrb[50].mxu1 %vm538_vm1, %v12001_v55  ;;  %v9328_v14 = vpop.f32.mrb[64].mxu0  ;;  %10361 = vmatprep.subr.bf16.mxu1 %v10360_v25 }
 0x30d   :  { %v2170_v26 = vpop.f32.mrb[65].mxu0  ;;  %10363 = vmatpush3.bf16.msra.mxu1 %v10360_v25  ;;  %9296 = vmatprep.mubr.msk.f32.mxu1 %vm538_vm1, %v12003_v57 }
 0x30e   :  { %v10364_v15 = vpack.c.bf16 %v9328_v14, %v2170_v26 }
 0x310   :  { %9297 = vmatmul.mubr.msk.f32.gmra.mrb[52].mxu1 %vm538_vm1, %v12009_v60  ;;  %v9331_v27 = vpop.f32.mrb[66].mxu0  ;;  %10365 = vmatprep.subr.bf16.mxu1 %v10364_v15 }
 0x311   :  { %v2180_v16 = vpop.f32.mrb[67].mxu0  ;;  %10367 = vmatpush3.bf16.msra.mxu1 %v10364_v15  ;;  %9299 = vmatprep.mubr.msk.f32.mxu1 %vm538_vm1, %v12011_v62 }
 0x312   :  { %v10368_v28 = vpack.c.bf16 %v9331_v27, %v2180_v16 }
 0x314   :  { %9300 = vmatmul.mubr.msk.f32.gmra.mrb[54].mxu1 %vm538_vm1, %v12017_v1  ;;  %v9334_v17 = vpop.f32.mrb[68].mxu0  ;;  %10369 = vmatprep.subr.bf16.mxu1 %v10368_v28 }
 0x315   :  { %v2190_v29 = vpop.f32.mrb[69].mxu0  ;;  %10371 = vmatpush3.bf16.msra.mxu1 %v10368_v28  ;;  %9302 = vmatprep.mubr.msk.f32.mxu1 %vm538_vm1, %v12019_v3 }
 0x316   :  { %v10372_v18 = vpack.c.bf16 %v9334_v17, %v2190_v29 }
 0x318   :  { %9303 = vmatmul.mubr.msk.f32.gmra.mrb[56].mxu1 %vm538_vm1, %v12025_v7  ;;  %v9337_v30 = vpop.f32.mrb[70].mxu0  ;;  %10373 = vmatprep.subr.bf16.mxu1 %v10372_v18 }
 0x319   :  { %v2200_v36 = vpop.f32.mrb[71].mxu0  ;;  %10375 = vmatpush3.bf16.msra.mxu1 %v10372_v18  ;;  %9305 = vmatprep.mubr.msk.f32.mxu1 %vm538_vm1, %v12027_v8 }
 0x31a   :  { %v10376_v19 = vpack.c.bf16 %v9337_v30, %v2200_v36 }
 0x31c   :  { %9306 = vmatmul.mubr.msk.f32.gmra.mrb[58].mxu1 %vm538_vm1, %v12033_v10  ;;  %10377 = vmatprep.subr.bf16.mxu1 %v10376_v19 }
 0x31d   :  { %10379 = vmatpush3.bf16.msra.mxu1 %v10376_v19  ;;  %9362 = vmatprep.mubr.msk.f32.mxu1 %vm538_vm1, %v11950_v5  ;;  %v11271_v5 = vmov 0.0|0.0  }
 0x31e   :  { %10399 = vmatprep.subr.bf16.mxu1 %v11271_v5  ;;  %10380 = vmatprep.subr.bf16.mxu0 %v11271_v5 }
 0x320   :  { %9363 = vmatmul.mubr.msk.f32.vlgmr.msra.gmra.mrb[60].mxu1 %vm538_vm1, %v11993_v50 }
 0x321   :  { %9365 = vmatprep.mubr.msk.f32.mxu1 %vm538_vm1, %v11995_v52 }
 0x324   :  { %9366 = vmatmul.mubr.msk.f32.gmra.mrb[62].mxu1 %vm538_vm1, %v12001_v55 }
 0x325   :  { %9368 = vmatprep.mubr.msk.f32.mxu1 %vm538_vm1, %v12003_v57 }
 0x328   :  { %9369 = vmatmul.mubr.msk.f32.gmra.mrb[64].mxu1 %vm538_vm1, %v12009_v60 }
 0x329   :  { %9371 = vmatprep.mubr.msk.f32.mxu1 %vm538_vm1, %v12011_v62 }
 0x32c   :  { %9372 = vmatmul.mubr.msk.f32.gmra.mrb[66].mxu1 %vm538_vm1, %v12017_v1  ;;  %v11273_v1 = vmov 0.0  }
 0x32d   :  { %9374 = vmatprep.mubr.msk.f32.mxu1 %vm538_vm1, %v12019_v3  ;;  %9404 = vmatprep.mubr.msk.f32.mxu0 %vm11272_vm2, %v11273_v1 }
 0x330   :  { %9375 = vmatmul.mubr.msk.f32.gmra.mrb[68].mxu1 %vm538_vm1, %v12025_v7 }
 0x331   :  { %9377 = vmatprep.mubr.msk.f32.mxu1 %vm538_vm1, %v12027_v8 }
 0x334   :  { %9378 = vmatmul.mubr.msk.f32.gmra.mrb[70].mxu1 %vm538_vm1, %v12033_v10 }
 0x335   :  { %9431 = vmatprep.mubr.msk.f32.mxu1 %vm11272_vm2, %v11273_v1 }
 0x37b   :  { %v9004_v50 = vpop.f32.mrb[0].mxu1 }
 0x37c   :  { %v641_v52 = vpop.f32.mrb[1].mxu1  ;;  %v987_v4 = vmul.f32 %v9004_v50, %v9004_v50 }
 0x37d   :  { %v986_v6 = vmul.f32 %v641_v52, %v641_v52 }
 0x37f   :  { %v9007_v55 = vpop.f32.mrb[2].mxu1 }
 0x380   :  { %v651_v57 = vpop.f32.mrb[3].mxu1  ;;  %v989_v34 = vmul.f32 %v9007_v55, %v9007_v55 }
 0x381   :  { %v988_v35 = vmul.f32 %v651_v57, %v651_v57 }
 0x383   :  { %v9010_v60 = vpop.f32.mrb[4].mxu1 }
 0x384   :  { %v661_v62 = vpop.f32.mrb[5].mxu1  ;;  %v991_v13 = vmul.f32 %v9010_v60, %v9010_v60 }
 0x385   :  { %v990_v25 = vmul.f32 %v661_v62, %v661_v62 }
 0x387   :  { %v9013_v3 = vpop.f32.mrb[6].mxu1 }
 0x388   :  { %v671_v7 = vpop.f32.mrb[7].mxu1  ;;  %v993_v16 = vmul.f32 %v9013_v3, %v9013_v3 }
 0x389   :  { %v992_v28 = vmul.f32 %v671_v7, %v671_v7 }
 0x38b   :  { %v9016_v8 = vpop.f32.mrb[8].mxu1 }
 0x38c   :  { %v681_v10 = vpop.f32.mrb[9].mxu1  ;;  %v995_v36 = vmul.f32 %v9016_v8, %v9016_v8 }
 0x38d   :  { %v994_v19 = vmul.f32 %v681_v10, %v681_v10 }
 0x38f   :  { %v9019_v31 = vpop.f32.mrb[10].mxu1 }
 0x390   :  { %v691_v37 = vpop.f32.mrb[11].mxu1 }
 0x393   :  { %v9076_v38 = vpop.f32.mrb[12].mxu1 }
 0x394   :  { %v12163_v20 = vmul.f32 %v9076_v38, %v9004_v50  ;;  %v927_v32 = vpop.f32.mrb[13].mxu1 }
 0x395   :  { %v12165_v39 = vmul.f32 %v927_v32, %v641_v52 }
 0x397   :  { %v9079_v40 = vpop.f32.mrb[14].mxu1 }
 0x398   :  { %v12167_v41 = vmul.f32 %v9079_v40, %v9007_v55  ;;  %v937_v42 = vpop.f32.mrb[15].mxu1 }
 0x399   :  { %v12169_v43 = vmul.f32 %v937_v42, %v651_v57 }
 0x39b   :  { %v12171_v44 = vpop.f32.mrb[16].mxu1 }
 0x39c   :  { %v12174_v45 = vmul.f32 %v12171_v44, %v9010_v60  ;;  %v12176_v46 = vpop.f32.mrb[17].mxu1 }
 0x39d   :  { %v12179_v47 = vmul.f32 %v12176_v46, %v661_v62 }
 0x39f   :  { %v12181_v48 = vpop.f32.mrb[18].mxu1 }
 0x3a0   :  { %v12184_v49 = vmul.f32 %v12181_v48, %v9013_v3  ;;  %v12186_v51 = vpop.f32.mrb[19].mxu1 }
 0x3a1   :  { %v12189_v53 = vmul.f32 %v12186_v51, %v671_v7 }
 0x3a3   :  { %v12191_v54 = vpop.f32.mrb[20].mxu1 }
 0x3a4   :  { %v12194_v56 = vmul.f32 %v12191_v54, %v9016_v8  ;;  %v12196_v58 = vpop.f32.mrb[21].mxu1  ;;  %v1000_v8 = vmul.f32 %v937_v42, %v937_v42 }
 0x3a5   :  { %v12199_v59 = vmul.f32 %v12196_v58, %v681_v10 }
 0x3a7   :  { %v12201_v61 = vpop.f32.mrb[22].mxu1 }
 0x3a8   :  { %v12204_v63 = vmul.f32 %v12201_v61, %v9019_v31  ;;  %v12206_v0 = vpop.f32.mrb[23].mxu1 }
 0x3a9   :  { %v12209_v2 = vmul.f32 %v12206_v0, %v691_v37 }
 0x3ab   :  { %v9148_v9 = vpop.f32.mrb[24].mxu1 }
 0x3ac   :  { %v1321_v21 = vsub.f32 %v9148_v9, %v987_v4  ;;  %v1261_v33 = vpop.f32.mrb[25].mxu1  ;;  %v997_v4 = vmul.f32 %v9019_v31, %v9019_v31  ;;  %v1003_v31 = vmul.f32 %v12171_v44, %v12171_v44 }
 0x3ad   :  { %v1320_v22 = vsub.f32 %v1261_v33, %v986_v6  ;;  %v996_v6 = vmul.f32 %v691_v37, %v691_v37 }
 0x3af   :  { %v9151_v11 = vpop.f32.mrb[26].mxu1 }
 0x3b0   :  { %v1323_v23 = vsub.f32 %v9151_v11, %v989_v34  ;;  %v1271_v12 = vpop.f32.mrb[27].mxu1  ;;  %v999_v34 = vmul.f32 %v9076_v38, %v9076_v38  ;;  %v1002_v38 = vmul.f32 %v12176_v46, %v12176_v46  ;;  %v1007_v46 = vmul.f32 %v12191_v54, %v12191_v54 }
 0x3b1   :  { %v1322_v24 = vsub.f32 %v1271_v12, %v988_v35  ;;  %v998_v35 = vmul.f32 %v927_v32, %v927_v32 }
 0x3b3   :  { %v9154_v14 = vpop.f32.mrb[28].mxu1 }
 0x3b4   :  { %v1325_v26 = vsub.f32 %v9154_v14, %v991_v13  ;;  %v1281_v15 = vpop.f32.mrb[29].mxu1  ;;  %v1001_v13 = vmul.f32 %v9079_v40, %v9079_v40  ;;  %v1005_v40 = vmul.f32 %v12181_v48, %v12181_v48 }
 0x3b5   :  { %v1324_v27 = vsub.f32 %v1281_v15, %v990_v25 }
 0x3b7   :  { %v9157_v17 = vpop.f32.mrb[30].mxu1 }
 0x3b8   :  { %v1327_v29 = vsub.f32 %v9157_v17, %v993_v16  ;;  %v1291_v18 = vpop.f32.mrb[31].mxu1 }
 0x3b9   :  { %v1326_v30 = vsub.f32 %v1291_v18, %v992_v28 }
 0x3bb   :  { %v9160_v50 = vpop.f32.mrb[32].mxu1 }
 0x3bc   :  { %v1329_v52 = vsub.f32 %v9160_v50, %v995_v36  ;;  %v1301_v55 = vpop.f32.mrb[33].mxu1 }
 0x3bd   :  { %v1328_v57 = vsub.f32 %v1301_v55, %v994_v19 }
 0x3bf   :  { %v9163_v60 = vpop.f32.mrb[34].mxu1 }
 0x3c0   :  { %v1331_v62 = vsub.f32 %v9163_v60, %v997_v4  ;;  %v1311_v9 = vpop.f32.mrb[35].mxu1  ;;  %v1006_v4 = vmul.f32 %v12196_v58, %v12196_v58 }
 0x3c1   :  { %v1330_v33 = vsub.f32 %v1311_v9, %v996_v6 }
 0x3c3   :  { %v9220_v3 = vpop.f32.mrb[36].mxu1 }
 0x3c4   :  { %v1631_v7 = vsub.f32 %v9220_v3, %v999_v34  ;;  %v1571_v11 = vpop.f32.mrb[37].mxu1  ;;  %v1008_v3 = vmul.f32 %v12206_v0, %v12206_v0 }
 0x3c5   :  { %v1630_v12 = vsub.f32 %v1571_v11, %v998_v35 }
 0x3c6   :  { %v1977_v25 = vadd.f32 %v1631_v7, %v1321_v21  ;;  %v1004_v21 = vmul.f32 %v12186_v51, %v12186_v51  ;;  %v1009_v51 = vmul.f32 %v12201_v61, %v12201_v61 }
 0x3c7   :  { %v1976_v10 = vadd.f32 %v1630_v12, %v1320_v22  ;;  %v9223_v14 = vpop.f32.mrb[38].mxu1 }
 0x3c8   :  { %v1633_v15 = vsub.f32 %v9223_v14, %v1001_v13  ;;  %v1581_v16 = vpop.f32.mrb[39].mxu1  ;;  %v1989_v6 = vadd.f32 0.0009, %v1977_v25 }
 0x3c9   :  { %v1632_v28 = vsub.f32 %v1581_v16, %v1000_v8  ;;  %v1988_v48 = vadd.f32 0.0009, %v1976_v10 }
 0x3ca   :  { %v1979_v37 = vadd.f32 %v1633_v15, %v1323_v23  ;;  %10715 = vrcp.f32 %v1989_v6 }
 0x3cb   :  { %v1978_v32 = vadd.f32 %v1632_v28, %v1322_v24  ;;  %v9226_v17 = vpop.f32.mrb[40].mxu1  ;;  %10717 = vrcp.f32 %v1988_v48 }
 0x3cc   :  { %v1635_v18 = vsub.f32 %v9226_v17, %v1003_v31  ;;  %v1591_v36 = vpop.f32.mrb[41].mxu1  ;;  %v1991_v54 = vadd.f32 0.0009, %v1979_v37 }
 0x3cd   :  { %v1634_v19 = vsub.f32 %v1591_v36, %v1002_v38  ;;  %v1990_v58 = vadd.f32 0.0009, %v1978_v32 }
 0x3ce   :  { %v1981_v42 = vadd.f32 %v1635_v18, %v1325_v26  ;;  %10719 = vrcp.f32 %v1991_v54 }
 0x3cf   :  { %v1980_v22 = vadd.f32 %v1634_v19, %v1324_v27  ;;  %v9229_v50 = vpop.f32.mrb[42].mxu1  ;;  %10721 = vrcp.f32 %v1990_v58 }
 0x3d0   :  { %v1637_v55 = vsub.f32 %v9229_v50, %v1005_v40  ;;  %v1601_v44 = vpop.f32.mrb[43].mxu1  ;;  %v1993_v25 = vadd.f32 0.0009, %v1981_v42 }
 0x3d1   :  { %v1636_v23 = vsub.f32 %v1601_v44, %v1004_v21  ;;  %v1992_v61 = vadd.f32 0.0009, %v1980_v22 }
 0x3d2   :  { %v1983_v24 = vadd.f32 %v1637_v55, %v1327_v29  ;;  %10723 = vrcp.f32 %v1993_v25 }
 0x3d3   :  { %v1982_v60 = vadd.f32 %v1636_v23, %v1326_v30  ;;  %v9232_v9 = vpop.f32.mrb[44].mxu1  ;;  %10725 = vrcp.f32 %v1992_v61 }
 0x3d4   :  { %v1639_v26 = vsub.f32 %v9232_v9, %v1007_v46  ;;  %v1611_v34 = vpop.f32.mrb[45].mxu1 }
 0x3d5   :  { %v1638_v35 = vsub.f32 %v1611_v34, %v1006_v4  ;;  %v1994_v31 = vadd.f32 0.0009, %v1982_v60 }
 0x3d6   :  { %v1985_v27 = vadd.f32 %v1639_v26, %v1329_v52 }
 0x3d7   :  { %v1984_v29 = vadd.f32 %v1638_v35, %v1328_v57  ;;  %v9235_v7 = vpop.f32.mrb[46].mxu1  ;;  %v1995_v57 = vadd.f32 0.0009, %v1983_v24 }
 0x3d8   :  { %v1641_v11 = vsub.f32 %v9235_v7, %v1009_v51  ;;  %v1621_v30 = vpop.f32.mrb[47].mxu1 }
 0x3d9   :  { %v1640_v12 = vsub.f32 %v1621_v30, %v1008_v3  ;;  %10727 = vrcp.f32 %v1995_v57  ;;  %v1996_v21 = vadd.f32 0.0009, %v1984_v29 }
 0x3da   :  { %v1987_v13 = vadd.f32 %v1641_v11, %v1331_v62  ;;  %10729 = vrcp.f32 %v1994_v31 }
 0x3db   :  { %v1986_v8 = vadd.f32 %v1640_v12, %v1330_v33  ;;  %v9292_v10 = vpop.f32.mrb[48].mxu1  ;;  %v10716_v33 = vpop.eup %10715 }
 0x3dc   :  { %v1941_v52 = vsub.f32 %v9292_v10, %v12163_v20  ;;  %v1881_v14 = vpop.f32.mrb[49].mxu1  ;;  %v10718_v18 = vpop.eup %10717  ;;  %v1999_v6 = vadd.f32 0.0009, %v1987_v13 }
 0x3dd   :  { %v1940_v0 = vsub.f32 %v1881_v14, %v12165_v39  ;;  %v1997_v39 = vadd.f32 0.0009, %v1985_v27  ;;  %v1998_v26 = vadd.f32 0.0009, %v1986_v8 }
 0x3de   :  { %v1953_v15 = vmul.f32 2.0, %v1941_v52 }
 0x3df   :  { %v1952_v16 = vmul.f32 2.0, %v1940_v0  ;;  %v9295_v28 = vpop.f32.mrb[50].mxu1  ;;  %10731 = vrcp.f32 %v1997_v39 }
 0x3e0   :  { %v1965_v37 = vadd.f32 0.0009, %v1953_v15  ;;  %v1943_v62 = vsub.f32 %v9295_v28, %v12167_v41  ;;  %v1891_v38 = vpop.f32.mrb[51].mxu1  ;;  %v10720_v41 = vpop.eup %10719  ;;  %10733 = vrcp.f32 %v1996_v21  ;;  %v2496_v21 = vld [vmem:[#allocation28] sm:$0xff] }
 0x3e1   :  { %v1964_v32 = vadd.f32 0.0009, %v1952_v16  ;;  %v1942_v17 = vsub.f32 %v1891_v38, %v12169_v43  ;;  %v10722_v43 = vpop.eup %10721  ;;  %10735 = vrcp.f32 %v1999_v6  ;;  %v2499_v6 = vld [vmem:[#allocation28 + $0x18] sm:$0xff] }
 0x3e2   :  { %v2003_v20 = vmul.f32 %v10716_v33, %v1965_v37  ;;  %v1955_v36 = vmul.f32 2.0, %v1943_v62  ;;  %v10724_v51 = vpop.eup %10723  ;;  %10737 = vrcp.f32 %v1998_v26 }
 0x3e3   :  { %v2001_v19 = vmul.f32 %v10718_v18, %v1964_v32  ;;  %v1954_v40 = vmul.f32 2.0, %v1942_v17  ;;  %v9298_v42 = vpop.f32.mrb[52].mxu1  ;;  %v10726_v54 = vpop.eup %10725 }
 0x3e4   :  { %v1967_v22 = vadd.f32 0.0009, %v1955_v36  ;;  %v1945_v50 = vsub.f32 %v9298_v42, %v12174_v45  ;;  %v1901_v55 = vpop.f32.mrb[53].mxu1  ;;  %v10728_v25 = vpop.eup %10727 }
 0x3e5   :  { %v10400_v44 = vpack.c.bf16 %v2003_v20, %v2001_v19  ;;  %v1966_v23 = vadd.f32 0.0009, %v1954_v40  ;;  %v1944_v46 = vsub.f32 %v1901_v55, %v12179_v47  ;;  %v10730_v61 = vpop.eup %10729 }
 0x3e6   :  { %v2007_v24 = vmul.f32 %v10720_v41, %v1967_v22  ;;  %v1957_v4 = vmul.f32 2.0, %v1945_v50  ;;  %v2497_v22 = vld [vmem:[#allocation28 + $0x8] sm:$0xff] }
 0x3e7   :  { %v2005_v60 = vmul.f32 %v10722_v43, %v1966_v23  ;;  %v1956_v9 = vmul.f32 2.0, %v1944_v46  ;;  %v9301_v48 = vpop.f32.mrb[54].mxu1  ;;  %10401 = vmatpush3.bf16.msra.mxu1 %v10400_v44  ;;  %v10418_v46 = vpack.c.bf16 %v2497_v22, %v2496_v21 }
 0x3e8   :  { %v1969_v34 = vadd.f32 0.0009, %v1957_v4  ;;  %v1947_v45 = vsub.f32 %v9301_v48, %v12184_v49  ;;  %v1911_v35 = vpop.f32.mrb[55].mxu1  ;;  %10402 = vmatprep.subr.bf16.mxu1 %v11271_v5  ;;  %v2498_v4 = vld [vmem:[#allocation28 + $0x10] sm:$0xff] }
 0x3e9   :  { %v10403_v27 = vpack.c.bf16 %v2007_v24, %v2005_v60  ;;  %v1968_v47 = vadd.f32 0.0009, %v1956_v9  ;;  %v1946_v3 = vsub.f32 %v1911_v35, %v12189_v53  ;;  %v375_v9 = vld [vmem:[#allocation9] sm:$0x3]  ;;  %v10422_v26 = vpack.c.bf16 %v2499_v6, %v2498_v4  ;;  %v2501_v35 = vld [vmem:[#allocation28 + $0x28] sm:$0xff] }
 0x3ea   :  { %v2011_v29 = vmul.f32 %v10724_v51, %v1969_v34  ;;  %v1959_v7 = vmul.f32 2.0, %v1947_v45  ;;  %v2500_v45 = vld [vmem:[#allocation28 + $0x20] sm:$0xff] }
 0x3eb   :  { %v2009_v58 = vmul.f32 %v10726_v54, %v1968_v47  ;;  %v1958_v11 = vmul.f32 2.0, %v1946_v3  ;;  %v9304_v30 = vpop.f32.mrb[56].mxu1  ;;  %10404 = vmatpush3.bf16.msra.mxu1 %v10403_v27  ;;  %v10426_v47 = vpack.c.bf16 %v2501_v35, %v2500_v45  ;;  %v10763_v54 = vld [vmem:[#allocation4] sm:$0xff] }
 0x3ec   :  { %v1971_v12 = vadd.f32 0.0009, %v1959_v7  ;;  %v1949_v49 = vsub.f32 %v9304_v30, %v12194_v56  ;;  %v1921_v13 = vpop.f32.mrb[57].mxu1  ;;  %10405 = vmatprep.subr.bf16.mxu1 %v11271_v5  ;;  %v10732_v56 = vpop.eup %10731 }
 0x3ed   :  { %v10406_v8 = vpack.c.bf16 %v2011_v29, %v2009_v58  ;;  %v1970_v10 = vadd.f32 0.0009, %v1958_v11  ;;  %v1948_v53 = vsub.f32 %v1921_v13, %v12199_v59  ;;  %v10734_v33 = vpop.eup %10733  ;;  %v10765_v13 = vld [vmem:[#allocation4 + $0x10] sm:$0xff] }
 0x3ee   :  { %v2015_v52 = vmul.f32 %v10728_v25, %v1971_v12  ;;  %v1961_v14 = vmul.f32 2.0, %v1949_v49  ;;  %v10764_v49 = vld [vmem:[#allocation4 + $0x8] sm:$0xff]  ;;  %v10766_v25 = vld [vmem:[#allocation4 + $0x18] sm:$0xff] }
 0x3ef   :  { %v2013_v0 = vmul.f32 %v10730_v61, %v1970_v10  ;;  %v1960_v15 = vmul.f32 2.0, %v1948_v53  ;;  %v9307_v57 = vpop.f32.mrb[58].mxu1  ;;  %10407 = vmatpush3.bf16.msra.mxu1 %v10406_v8  ;;  %v10767_v8 = vld [vmem:[#allocation4 + $0x20] sm:$0xff]  ;;  %v10769_v53 = vld [vmem:[#allocation4 + $0x28] sm:$0xff]  ;;  %v10770_v61 = vld [vmem:[#allocation4 + $0x30] sm:$0xff] }
 0x3f0   :  { %v1973_v16 = vadd.f32 0.0009, %v1961_v14  ;;  %v1951_v28 = vsub.f32 %v9307_v57, %v12204_v63  ;;  %v1931_v31 = vpop.f32.mrb[59].mxu1  ;;  %10408 = vmatprep.subr.bf16.mxu1 %v11271_v5  ;;  %v10736_v63 = vpop.eup %10735  ;;  %v10768_v10 = vld [vmem:[#allocation2] sm:$0xff]  ;;  %v10775_v57 = vld [vmem:[#allocation2 + $0x10] sm:$0xff] }
 0x3f1   :  { %v10409_v37 = vpack.c.bf16 %v2015_v52, %v2013_v0  ;;  %v1972_v62 = vadd.f32 0.0009, %v1960_v15  ;;  %v1950_v38 = vsub.f32 %v1931_v31, %v12209_v2  ;;  %v10738_v50 = vpop.eup %10737  ;;  %v10771_v52 = vld [vmem:[#allocation4 + $0x38] sm:$0xff]  ;;  %v10772_v14 = vld [vmem:[#allocation4 + $0x40] sm:$0xff]  ;;  %v10773_v0 = vld [vmem:[#allocation2 + $0x8] sm:$0xff] }
 0x3f2   :  { %v2019_v59 = vmul.f32 %v10732_v56, %v1973_v16  ;;  %v1963_v32 = vmul.f32 2.0, %v1951_v28  ;;  %v10774_v15 = vld [vmem:[#allocation4 + $0x48] sm:$0xff]  ;;  %v10776_v16 = vld [vmem:[#allocation4 + $0x50] sm:$0xff]  ;;  %v10777_v28 = vld [vmem:[#allocation2 + $0x18] sm:$0xff] }
 0x3f3   :  { %v2017_v17 = vmul.f32 %v10734_v33, %v1972_v62  ;;  %v1962_v18 = vmul.f32 2.0, %v1950_v38  ;;  %v9364_v20 = vpop.f32.mrb[60].mxu1  ;;  %10410 = vmatpush3.bf16.msra.mxu1 %v10409_v37  ;;  %v10778_v31 = vld [vmem:[#allocation4 + $0x58] sm:$0xff]  ;;  %v10779_v56 = vld [vmem:[#allocation2 + $0x20] sm:$0xff]  ;;  %v10780_v37 = vld [vmem:[#allocation2 + $0x28] sm:$0xff] }
 0x3f4   :  { %v1975_v36 = vadd.f32 0.0009, %v1963_v32  ;;  %v2275_v39 = vpop.f32.mrb[61].mxu1  ;;  %10411 = vmatprep.subr.bf16.mxu1 %v11271_v5  ;;  %v10781_v62 = vld [vmem:[#allocation2 + $0x30] sm:$0xff]  ;;  %v10782_v38 = vld [vmem:[#allocation2 + $0x38] sm:$0xff]  ;;  %v10783_v33 = vld [vmem:[#allocation2 + $0x40] sm:$0xff] }
 0x3f5   :  { %v10412_v19 = vpack.c.bf16 %v2019_v59, %v2017_v17  ;;  %v1974_v40 = vadd.f32 0.0009, %v1962_v18  ;;  %v10381_v42 = vpack.c.bf16 %v9364_v20, %v2275_v39  ;;  %v10784_v59 = vld [vmem:[#allocation2 + $0x48] sm:$0xff]  ;;  %v10785_v32 = vld [vmem:[#allocation2 + $0x50] sm:$0xff]  ;;  %v10786_v17 = vld [vmem:[#allocation2 + $0x58] sm:$0xff] }
 0x3f6   :  { %v2023_v2 = vmul.f32 %v10736_v63, %v1975_v36  ;;  %v2502_v18 = vld [vmem:[%s13000_s18] sm:$0xff] }
 0x3f7   :  { %v2021_v55 = vmul.f32 %v10738_v50, %v1974_v40  ;;  %v9367_v41 = vpop.f32.mrb[62].mxu1  ;;  %10382 = vmatpush3.bf16.msra.mxu0 %v10381_v42  ;;  %10413 = vmatpush3.bf16.msra.mxu1 %v10412_v19 }
 0x3f8   :  { %v2285_v44 = vpop.f32.mrb[63].mxu1  ;;  %10383 = vmatprep.subr.bf16.mxu0 %v11271_v5  ;;  %10414 = vmatprep.subr.bf16.mxu1 %v11271_v5 }
 0x3f9   :  { %v10415_v43 = vpack.c.bf16 %v2023_v2, %v2021_v55  ;;  %v10384_v24 = vpack.c.bf16 %v9367_v41, %v2285_v44 }
 0x3fb   :  { %v9370_v60 = vpop.f32.mrb[64].mxu1  ;;  %10385 = vmatpush3.bf16.msra.mxu0 %v10384_v24  ;;  %10417 = vmatpush3.bf16.msk.msra.mxu1 %vm12246_vm5, %v10415_v43 }
 0x3fc   :  { %v2295_v48 = vpop.f32.mrb[65].mxu1  ;;  %10386 = vmatprep.subr.bf16.mxu0 %v11271_v5  ;;  %10455 = vmatprep.subr.bf16.mxu1 %v10418_v46 }
 0x3fd   :  { %v10387_v34 = vpack.c.bf16 %v9370_v60, %v2295_v48 }
 0x3fe   :  { %9432 = vmatmul.mubr.msk.f32.vlgmr.msra.gmra.mrb[72].mxu1 %vm2334_vm6, %v375_v9 }
 0x3ff   :  { %v9373_v51 = vpop.f32.mrb[66].mxu1  ;;  %10388 = vmatpush3.bf16.msra.mxu0 %v10387_v34  ;;  %10457 = vmatpush3.bf16.msra.mxu1 %v10418_v46 }
 0x400   :  { %v2305_v27 = vpop.f32.mrb[67].mxu1  ;;  %10389 = vmatprep.subr.bf16.mxu0 %v11271_v5  ;;  %10459 = vmatprep.subr.bf16.mxu1 %v10422_v26 }
 0x401   :  { %v10390_v3 = vpack.c.bf16 %v9373_v51, %v2305_v27  ;;  %9509 = vmatprep.mubr.msk.f32.mxu1 %vm376_vm0, %v10763_v54 }
 0x403   :  { %v9376_v29 = vpop.f32.mrb[68].mxu1  ;;  %10391 = vmatpush3.bf16.msra.mxu0 %v10390_v3  ;;  %10461 = vmatpush3.bf16.msra.mxu1 %v10422_v26  ;;  %v2967_v3 = vld [vmem:[#allocation10 + $0x8] sm:$0xff] }
 0x404   :  { %v2315_v7 = vpop.f32.mrb[69].mxu1  ;;  %10392 = vmatprep.subr.bf16.mxu0 %v11271_v5  ;;  %10463 = vmatprep.subr.bf16.mxu1 %v10426_v47 }
 0x405   :  { %v10393_v58 = vpack.c.bf16 %v9376_v29, %v2315_v7 }
 0x407   :  { %v9379_v11 = vpop.f32.mrb[70].mxu1  ;;  %10394 = vmatpush3.bf16.msra.mxu0 %v10393_v58  ;;  %10465 = vmatpush3.bf16.msra.mxu1 %v10426_v47 }
 0x408   :  { %v2325_v30 = vpop.f32.mrb[71].mxu1  ;;  %10395 = vmatprep.subr.bf16.mxu0 %v11271_v5 }
 0x409   :  { %v10396_v12 = vpack.c.bf16 %v9379_v11, %v2325_v30  ;;  %v2503_v30 = vld [vmem:[%s13000_s18 + $0x8] sm:$0xff] }
 0x40a   :  { %9510 = vmatmul.mubr.msk.f32.vlgmr.msra.gmra.mrb[74].mxu1 %vm376_vm0, %v10764_v49  ;;  %v2504_v49 = vld [vmem:[%s13000_s18 + $0x10] sm:$0xff] }
 0x40b   :  { %10398 = vmatpush3.bf16.msk.msra.mxu0 %vm12246_vm5, %v10396_v12  ;;  %9512 = vmatprep.mubr.msk.f32.mxu1 %vm376_vm0, %v10765_v13 }
 0x40c   :  { %10419 = vmatprep.subr.bf16.mxu0 %v10418_v46 }
 0x40e   :  { %9405 = vmatmul.mubr.msk.f32.vlgmr.msra.gmra.mrb[72].mxu0 %vm2334_vm6, %v375_v9  ;;  %9513 = vmatmul.mubr.msk.f32.gmra.mrb[76].mxu1 %vm376_vm0, %v10766_v25  ;;  %vm6687_vm6 = vcmask 64512  }
 0x40f   :  { %10421 = vmatpush3.bf16.msra.mxu0 %v10418_v46  ;;  %9515 = vmatprep.mubr.msk.f32.mxu1 %vm376_vm0, %v10767_v8  ;;  %v2505_v8 = vld [vmem:[%s13000_s18 + $0x18] sm:$0xff] }
 0x410   :  { %10423 = vmatprep.subr.bf16.mxu0 %v10422_v26  ;;  %9446 = vmatprep.mubr.msk.f32.mxu0 %vm376_vm0, %v10768_v10 }
 0x412   :  { %9516 = vmatmul.mubr.msk.f32.gmra.mrb[78].mxu1 %vm376_vm0, %v10769_v53  ;;  %v2506_v53 = vld [vmem:[%s13000_s18 + $0x20] sm:$0xff] }
 0x413   :  { %10425 = vmatpush3.bf16.msra.mxu0 %v10422_v26  ;;  %9518 = vmatprep.mubr.msk.f32.mxu1 %vm376_vm0, %v10770_v61 }
 0x414   :  { %10427 = vmatprep.subr.bf16.mxu0 %v10426_v47 }
 0x416   :  { %9519 = vmatmul.mubr.msk.f32.gmra.mrb[80].mxu1 %vm376_vm0, %v10771_v52 }
 0x417   :  { %10429 = vmatpush3.bf16.msra.mxu0 %v10426_v47  ;;  %9521 = vmatprep.mubr.msk.f32.mxu1 %vm376_vm0, %v10772_v14  ;;  %v2966_v47 = vld [vmem:[#allocation10] sm:$0xff]  ;;  %v2507_v14 = vld [vmem:[%s13000_s18 + $0x28] sm:$0xff] }
 0x418   :  { %v12289_v7 = vpack.c.bf16 %v2967_v3, %v2966_v47 }
 0x41a   :  { %9447 = vmatmul.mubr.msk.f32.vlgmr.msra.gmra.mrb[74].mxu0 %vm376_vm0, %v10773_v0  ;;  %9522 = vmatmul.mubr.msk.f32.gmra.mrb[82].mxu1 %vm376_vm0, %v10774_v15 }
 0x41b   :  { %9449 = vmatprep.mubr.msk.f32.mxu0 %vm376_vm0, %v10775_v57  ;;  %9524 = vmatprep.mubr.msk.f32.mxu1 %vm376_vm0, %v10776_v16 }
 0x41e   :  { %9450 = vmatmul.mubr.msk.f32.gmra.mrb[76].mxu0 %vm376_vm0, %v10777_v28  ;;  %9525 = vmatmul.mubr.msk.f32.gmra.mrb[84].mxu1 %vm376_vm0, %v10778_v31  ;;  %v12320_v28 = vld [vmem:[#allocation10 + $0x10] sm:$0xff] }
 0x41f   :  { %9452 = vmatprep.mubr.msk.f32.mxu0 %vm376_vm0, %v10779_v56  ;;  %9551 = vmatprep.mubr.msk.f32.mxu1 %vm538_vm1, %v2502_v18 }
 0x422   :  { %9453 = vmatmul.mubr.msk.f32.gmra.mrb[78].mxu0 %vm376_vm0, %v10780_v37 }
 0x423   :  { %9455 = vmatprep.mubr.msk.f32.mxu0 %vm376_vm0, %v10781_v62 }
 0x426   :  { %9456 = vmatmul.mubr.msk.f32.gmra.mrb[80].mxu0 %vm376_vm0, %v10782_v38 }
 0x427   :  { %9458 = vmatprep.mubr.msk.f32.mxu0 %vm376_vm0, %v10783_v33 }
 0x42a   :  { %9459 = vmatmul.mubr.msk.f32.gmra.mrb[82].mxu0 %vm376_vm0, %v10784_v59 }
 0x42b   :  { %9461 = vmatprep.mubr.msk.f32.mxu0 %vm376_vm0, %v10785_v32 }
 0x42e   :  { %9462 = vmatmul.mubr.msk.f32.gmra.mrb[84].mxu0 %vm376_vm0, %v10786_v17 }
 0x42f   :  { %9488 = vmatprep.mubr.msk.f32.mxu0 %vm538_vm1, %v2502_v18 }
 0x4d1   :  { %v2487_v20 = vpop.f32.mrb[72].mxu1 }
 0x4d2   :  { %v2491_v36 = vsel %vm2412_vm7, %v2487_v20, 0.0  ;;  %v9433_v39 = vpop.f32.mrb[73].mxu1 }
 0x4d3   :  { %2492 = vadd.xlane.f32.xlu0 %v2491_v36 }
 0x4dd   :  { %v9511_v63 = vpop.f32.mrb[74].mxu1 }
 0x4de   :  { %v2812_v19 = vpop.f32.mrb[75].mxu1 }
 0x4df   :  { %v10466_v40 = vpack.c.bf16 %v9511_v63, %v2812_v19 }
 0x4e1   :  { %v2408_v42 = vpop.f32.mrb[72].mxu0  ;;  %v9514_v21 = vpop.f32.mrb[76].mxu1  ;;  %10467 = vmatprep.subr.bf16.mxu1 %v10466_v40 }
 0x4e2   :  { %v9406_v22 = vpop.f32.mrb[73].mxu0  ;;  %v2413_v50 = vsel %vm2412_vm7, %v2408_v42, 0.0  ;;  %v2822_v2 = vpop.f32.mrb[77].mxu1  ;;  %10469 = vmatpush3.bf16.msra.mxu1 %v10466_v40  ;;  %vm7078_vm7 = vcmask 1042432  }
 0x4e3   :  { %2414 = vadd.xlane.f32.xlu0 %v2413_v50  ;;  %v10470_v55 = vpack.c.bf16 %v9514_v21, %v2822_v2 }
 0x4e5   :  { %v9517_v41 = vpop.f32.mrb[78].mxu1  ;;  %10471 = vmatprep.subr.bf16.mxu1 %v10470_v55 }
 0x4e6   :  { %v2832_v44 = vpop.f32.mrb[79].mxu1  ;;  %10473 = vmatpush3.bf16.msra.mxu1 %v10470_v55 }
 0x4e7   :  { %v10474_v46 = vpack.c.bf16 %v9517_v41, %v2832_v44 }
 0x4e9   :  { %v9520_v43 = vpop.f32.mrb[80].mxu1  ;;  %10475 = vmatprep.subr.bf16.mxu1 %v10474_v46 }
 0x4ea   :  { %v2842_v24 = vpop.f32.mrb[81].mxu1  ;;  %10477 = vmatpush3.bf16.msra.mxu1 %v10474_v46 }
 0x4eb   :  { %v10478_v4 = vpack.c.bf16 %v9520_v43, %v2842_v24 }
 0x4ed   :  { %v9448_v6 = vpop.f32.mrb[74].mxu0  ;;  %v9523_v60 = vpop.f32.mrb[82].mxu1  ;;  %10479 = vmatprep.subr.bf16.mxu1 %v10478_v4 }
 0x4ee   :  { %v2574_v9 = vpop.f32.mrb[75].mxu0  ;;  %v2852_v48 = vpop.f32.mrb[83].mxu1  ;;  %10481 = vmatpush3.bf16.msra.mxu1 %v10478_v4 }
 0x4ef   :  { %v10430_v26 = vpack.c.bf16 %v9448_v6, %v2574_v9  ;;  %v10482_v34 = vpack.c.bf16 %v9523_v60, %v2852_v48 }
 0x4f1   :  { %v9451_v45 = vpop.f32.mrb[76].mxu0  ;;  %10431 = vmatprep.subr.bf16.mxu0 %v10430_v26  ;;  %v9526_v35 = vpop.f32.mrb[84].mxu1  ;;  %10483 = vmatprep.subr.bf16.mxu1 %v10482_v34 }
 0x4f2   :  { %v2584_v51 = vpop.f32.mrb[77].mxu0  ;;  %10433 = vmatpush3.bf16.msra.mxu0 %v10430_v26  ;;  %v2862_v27 = vpop.f32.mrb[85].mxu1  ;;  %10485 = vmatpush3.bf16.msra.mxu1 %v10482_v34  ;;  %v12449_v26 = vld [vmem:[#allocation12] sm:$0xff] }
 0x4f3   :  { %v10434_v54 = vpack.c.bf16 %v9451_v45, %v2584_v51  ;;  %v10486_v29 = vpack.c.bf16 %v9526_v35, %v2862_v27 }
 0x4f5   :  { %v9454_v58 = vpop.f32.mrb[78].mxu0  ;;  %10435 = vmatprep.subr.bf16.mxu0 %v10434_v54  ;;  %10487 = vmatprep.subr.bf16.mxu1 %v10486_v29 }
 0x4f6   :  { %v2594_v11 = vpop.f32.mrb[79].mxu0  ;;  %10437 = vmatpush3.bf16.msra.mxu0 %v10434_v54  ;;  %10489 = vmatpush3.bf16.msra.mxu1 %v10486_v29 }
 0x4f7   :  { %v10438_v12 = vpack.c.bf16 %v9454_v58, %v2594_v11  ;;  %10507 = vmatprep.subr.bf16.mxu1 %v12289_v7 }
 0x4f9   :  { %v9457_v13 = vpop.f32.mrb[80].mxu0  ;;  %10439 = vmatprep.subr.bf16.mxu0 %v10438_v12  ;;  %9552 = vmatmul.mubr.msk.f32.vlgmr.msra.gmra.mrb[86].mxu1 %vm538_vm1, %v2503_v30 }
 0x4fa   :  { %v2604_v25 = vpop.f32.mrb[81].mxu0  ;;  %10441 = vmatpush3.bf16.msra.mxu0 %v10438_v12  ;;  %9554 = vmatprep.mubr.msk.f32.mxu1 %vm538_vm1, %v2504_v49 }
 0x4fb   :  { %v10442_v10 = vpack.c.bf16 %v9457_v13, %v2604_v25  ;;  %10509 = vmatpush3.bf16.msra.mxu1 %v12289_v7 }
 0x4fc   :  { %9600 = vmatprep.subr.mxu1 %v12320_v28 }
 0x4fd   :  { %v9460_v61 = vpop.f32.mrb[82].mxu0  ;;  %10443 = vmatprep.subr.bf16.mxu0 %v10442_v10  ;;  %9555 = vmatmul.mubr.msk.f32.gmra.mrb[88].mxu1 %vm538_vm1, %v2505_v8 }
 0x4fe   :  { %v2614_v52 = vpop.f32.mrb[83].mxu0  ;;  %10445 = vmatpush3.bf16.msra.mxu0 %v10442_v10  ;;  %9557 = vmatprep.mubr.msk.f32.mxu1 %vm538_vm1, %v2506_v53 }
 0x4ff   :  { %v10446_v0 = vpack.c.bf16 %v9460_v61, %v2614_v52  ;;  %9601 = vmatpush3.msra.mxu1 %v12320_v28 }
 0x500   :  { %10523 = vmatprep.subr.bf16.mxu1 %v12289_v7 }
 0x501   :  { %v9463_v15 = vpop.f32.mrb[84].mxu0  ;;  %10447 = vmatprep.subr.bf16.mxu0 %v10446_v0  ;;  %9558 = vmatmul.mubr.msk.f32.gmra.mrb[90].mxu1 %vm538_vm1, %v2507_v14 }
 0x502   :  { %v2624_v57 = vpop.f32.mrb[85].mxu0  ;;  %10449 = vmatpush3.bf16.msra.mxu0 %v10446_v0 }
 0x503   :  { %v10450_v16 = vpack.c.bf16 %v9463_v15, %v2624_v57 }
 0x505   :  { %10451 = vmatprep.subr.bf16.mxu0 %v10450_v16 }
 0x506   :  { %10453 = vmatpush3.bf16.msra.mxu0 %v10450_v16 }
 0x507   :  { %10491 = vmatprep.subr.bf16.mxu0 %v12289_v7 }
 0x509   :  { %9489 = vmatmul.mubr.msk.f32.vlgmr.msra.gmra.mrb[86].mxu0 %vm538_vm1, %v2503_v30 }
 0x50a   :  { %9491 = vmatprep.mubr.msk.f32.mxu0 %vm538_vm1, %v2504_v49  ;;  %10493 = vmatpush3.bf16.msra.mxu0 %v12289_v7 }
 0x50b   :  { %9564 = vmatprep.subr.mxu0 %v12320_v28 }
 0x50d   :  { %9492 = vmatmul.mubr.msk.f32.gmra.mrb[88].mxu0 %vm538_vm1, %v2505_v8 }
 0x50e   :  { %9494 = vmatprep.mubr.msk.f32.mxu0 %vm538_vm1, %v2506_v53  ;;  %9565 = vmatpush3.msra.mxu0 %v12320_v28 }
 0x511   :  { %9495 = vmatmul.mubr.msk.f32.gmra.mrb[90].mxu0 %vm538_vm1, %v2507_v14  ;;  %vm5563_vm1 = vcmask 17424  }
 0x560   :  { %v2493_v31 = vpop.xlane.xlu0 %2492 }
 0x570   :  { %v2415_v56 = vpop.xlane.xlu0 %2414 }
 0x571   :  { %2417 = vst.msk [vmem:[%s13007_s25] sm:$0x3] %vm2416_vm8, %v2415_v56  ;;  %v12455_v56 = vld [vmem:[#allocation12 + $0x10] sm:$0xff]  ;;  %vm6761_vm8 = vcmask 25600  }
 0x572   :  { %2495 = vst.msk [vmem:[%s13007_s25] sm:$0x3] %vm2494_vm9, %v2493_v31  ;;  %vm6765_vm9 = vcmask 25624  }
 0x5cc   :  { %v12333_v37 = vpop.f32.mrb[86].mxu1 }
 0x5cd   :  { %v12335_v62 = vpop.f32.mrb[87].mxu1  ;;  %v3650_v6 = vmul.f32 %v12333_v37, %v12333_v37 }
 0x5ce   :  { %9602 = vmatprep.mubr.msk.f32.mxu1 %vm2976_vm10, %v12335_v62  ;;  %v3649_v44 = vmul.f32 %v12335_v62, %v12335_v62 }
 0x5cf   :  { %9603 = vmatmul.mubr.msk.f32.vlgmr.msra.gmra.mrb[92].mxu1 %vm2976_vm10, %v12333_v37 }
 0x5d0   :  { %v12341_v38 = vpop.f32.mrb[88].mxu1  ;;  %10525 = vmatpush3.bf16.msra.mxu1 %v12289_v7 }
 0x5d1   :  { %v12344_v33 = vpop.f32.mrb[89].mxu1  ;;  %9636 = vmatprep.subr.mxu1 %v12320_v28  ;;  %v3652_v9 = vmul.f32 %v12341_v38, %v12341_v38 }
 0x5d2   :  { %9605 = vmatprep.mubr.msk.f32.mxu1 %vm2976_vm10, %v12344_v33  ;;  %v3651_v4 = vmul.f32 %v12344_v33, %v12344_v33 }
 0x5d3   :  { %9606 = vmatmul.mubr.msk.f32.gmra.mrb[94].mxu1 %vm2976_vm10, %v12341_v38 }
 0x5d4   :  { %v12351_v59 = vpop.f32.mrb[90].mxu1  ;;  %9637 = vmatpush3.msra.mxu1 %v12320_v28 }
 0x5d5   :  { %v12354_v32 = vpop.f32.mrb[91].mxu1  ;;  %10539 = vmatprep.subr.bf16.mxu1 %v12289_v7  ;;  %v3654_v48 = vmul.f32 %v12351_v59, %v12351_v59 }
 0x5d6   :  { %9608 = vmatprep.mubr.msk.f32.mxu1 %vm2976_vm10, %v12354_v32  ;;  %v3653_v60 = vmul.f32 %v12354_v32, %v12354_v32 }
 0x5d7   :  { %9609 = vmatmul.mubr.msk.f32.gmra.mrb[96].mxu1 %vm2976_vm10, %v12351_v59 }
 0x5dc   :  { %v12361_v17 = vpop.f32.mrb[86].mxu0 }
 0x5dd   :  { %v3870_v18 = vmul.f32 %v12333_v37, %v12361_v17  ;;  %v12365_v20 = vpop.f32.mrb[87].mxu0  ;;  %v3430_v63 = vmul.f32 %v12361_v17, %v12361_v17 }
 0x5de   :  { %v3429_v36 = vmul.f32 %v12365_v20, %v12365_v20  ;;  %v3869_v39 = vmul.f32 %v12335_v62, %v12365_v20  ;;  %9566 = vmatprep.mubr.msk.f32.mxu0 %vm2976_vm10, %v12365_v20 }
 0x5df   :  { %9567 = vmatmul.mubr.msk.f32.vlgmr.msra.gmra.mrb[92].mxu0 %vm2976_vm10, %v12361_v17 }
 0x5e0   :  { %v12377_v19 = vpop.f32.mrb[88].mxu0  ;;  %9638 = vmatprep.mubr.msk.f32.mxu1 %vm2976_vm10, %v3429_v36 }
 0x5e1   :  { %v3872_v40 = vmul.f32 %v12341_v38, %v12377_v19  ;;  %v12382_v42 = vpop.f32.mrb[89].mxu0  ;;  %9639 = vmatmul.mubr.msk.f32.vlgmr.msra.gmra.mrb[98].mxu1 %vm2976_vm10, %v3430_v63  ;;  %v3432_v50 = vmul.f32 %v12377_v19, %v12377_v19 }
 0x5e2   :  { %v3431_v21 = vmul.f32 %v12382_v42, %v12382_v42  ;;  %v3871_v22 = vmul.f32 %v12344_v33, %v12382_v42  ;;  %9569 = vmatprep.mubr.msk.f32.mxu0 %vm2976_vm10, %v12382_v42  ;;  %10541 = vmatpush3.bf16.msra.mxu1 %v12289_v7 }
 0x5e3   :  { %9570 = vmatmul.mubr.msk.f32.gmra.mrb[94].mxu0 %vm2976_vm10, %v12377_v19  ;;  %9672 = vmatprep.subr.mxu1 %v12320_v28 }
 0x5e4   :  { %v12397_v2 = vpop.f32.mrb[90].mxu0  ;;  %9641 = vmatprep.mubr.msk.f32.mxu1 %vm2976_vm10, %v3431_v21 }
 0x5e5   :  { %v3874_v55 = vmul.f32 %v12351_v59, %v12397_v2  ;;  %v12402_v41 = vpop.f32.mrb[91].mxu0  ;;  %9642 = vmatmul.mubr.msk.f32.gmra.mrb[100].mxu1 %vm2976_vm10, %v3432_v50  ;;  %v3434_v24 = vmul.f32 %v12397_v2, %v12397_v2  ;;  %v2974_v50 = vld [vmem:[#allocation12 + $0x28] sm:$0xf] }
 0x5e6   :  { %v3433_v46 = vmul.f32 %v12402_v41, %v12402_v41  ;;  %v3873_v43 = vmul.f32 %v12354_v32, %v12402_v41  ;;  %9572 = vmatprep.mubr.msk.f32.mxu0 %vm2976_vm10, %v12402_v41  ;;  %9673 = vmatpush3.msra.mxu1 %v12320_v28 }
 0x5e7   :  { %9573 = vmatmul.mubr.msk.f32.gmra.mrb[96].mxu0 %vm2976_vm10, %v12397_v2  ;;  %10555 = vmatprep.subr.bf16.mxu1 %v12289_v7 }
 0x5e8   :  { %9644 = vmatprep.mubr.msk.f32.mxu1 %vm2976_vm10, %v3433_v46  ;;  %9587 = vmatprep.mubr.msk.f32.mxu0 %vm376_vm0, %v12449_v26 }
 0x5e9   :  { %9645 = vmatmul.mubr.msk.f32.gmra.mrb[102].mxu1 %vm2976_vm10, %v3434_v24 }
 0x5ea   :  { %9674 = vmatprep.mubr.msk.f32.mxu1 %vm2976_vm10, %v3649_v44 }
 0x5ed   :  { %9675 = vmatmul.mubr.msk.f32.vlgmr.msra.gmra.mrb[104].mxu1 %vm2976_vm10, %v3650_v6 }
 0x5ee   :  { %9677 = vmatprep.mubr.msk.f32.mxu1 %vm2976_vm10, %v3651_v4  ;;  %10557 = vmatpush3.bf16.msra.mxu1 %v12289_v7 }
 0x5ef   :  { %9708 = vmatprep.subr.mxu1 %v12320_v28 }
 0x5f1   :  { %9678 = vmatmul.mubr.msk.f32.gmra.mrb[106].mxu1 %vm2976_vm10, %v3652_v9 }
 0x5f2   :  { %9680 = vmatprep.mubr.msk.f32.mxu1 %vm2976_vm10, %v3653_v60  ;;  %9709 = vmatpush3.msra.mxu1 %v12320_v28  ;;  %v12453_v28 = vld [vmem:[#allocation12 + $0x8] sm:$0xff] }
 0x5f3   :  { %10570 = vmatprep.subr.bf16.mxu1 %v11271_v5 }
 0x5f5   :  { %9681 = vmatmul.mubr.msk.f32.gmra.mrb[108].mxu1 %vm2976_vm10, %v3654_v48 }
 0x5f6   :  { %9710 = vmatprep.mubr.msk.f32.mxu1 %vm2976_vm10, %v3869_v39  ;;  %v12461_v39 = vld [vmem:[#allocation12 + $0x18] sm:$0xff] }
 0x5f9   :  { %9711 = vmatmul.mubr.msk.f32.vlgmr.msra.gmra.mrb[110].mxu1 %vm2976_vm10, %v3870_v18 }
 0x5fa   :  { %9713 = vmatprep.mubr.msk.f32.mxu1 %vm2976_vm10, %v3871_v22 }
 0x5fd   :  { %9714 = vmatmul.mubr.msk.f32.gmra.mrb[112].mxu1 %vm2976_vm10, %v3872_v40  ;;  %v12463_v40 = vld [vmem:[#allocation12 + $0x20] sm:$0xff] }
 0x5fe   :  { %9716 = vmatprep.mubr.msk.f32.mxu1 %vm2976_vm10, %v3873_v43 }
 0x601   :  { %9717 = vmatmul.mubr.msk.f32.gmra.mrb[114].mxu1 %vm2976_vm10, %v3874_v55 }
 0x602   :  { %9752 = vmatprep.mubr.msk.f32.mxu1 %vm11272_vm2, %v11273_v1 }
 0x6a2   :  { %v9604_v34 = vpop.f32.mrb[92].mxu1 }
 0x6a3   :  { %v3287_v45 = vpop.f32.mrb[93].mxu1 }
 0x6a4   :  { %v10510_v35 = vpack.c.bf16 %v9604_v34, %v3287_v45 }
 0x6a6   :  { %v9607_v51 = vpop.f32.mrb[94].mxu1 }
 0x6a7   :  { %v3297_v27 = vpop.f32.mrb[95].mxu1 }
 0x6a8   :  { %v10514_v47 = vpack.c.bf16 %v9607_v51, %v3297_v27 }
 0x6aa   :  { %v9610_v3 = vpop.f32.mrb[96].mxu1 }
 0x6ab   :  { %v3307_v54 = vpop.f32.mrb[97].mxu1 }
 0x6ac   :  { %v10518_v29 = vpack.c.bf16 %v9610_v3, %v3307_v54 }
 0x6b2   :  { %v9568_v7 = vpop.f32.mrb[92].mxu0 }
 0x6b3   :  { %v3061_v58 = vpop.f32.mrb[93].mxu0 }
 0x6b4   :  { %v10494_v11 = vpack.c.bf16 %v9568_v7, %v3061_v58  ;;  %v9640_v30 = vpop.f32.mrb[98].mxu1 }
 0x6b5   :  { %v3519_v12 = vpop.f32.mrb[99].mxu1 }
 0x6b6   :  { %v10526_v49 = vpack.c.bf16 %v9640_v30, %v3519_v12  ;;  %v9571_v13 = vpop.f32.mrb[94].mxu0  ;;  %10495 = vmatprep.subr.bf16.mxu0 %v10494_v11 }
 0x6b7   :  { %v3071_v25 = vpop.f32.mrb[95].mxu0  ;;  %10497 = vmatpush3.bf16.msra.mxu0 %v10494_v11 }
 0x6b8   :  { %v10498_v8 = vpack.c.bf16 %v9571_v13, %v3071_v25  ;;  %v9643_v10 = vpop.f32.mrb[100].mxu1 }
 0x6b9   :  { %v3529_v53 = vpop.f32.mrb[101].mxu1 }
 0x6ba   :  { %v10530_v61 = vpack.c.bf16 %v9643_v10, %v3529_v53  ;;  %v9574_v52 = vpop.f32.mrb[96].mxu0  ;;  %10499 = vmatprep.subr.bf16.mxu0 %v10498_v8 }
 0x6bb   :  { %v3081_v14 = vpop.f32.mrb[97].mxu0  ;;  %10501 = vmatpush3.bf16.msra.mxu0 %v10498_v8 }
 0x6bc   :  { %v10502_v0 = vpack.c.bf16 %v9574_v52, %v3081_v14  ;;  %v9646_v15 = vpop.f32.mrb[102].mxu1 }
 0x6bd   :  { %v3539_v57 = vpop.f32.mrb[103].mxu1 }
 0x6be   :  { %v10534_v16 = vpack.c.bf16 %v9646_v15, %v3539_v57  ;;  %10503 = vmatprep.subr.bf16.mxu0 %v10502_v0 }
 0x6bf   :  { %10505 = vmatpush3.bf16.msra.mxu0 %v10502_v0 }
 0x6c0   :  { %10511 = vmatprep.subr.bf16.mxu0 %v10510_v35  ;;  %v9676_v31 = vpop.f32.mrb[104].mxu1 }
 0x6c1   :  { %v3739_v18 = vpop.f32.mrb[105].mxu1 }
 0x6c2   :  { %v10542_v36 = vpack.c.bf16 %v9676_v31, %v3739_v18  ;;  %9588 = vmatmul.mubr.msk.f32.vlgmr.msra.gmra.mrb[98].mxu0 %vm376_vm0, %v12453_v28 }
 0x6c3   :  { %10513 = vmatpush3.bf16.msra.mxu0 %v10510_v35  ;;  %9590 = vmatprep.mubr.msk.f32.mxu0 %vm376_vm0, %v12455_v56 }
 0x6c4   :  { %10515 = vmatprep.subr.bf16.mxu0 %v10514_v47  ;;  %v9679_v63 = vpop.f32.mrb[106].mxu1 }
 0x6c5   :  { %v3749_v21 = vpop.f32.mrb[107].mxu1 }
 0x6c6   :  { %v10546_v22 = vpack.c.bf16 %v9679_v63, %v3749_v21  ;;  %9591 = vmatmul.mubr.msk.f32.gmra.mrb[100].mxu0 %vm376_vm0, %v12461_v39 }
 0x6c7   :  { %10517 = vmatpush3.bf16.msra.mxu0 %v10514_v47  ;;  %9593 = vmatprep.mubr.msk.f32.mxu0 %vm376_vm0, %v12463_v40 }
 0x6c8   :  { %10519 = vmatprep.subr.bf16.mxu0 %v10518_v29  ;;  %v9682_v55 = vpop.f32.mrb[108].mxu1 }
 0x6c9   :  { %v3759_v44 = vpop.f32.mrb[109].mxu1 }
 0x6ca   :  { %v10550_v46 = vpack.c.bf16 %v9682_v55, %v3759_v44  ;;  %9594 = vmatmul.mubr.msk.f32.gmra.mrb[102].mxu0 %vm376_vm0, %v2974_v50 }
 0x6cb   :  { %10521 = vmatpush3.bf16.msra.mxu0 %v10518_v29  ;;  %9623 = vmatprep.mubr.msk.f32.mxu0 %vm376_vm0, %v12449_v26 }
 0x6cc   :  { %10527 = vmatprep.subr.bf16.mxu0 %v10526_v49  ;;  %v9712_v43 = vpop.f32.mrb[110].mxu1 }
 0x6cd   :  { %v3959_v24 = vpop.f32.mrb[111].mxu1 }
 0x6ce   :  { %v10558_v4 = vpack.c.bf16 %v9712_v43, %v3959_v24  ;;  %9624 = vmatmul.mubr.msk.f32.vlgmr.msra.gmra.mrb[104].mxu0 %vm376_vm0, %v12453_v28 }
 0x6cf   :  { %10529 = vmatpush3.bf16.msra.mxu0 %v10526_v49  ;;  %9626 = vmatprep.mubr.msk.f32.mxu0 %vm376_vm0, %v12455_v56 }
 0x6d0   :  { %10531 = vmatprep.subr.bf16.mxu0 %v10530_v61  ;;  %v9715_v6 = vpop.f32.mrb[112].mxu1 }
 0x6d1   :  { %v3969_v60 = vpop.f32.mrb[113].mxu1 }
 0x6d2   :  { %v10562_v9 = vpack.c.bf16 %v9715_v6, %v3969_v60  ;;  %9627 = vmatmul.mubr.msk.f32.gmra.mrb[106].mxu0 %vm376_vm0, %v12461_v39 }
 0x6d3   :  { %10533 = vmatpush3.bf16.msra.mxu0 %v10530_v61  ;;  %9629 = vmatprep.mubr.msk.f32.mxu0 %vm376_vm0, %v12463_v40 }
 0x6d4   :  { %10535 = vmatprep.subr.bf16.mxu0 %v10534_v16  ;;  %v9718_v48 = vpop.f32.mrb[114].mxu1 }
 0x6d5   :  { %v3979_v34 = vpop.f32.mrb[115].mxu1 }
 0x6d6   :  { %v10566_v45 = vpack.c.bf16 %v9718_v48, %v3979_v34  ;;  %9630 = vmatmul.mubr.msk.f32.gmra.mrb[108].mxu0 %vm376_vm0, %v2974_v50 }
 0x6d7   :  { %10537 = vmatpush3.bf16.msra.mxu0 %v10534_v16  ;;  %9659 = vmatprep.mubr.msk.f32.mxu0 %vm376_vm0, %v12449_v26 }
 0x6d8   :  { %10543 = vmatprep.subr.bf16.mxu0 %v10542_v36 }
 0x6da   :  { %9660 = vmatmul.mubr.msk.f32.vlgmr.msra.gmra.mrb[110].mxu0 %vm376_vm0, %v12453_v28 }
 0x6db   :  { %10545 = vmatpush3.bf16.msra.mxu0 %v10542_v36  ;;  %9662 = vmatprep.mubr.msk.f32.mxu0 %vm376_vm0, %v12455_v56 }
 0x6dc   :  { %10547 = vmatprep.subr.bf16.mxu0 %v10546_v22 }
 0x6de   :  { %9663 = vmatmul.mubr.msk.f32.gmra.mrb[112].mxu0 %vm376_vm0, %v12461_v39 }
 0x6df   :  { %10549 = vmatpush3.bf16.msra.mxu0 %v10546_v22  ;;  %9665 = vmatprep.mubr.msk.f32.mxu0 %vm376_vm0, %v12463_v40 }
 0x6e0   :  { %10551 = vmatprep.subr.bf16.mxu0 %v10550_v46 }
 0x6e2   :  { %9666 = vmatmul.mubr.msk.f32.gmra.mrb[114].mxu0 %vm376_vm0, %v2974_v50 }
 0x6e3   :  { %10553 = vmatpush3.bf16.msra.mxu0 %v10550_v46  ;;  %9695 = vmatprep.mubr.msk.f32.mxu0 %vm376_vm0, %v12449_v26 }
 0x6e4   :  { %10559 = vmatprep.subr.bf16.mxu0 %v10558_v4 }
 0x6e6   :  { %9696 = vmatmul.mubr.msk.f32.vlgmr.msra.gmra.mrb[116].mxu0 %vm376_vm0, %v12453_v28 }
 0x6e7   :  { %10561 = vmatpush3.bf16.msra.mxu0 %v10558_v4  ;;  %9698 = vmatprep.mubr.msk.f32.mxu0 %vm376_vm0, %v12455_v56 }
 0x6e8   :  { %10563 = vmatprep.subr.bf16.mxu0 %v10562_v9 }
 0x6ea   :  { %9699 = vmatmul.mubr.msk.f32.gmra.mrb[118].mxu0 %vm376_vm0, %v12461_v39 }
 0x6eb   :  { %10565 = vmatpush3.bf16.msra.mxu0 %v10562_v9  ;;  %9701 = vmatprep.mubr.msk.f32.mxu0 %vm376_vm0, %v12463_v40 }
 0x6ec   :  { %10567 = vmatprep.subr.bf16.mxu0 %v10566_v45 }
 0x6ee   :  { %9702 = vmatmul.mubr.msk.f32.gmra.mrb[120].mxu0 %vm376_vm0, %v2974_v50 }
 0x6ef   :  { %10569 = vmatpush3.bf16.msra.mxu0 %v10566_v45  ;;  %9731 = vmatprep.mubr.msk.f32.mxu0 %vm376_vm0, %v12449_v26 }
 0x6f0   :  { %10584 = vmatprep.subr.bf16.mxu0 %v11271_v5 }
 0x6f2   :  { %9732 = vmatmul.mubr.msk.f32.vlgmr.msra.gmra.mrb[122].mxu0 %vm376_vm0, %v12453_v28 }
 0x6f3   :  { %9734 = vmatprep.mubr.msk.f32.mxu0 %vm376_vm0, %v12455_v56 }
 0x6f6   :  { %9735 = vmatmul.mubr.msk.f32.gmra.mrb[124].mxu0 %vm376_vm0, %v12461_v39 }
 0x6f7   :  { %9737 = vmatprep.mubr.msk.f32.mxu0 %vm376_vm0, %v12463_v40 }
 0x6fa   :  { %9738 = vmatmul.mubr.msk.f32.gmra.mrb[126].mxu0 %vm376_vm0, %v2974_v50 }
 0x6fb   :  { %9782 = vmatprep.mubr.msk.f32.mxu0 %vm11272_vm2, %v11273_v1 }
 0x795   :  { %v9589_v26 = vpop.f32.mrb[98].mxu0 }
 0x796   :  { %v3174_v35 = vpop.f32.mrb[99].mxu0  ;;  %v3412_v53 = vmul.f32 %v9589_v26, %v9589_v26 }
 0x797   :  { %v3411_v61 = vmul.f32 %v3174_v35, %v3174_v35 }
 0x799   :  { %v9592_v51 = vpop.f32.mrb[100].mxu0 }
 0x79a   :  { %v3184_v27 = vpop.f32.mrb[101].mxu0  ;;  %v3414_v57 = vmul.f32 %v9592_v51, %v9592_v51 }
 0x79b   :  { %v3413_v16 = vmul.f32 %v3184_v27, %v3184_v27 }
 0x79d   :  { %v9595_v47 = vpop.f32.mrb[102].mxu0 }
 0x79e   :  { %v3194_v3 = vpop.f32.mrb[103].mxu0  ;;  %v3416_v36 = vmul.f32 %v9595_v47, %v9595_v47 }
 0x79f   :  { %v3415_v39 = vmul.f32 %v3194_v3, %v3194_v3 }
 0x7a1   :  { %v9625_v54 = vpop.f32.mrb[104].mxu0 }
 0x7a2   :  { %v12517_v29 = vmul.f32 %v9625_v54, %v9589_v26  ;;  %v3382_v7 = vpop.f32.mrb[105].mxu0  ;;  %v3418_v50 = vmul.f32 %v9625_v54, %v9625_v54 }
 0x7a3   :  { %v12519_v58 = vmul.f32 %v3382_v7, %v3174_v35  ;;  %v3417_v55 = vmul.f32 %v3382_v7, %v3382_v7 }
 0x7a5   :  { %v9628_v11 = vpop.f32.mrb[106].mxu0 }
 0x7a6   :  { %v12521_v30 = vmul.f32 %v9628_v11, %v9592_v51  ;;  %v3392_v12 = vpop.f32.mrb[107].mxu0  ;;  %v3420_v4 = vmul.f32 %v9628_v11, %v9628_v11 }
 0x7a7   :  { %v12523_v49 = vmul.f32 %v3392_v12, %v3184_v27  ;;  %v3419_v60 = vmul.f32 %v3392_v12, %v3392_v12 }
 0x7a9   :  { %v9631_v13 = vpop.f32.mrb[108].mxu0 }
 0x7aa   :  { %v12525_v25 = vmul.f32 %v9631_v13, %v9595_v47  ;;  %v3402_v8 = vpop.f32.mrb[109].mxu0  ;;  %v3422_v27 = vmul.f32 %v9631_v13, %v9631_v13 }
 0x7ab   :  { %v12527_v10 = vmul.f32 %v3402_v8, %v3194_v3  ;;  %v3421_v3 = vmul.f32 %v3402_v8, %v3402_v8 }
 0x7ad   :  { %v9661_v52 = vpop.f32.mrb[110].mxu0 }
 0x7ae   :  { %v3644_v14 = vsub.f32 %v9661_v52, %v3412_v53  ;;  %v3614_v0 = vpop.f32.mrb[111].mxu0 }
 0x7af   :  { %v3643_v15 = vsub.f32 %v3614_v0, %v3411_v61 }
 0x7b1   :  { %v9664_v28 = vpop.f32.mrb[112].mxu0 }
 0x7b2   :  { %v3646_v31 = vsub.f32 %v9664_v28, %v3414_v57  ;;  %v3624_v56 = vpop.f32.mrb[113].mxu0 }
 0x7b3   :  { %v3645_v18 = vsub.f32 %v3624_v56, %v3413_v16 }
 0x7b5   :  { %v9667_v63 = vpop.f32.mrb[114].mxu0 }
 0x7b6   :  { %v3648_v40 = vsub.f32 %v9667_v63, %v3416_v36  ;;  %v3634_v21 = vpop.f32.mrb[115].mxu0 }
 0x7b7   :  { %v3647_v22 = vsub.f32 %v3634_v21, %v3415_v39 }
 0x7b9   :  { %v9697_v44 = vpop.f32.mrb[116].mxu0 }
 0x7ba   :  { %v3864_v46 = vsub.f32 %v9697_v44, %v3418_v50  ;;  %v3834_v43 = vpop.f32.mrb[117].mxu0 }
 0x7bb   :  { %v3863_v24 = vsub.f32 %v3834_v43, %v3417_v55 }
 0x7bc   :  { %v4102_v6 = vadd.f32 %v3864_v46, %v3644_v14 }
 0x7bd   :  { %v4101_v9 = vadd.f32 %v3863_v24, %v3643_v15  ;;  %v9700_v48 = vpop.f32.mrb[118].mxu0 }
 0x7be   :  { %v4108_v34 = vadd.f32 0.0009, %v4102_v6  ;;  %v3866_v45 = vsub.f32 %v9700_v48, %v3420_v4  ;;  %v3844_v26 = vpop.f32.mrb[119].mxu0 }
 0x7bf   :  { %v4107_v35 = vadd.f32 0.0009, %v4101_v9  ;;  %v3865_v51 = vsub.f32 %v3844_v26, %v3419_v60 }
 0x7c0   :  { %10739 = vrcp.f32 %v4108_v34  ;;  %v4104_v47 = vadd.f32 %v3866_v45, %v3646_v31 }
 0x7c1   :  { %10741 = vrcp.f32 %v4107_v35  ;;  %v4103_v54 = vadd.f32 %v3865_v51, %v3645_v18  ;;  %v9703_v7 = vpop.f32.mrb[120].mxu0 }
 0x7c2   :  { %v4110_v53 = vadd.f32 0.0009, %v4104_v47  ;;  %v3868_v61 = vsub.f32 %v9703_v7, %v3422_v27  ;;  %v3854_v52 = vpop.f32.mrb[121].mxu0 }
 0x7c3   :  { %v4109_v11 = vadd.f32 0.0009, %v4103_v54  ;;  %v3867_v14 = vsub.f32 %v3854_v52, %v3421_v3  ;;  %v4208_v54 = vld [vmem:[#allocation30] sm:$0xff]  ;;  %v2975_v52 = vld [vmem:[#allocation13] sm:$0x3] }
 0x7c4   :  { %10743 = vrcp.f32 %v4110_v53  ;;  %v4106_v12 = vadd.f32 %v3868_v61, %v3648_v40 }
 0x7c5   :  { %10745 = vrcp.f32 %v4109_v11  ;;  %v4105_v0 = vadd.f32 %v3867_v14, %v3647_v22  ;;  %v9733_v15 = vpop.f32.mrb[122].mxu0  ;;  %v4210_v11 = vld [vmem:[#allocation30 + $0x10] sm:$0xff] }
 0x7c6   :  { %v4112_v57 = vadd.f32 0.0009, %v4106_v12  ;;  %v4084_v16 = vsub.f32 %v9733_v15, %v12517_v29  ;;  %v4054_v13 = vpop.f32.mrb[123].mxu0  ;;  %v4573_v14 = vld [vmem:[#allocation15] sm:$0xff]  ;;  %v4574_v12 = vld [vmem:[#allocation15 + $0x8] sm:$0xf] }
 0x7c7   :  { %v4111_v28 = vadd.f32 0.0009, %v4105_v0  ;;  %v4083_v8 = vsub.f32 %v4054_v13, %v12519_v58  ;;  %v12568_v0 = vpack.c.bf16 %v4574_v12, %v4573_v14 }
 0x7c8   :  { %10747 = vrcp.f32 %v4112_v57  ;;  %v4090_v31 = vmul.f32 2.0, %v4084_v16  ;;  %v4211_v57 = vld [vmem:[%s13002_s20] sm:$0xff] }
 0x7c9   :  { %10749 = vrcp.f32 %v4111_v28  ;;  %v4089_v56 = vmul.f32 2.0, %v4083_v8  ;;  %v9736_v18 = vpop.f32.mrb[124].mxu0  ;;  %v4212_v8 = vld [vmem:[%s13002_s20 + $0x8] sm:$0xff] }
 0x7ca   :  { %v10740_v36 = vpop.eup %10739  ;;  %v4096_v39 = vadd.f32 0.0009, %v4090_v31  ;;  %v4086_v63 = vsub.f32 %v9736_v18, %v12521_v30  ;;  %v4064_v40 = vpop.f32.mrb[125].mxu0 }
 0x7cb   :  { %v10742_v21 = vpop.eup %10741  ;;  %v4095_v22 = vadd.f32 0.0009, %v4089_v56  ;;  %v4085_v50 = vsub.f32 %v4064_v40, %v12523_v49 }
 0x7cc   :  { %v4116_v55 = vmul.f32 %v10740_v36, %v4096_v39  ;;  %v4092_v29 = vmul.f32 2.0, %v4086_v63  ;;  %v4213_v36 = vld [vmem:[%s13002_s20 + $0x10] sm:$0xff] }
 0x7cd   :  { %v4114_v44 = vmul.f32 %v10742_v21, %v4095_v22  ;;  %v4091_v46 = vmul.f32 2.0, %v4085_v50  ;;  %v9739_v43 = vpop.f32.mrb[126].mxu0 }
 0x7ce   :  { %v10744_v58 = vpop.eup %10743  ;;  %v4098_v24 = vadd.f32 0.0009, %v4092_v29  ;;  %v4088_v4 = vsub.f32 %v9739_v43, %v12525_v25  ;;  %v4074_v6 = vpop.f32.mrb[127].mxu0  ;;  %v4209_v25 = vld [vmem:[#allocation30 + $0x8] sm:$0xff] }
 0x7cf   :  { %v10746_v60 = vpop.eup %10745  ;;  %v10571_v9 = vpack.c.bf16 %v4116_v55, %v4114_v44  ;;  %v4097_v48 = vadd.f32 0.0009, %v4091_v46  ;;  %v4087_v30 = vsub.f32 %v4074_v6, %v12527_v10  ;;  %v10580_v10 = vpack.c.bf16 %v4209_v25, %v4208_v54 }
 0x7d0   :  { %v4120_v34 = vmul.f32 %v10744_v58, %v4098_v24  ;;  %v4094_v45 = vmul.f32 2.0, %v4088_v4 }
 0x7d1   :  { %v4118_v26 = vmul.f32 %v10746_v60, %v4097_v48  ;;  %v4093_v35 = vmul.f32 2.0, %v4087_v30  ;;  %10572 = vmatpush3.bf16.msra.mxu1 %v10571_v9 }
 0x7d2   :  { %v10748_v49 = vpop.eup %10747  ;;  %v4100_v51 = vadd.f32 0.0009, %v4094_v45  ;;  %10573 = vmatprep.subr.bf16.mxu1 %v11271_v5 }
 0x7d3   :  { %v10750_v27 = vpop.eup %10749  ;;  %v10574_v47 = vpack.c.bf16 %v4120_v34, %v4118_v26  ;;  %v4099_v3 = vadd.f32 0.0009, %v4093_v35 }
 0x7d4   :  { %v4124_v7 = vmul.f32 %v10748_v49, %v4100_v51 }
 0x7d5   :  { %v4122_v53 = vmul.f32 %v10750_v27, %v4099_v3  ;;  %10575 = vmatpush3.bf16.msra.mxu1 %v10574_v47 }
 0x7d6   :  { %10576 = vmatprep.subr.bf16.mxu1 %v11271_v5 }
 0x7d7   :  { %v10577_v61 = vpack.c.bf16 %v4124_v7, %v4122_v53  ;;  %v12706_v53 = vld [vmem:[#allocation16] sm:$0xff] }
 0x7d9   :  { %10579 = vmatpush3.bf16.msk.msra.mxu1 %vm12246_vm5, %v10577_v61 }
 0x7da   :  { %10581 = vmatprep.subr.bf16.mxu1 %v10580_v10 }
 0x7dc   :  { %9753 = vmatmul.mubr.msk.f32.vlgmr.msra.gmra.mrb[116].mxu1 %vm4125_vm11, %v2975_v52  ;;  %v12713_v52 = vld [vmem:[#allocation16 + $0x8] sm:$0xff]  ;;  %vm7917_vm11 = vcmask 33824  }
 0x7dd   :  { %10583 = vmatpush3.bf16.msra.mxu1 %v10580_v10  ;;  %9761 = vmatprep.mubr.msk.f32.mxu1 %vm2976_vm10, %v12365_v20 }
 0x7de   :  { %9759 = vmatprep.subr.mxu1 %v4210_v11 }
 0x7e1   :  { %9760 = vmatpush3.msra.mxu1 %v4210_v11 }
 0x7e2   :  { %9762 = vmatmul.mubr.msk.f32.vlgmr.msra.gmra.mrb[118].mxu1 %vm2976_vm10, %v12361_v17  ;;  %10594 = vmatprep.subr.bf16.mxu1 %v10580_v10 }
 0x7e3   :  { %9764 = vmatprep.mubr.msk.f32.mxu1 %vm2976_vm10, %v12382_v42  ;;  %10596 = vmatpush3.bf16.msra.mxu1 %v10580_v10 }
 0x7e4   :  { %9795 = vmatprep.subr.mxu1 %v4210_v11 }
 0x7e6   :  { %9765 = vmatmul.mubr.msk.f32.gmra.mrb[120].mxu1 %vm2976_vm10, %v12377_v19 }
 0x7e7   :  { %9767 = vmatprep.mubr.msk.f32.mxu1 %vm2976_vm10, %v12402_v41  ;;  %9796 = vmatpush3.msra.mxu1 %v4210_v11 }
 0x7e8   :  { %10606 = vmatprep.subr.bf16.mxu1 %v11271_v5 }
 0x7ea   :  { %9768 = vmatmul.mubr.msk.f32.gmra.mrb[122].mxu1 %vm2976_vm10, %v12397_v2 }
 0x7eb   :  { %9797 = vmatprep.mubr.msk.f32.mxu1 %vm2976_vm10, %v12335_v62 }
 0x7ee   :  { %9798 = vmatmul.mubr.msk.f32.vlgmr.msra.gmra.mrb[124].mxu1 %vm2976_vm10, %v12333_v37 }
 0x7ef   :  { %9800 = vmatprep.mubr.msk.f32.mxu1 %vm2976_vm10, %v12344_v33  ;;  %10609 = vmatpush3.bf16.msk.msra.mxu1 %vm12246_vm5, %v12568_v0 }
 0x7f0   :  { %10613 = vmatprep.subr.bf16.mxu1 %v11271_v5 }
 0x7f2   :  { %9801 = vmatmul.mubr.msk.f32.gmra.mrb[126].mxu1 %vm2976_vm10, %v12341_v38 }
 0x7f3   :  { %9803 = vmatprep.mubr.msk.f32.mxu1 %vm2976_vm10, %v12354_v32 }
 0x7f6   :  { %9804 = vmatmul.mubr.msk.f32.gmra.mrb[128].mxu1 %vm2976_vm10, %v12351_v59 }
 0x7f7   :  { %9831 = vmatprep.mubr.msk.f32.mxu1 %vm11272_vm2, %v11273_v1 }
 0x8af   :  { %v4198_v62 = vpop.f32.mrb[116].mxu1 }
 0x8b0   :  { %v9754_v17 = vpop.f32.mrb[117].mxu1  ;;  %v4203_v20 = vsel %vm4202_vm12, %v4198_v62, 0.0 }
 0x8b1   :  { %4204 = vadd.xlane.f32.xlu1 %v4203_v20  ;;  %v12719_v20 = vld [vmem:[#allocation16 + $0x10] sm:$0xf] }
 0x8b5   :  { %v9763_v37 = vpop.f32.mrb[118].mxu1 }
 0x8b6   :  { %v4280_v19 = vpop.f32.mrb[119].mxu1 }
 0x8b7   :  { %v10585_v33 = vpack.c.bf16 %v9763_v37, %v4280_v19 }
 0x8b9   :  { %v9766_v42 = vpop.f32.mrb[120].mxu1  ;;  %10586 = vmatpush3.bf16.msra.mxu0 %v10585_v33 }
 0x8ba   :  { %v4290_v38 = vpop.f32.mrb[121].mxu1  ;;  %10587 = vmatprep.subr.bf16.mxu0 %v11271_v5 }
 0x8bb   :  { %v10588_v32 = vpack.c.bf16 %v9766_v42, %v4290_v38 }
 0x8bd   :  { %v9769_v2 = vpop.f32.mrb[122].mxu1  ;;  %10589 = vmatpush3.bf16.msra.mxu0 %v10588_v32 }
 0x8be   :  { %v4300_v59 = vpop.f32.mrb[123].mxu1  ;;  %10590 = vmatprep.subr.bf16.mxu0 %v11271_v5 }
 0x8bf   :  { %v10591_v41 = vpack.c.bf16 %v9769_v2, %v4300_v59 }
 0x8c1   :  { %10592 = vmatpush3.bf16.msra.mxu0 %v10591_v41  ;;  %v9799_v15 = vpop.f32.mrb[124].mxu1 }
 0x8c2   :  { %v4464_v16 = vpop.f32.mrb[125].mxu1  ;;  %10597 = vmatprep.subr.bf16.mxu0 %v11271_v5 }
 0x8c3   :  { %v10598_v13 = vpack.c.bf16 %v9799_v15, %v4464_v16 }
 0x8c4   :  { %9783 = vmatmul.mubr.msk.f32.vlgmr.msra.gmra.mrb[128].mxu0 %vm376_vm0, %v4211_v57 }
 0x8c5   :  { %v9802_v28 = vpop.f32.mrb[126].mxu1  ;;  %10599 = vmatpush3.bf16.msra.mxu0 %v10598_v13  ;;  %9785 = vmatprep.mubr.msk.f32.mxu0 %vm11272_vm2, %v11273_v1 }
 0x8c6   :  { %v4474_v31 = vpop.f32.mrb[127].mxu1  ;;  %10600 = vmatprep.subr.bf16.mxu0 %v11271_v5 }
 0x8c7   :  { %v10601_v56 = vpack.c.bf16 %v9802_v28, %v4474_v31 }
 0x8c8   :  { %9786 = vmatmul.mubr.msk.f32.gmra.mrb[130].mxu0 %vm376_vm0, %v4212_v8 }
 0x8c9   :  { %v9805_v18 = vpop.f32.mrb[128].mxu1  ;;  %10602 = vmatpush3.bf16.msra.mxu0 %v10601_v56  ;;  %9788 = vmatprep.mubr.msk.f32.mxu0 %vm11272_vm2, %v11273_v1 }
 0x8ca   :  { %v4484_v39 = vpop.f32.mrb[129].mxu1  ;;  %10603 = vmatprep.subr.bf16.mxu0 %v11271_v5 }
 0x8cb   :  { %v10604_v63 = vpack.c.bf16 %v9805_v18, %v4484_v39 }
 0x8cc   :  { %9789 = vmatmul.mubr.msk.f32.gmra.mrb[132].mxu0 %vm376_vm0, %v4213_v36 }
 0x8cd   :  { %10605 = vmatpush3.bf16.msra.mxu0 %v10604_v63  ;;  %9818 = vmatprep.mubr.msk.f32.mxu0 %vm11272_vm2, %v11273_v1 }
 0x8ce   :  { %10610 = vmatprep.subr.bf16.mxu0 %v11271_v5 }
 0x8d0   :  { %9819 = vmatmul.mubr.msk.f32.vlgmr.msra.gmra.mrb[134].mxu0 %vm376_vm0, %v4211_v57 }
 0x8d1   :  { %9821 = vmatprep.mubr.msk.f32.mxu0 %vm11272_vm2, %v11273_v1 }
 0x8d4   :  { %9822 = vmatmul.mubr.msk.f32.gmra.mrb[136].mxu0 %vm376_vm0, %v4212_v8 }
 0x8d5   :  { %9824 = vmatprep.mubr.msk.f32.mxu0 %vm11272_vm2, %v11273_v1 }
 0x8d8   :  { %9825 = vmatmul.mubr.msk.f32.gmra.mrb[138].mxu0 %vm376_vm0, %v4213_v36  ;;  %vm5559_vm0 = vcmask 74752  }
 0x8d9   :  { %9846 = vmatprep.mubr.msk.f32.mxu0 %vm11272_vm2, %v11273_v1 }
 0x93e   :  { %v4205_v40 = vpop.xlane.xlu1 %4204 }
 0x93f   :  { %4207 = vst.msk [vmem:[%s13007_s25] sm:$0x3] %vm4206_vm13, %v4205_v40 }
 0x997   :  { %v12608_v21 = vpop.f32.mrb[128].mxu0 }
 0x998   :  { %v9784_v22 = vpop.f32.mrb[129].mxu0  ;;  %9832 = vmatmul.mubr.msk.f32.vlgmr.msra.gmra.mrb[130].mxu1 %vm4579_vm14, %v12608_v21  ;;  %v4939_v30 = vmul.f32 %v12608_v21, %v12608_v21 }
 0x999   :  { %9834 = vmatprep.mubr.msk.f32.mxu1 %vm11272_vm2, %v11273_v1  ;;  %10616 = vmatpush3.bf16.msk.msra.mxu1 %vm12246_vm5, %v12568_v0 }
 0x99a   :  { %10620 = vmatprep.subr.bf16.mxu1 %v11271_v5 }
 0x99b   :  { %v12618_v50 = vpop.f32.mrb[130].mxu0 }
 0x99c   :  { %v9787_v55 = vpop.f32.mrb[131].mxu0  ;;  %9835 = vmatmul.mubr.msk.f32.gmra.mrb[132].mxu1 %vm4579_vm14, %v12618_v50  ;;  %v4940_v34 = vmul.f32 %v12618_v50, %v12618_v50 }
 0x99d   :  { %9837 = vmatprep.mubr.msk.f32.mxu1 %vm11272_vm2, %v11273_v1 }
 0x99f   :  { %v12624_v29 = vpop.f32.mrb[132].mxu0 }
 0x9a0   :  { %v9790_v44 = vpop.f32.mrb[133].mxu0  ;;  %9838 = vmatmul.mubr.msk.f32.gmra.mrb[134].mxu1 %vm4579_vm14, %v12624_v29  ;;  %v4941_v45 = vmul.f32 %v12624_v29, %v12624_v29 }
 0x9a1   :  { %9859 = vmatprep.mubr.msk.f32.mxu1 %vm11272_vm2, %v11273_v1 }
 0x9a3   :  { %v12630_v46 = vpop.f32.mrb[134].mxu0 }
 0x9a4   :  { %v5289_v43 = vmul.f32 %v12630_v46, %v12608_v21  ;;  %v9820_v58 = vpop.f32.mrb[135].mxu0  ;;  %9860 = vmatmul.mubr.msk.f32.vlgmr.msra.gmra.mrb[136].mxu1 %vm4579_vm14, %v12630_v46  ;;  %v5114_v26 = vmul.f32 %v12630_v46, %v12630_v46 }
 0x9a5   :  { %9862 = vmatprep.mubr.msk.f32.mxu1 %vm11272_vm2, %v11273_v1  ;;  %10623 = vmatpush3.bf16.msk.msra.mxu1 %vm12246_vm5, %v12568_v0 }
 0x9a6   :  { %10627 = vmatprep.subr.bf16.mxu1 %v11271_v5 }
 0x9a7   :  { %v12642_v24 = vpop.f32.mrb[136].mxu0 }
 0x9a8   :  { %v5290_v4 = vmul.f32 %v12642_v24, %v12618_v50  ;;  %v9823_v6 = vpop.f32.mrb[137].mxu0  ;;  %9863 = vmatmul.mubr.msk.f32.gmra.mrb[138].mxu1 %vm4579_vm14, %v12642_v24  ;;  %v5115_v35 = vmul.f32 %v12642_v24, %v12642_v24 }
 0x9a9   :  { %9865 = vmatprep.mubr.msk.f32.mxu1 %vm11272_vm2, %v11273_v1 }
 0x9ab   :  { %v12650_v60 = vpop.f32.mrb[138].mxu0 }
 0x9ac   :  { %v5291_v9 = vmul.f32 %v12650_v60, %v12624_v29  ;;  %v9826_v48 = vpop.f32.mrb[139].mxu0  ;;  %9866 = vmatmul.mubr.msk.f32.gmra.mrb[140].mxu1 %vm4579_vm14, %v12650_v60  ;;  %v5116_v49 = vmul.f32 %v12650_v60, %v12650_v60 }
 0x9ad   :  { %9887 = vmatprep.mubr.msk.f32.mxu1 %vm11272_vm2, %v11273_v1 }
 0x9b0   :  { %9888 = vmatmul.mubr.msk.f32.vlgmr.msra.gmra.mrb[142].mxu1 %vm4579_vm14, %v4939_v30 }
 0x9b1   :  { %9890 = vmatprep.mubr.msk.f32.mxu1 %vm11272_vm2, %v11273_v1  ;;  %10630 = vmatpush3.bf16.msk.msra.mxu1 %vm12246_vm5, %v12568_v0 }
 0x9b2   :  { %10634 = vmatprep.subr.bf16.mxu1 %v11271_v5 }
 0x9b4   :  { %9891 = vmatmul.mubr.msk.f32.gmra.mrb[144].mxu1 %vm4579_vm14, %v4940_v34 }
 0x9b5   :  { %9893 = vmatprep.mubr.msk.f32.mxu1 %vm11272_vm2, %v11273_v1 }
 0x9b8   :  { %9894 = vmatmul.mubr.msk.f32.gmra.mrb[146].mxu1 %vm4579_vm14, %v4941_v45 }
 0x9b9   :  { %9915 = vmatprep.mubr.msk.f32.mxu1 %vm11272_vm2, %v11273_v1 }
 0x9bc   :  { %9916 = vmatmul.mubr.msk.f32.vlgmr.msra.gmra.mrb[148].mxu1 %vm4579_vm14, %v5114_v26 }
 0x9bd   :  { %9918 = vmatprep.mubr.msk.f32.mxu1 %vm11272_vm2, %v11273_v1  ;;  %10637 = vmatpush3.bf16.msk.msra.mxu1 %vm12246_vm5, %v12568_v0 }
 0x9be   :  { %10641 = vmatprep.subr.bf16.mxu1 %v11271_v5 }
 0x9c0   :  { %9919 = vmatmul.mubr.msk.f32.gmra.mrb[150].mxu1 %vm4579_vm14, %v5115_v35 }
 0x9c1   :  { %9921 = vmatprep.mubr.msk.f32.mxu1 %vm11272_vm2, %v11273_v1 }
 0x9c4   :  { %9922 = vmatmul.mubr.msk.f32.gmra.mrb[152].mxu1 %vm4579_vm14, %v5116_v49 }
 0x9c5   :  { %9943 = vmatprep.mubr.msk.f32.mxu1 %vm11272_vm2, %v11273_v1 }
 0x9c8   :  { %9944 = vmatmul.mubr.msk.f32.vlgmr.msra.gmra.mrb[154].mxu1 %vm4579_vm14, %v5289_v43 }
 0x9c9   :  { %9946 = vmatprep.mubr.msk.f32.mxu1 %vm11272_vm2, %v11273_v1 }
 0x9cc   :  { %9947 = vmatmul.mubr.msk.f32.gmra.mrb[156].mxu1 %vm4579_vm14, %v5290_v4 }
 0x9cd   :  { %9949 = vmatprep.mubr.msk.f32.mxu1 %vm11272_vm2, %v11273_v1 }
 0x9d0   :  { %9950 = vmatmul.mubr.msk.f32.gmra.mrb[158].mxu1 %vm4579_vm14, %v5291_v9 }
 0x9d1   :  { %9973 = vmatprep.mubr.msk.f32.mxu1 %vm11272_vm2, %v11273_v1 }
 0xa6b   :  { %v4658_v51 = vpop.f32.mrb[130].mxu1 }
 0xa6c   :  { %v9833_v27 = vpop.f32.mrb[131].mxu1 }
 0xa6f   :  { %v4663_v47 = vpop.f32.mrb[132].mxu1 }
 0xa70   :  { %v10611_v3 = vpack.c.bf16 %v4663_v47, %v4658_v51  ;;  %v9836_v54 = vpop.f32.mrb[133].mxu1 }
 0xa72   :  { %10612 = vmatpush3.bf16.msra.mxu0 %v10611_v3 }
 0xa73   :  { %v4668_v25 = vpop.f32.mrb[134].mxu1  ;;  %9844 = vmatprep.subr.mxu0 %v11273_v1 }
 0xa74   :  { %v9839_v7 = vpop.f32.mrb[135].mxu1 }
 0xa76   :  { %9845 = vmatpush3.msra.mxu0 %v4668_v25 }
 0xa77   :  { %9847 = vmatmul.mubr.msk.f32.vlgmr.msra.gmra.mrb[140].mxu0 %vm2976_vm10, %v12706_v53  ;;  %v4836_v10 = vpop.f32.mrb[136].mxu1  ;;  %10617 = vmatprep.subr.bf16.mxu0 %v11271_v5 }
 0xa78   :  { %v9861_v61 = vpop.f32.mrb[137].mxu1  ;;  %9849 = vmatprep.mubr.msk.f32.mxu0 %vm11272_vm2, %v11273_v1 }
 0xa7b   :  { %9850 = vmatmul.mubr.msk.f32.gmra.mrb[142].mxu0 %vm2976_vm10, %v12713_v52  ;;  %v4841_v11 = vpop.f32.mrb[138].mxu1 }
 0xa7c   :  { %v10618_v62 = vpack.c.bf16 %v4841_v11, %v4836_v10  ;;  %v9864_v17 = vpop.f32.mrb[139].mxu1  ;;  %9852 = vmatprep.mubr.msk.f32.mxu0 %vm11272_vm2, %v11273_v1 }
 0xa7e   :  { %10619 = vmatpush3.bf16.msra.mxu0 %v10618_v62 }
 0xa7f   :  { %9853 = vmatmul.mubr.msk.f32.gmra.mrb[144].mxu0 %vm2976_vm10, %v12719_v20  ;;  %v4846_v37 = vpop.f32.mrb[140].mxu1  ;;  %9872 = vmatprep.subr.mxu0 %v11273_v1 }
 0xa80   :  { %v9867_v19 = vpop.f32.mrb[141].mxu1  ;;  %9874 = vmatprep.mubr.msk.f32.mxu0 %vm11272_vm2, %v11273_v1 }
 0xa82   :  { %9873 = vmatpush3.msra.mxu0 %v4846_v37 }
 0xa83   :  { %9875 = vmatmul.mubr.msk.f32.vlgmr.msra.gmra.mrb[146].mxu0 %vm2976_vm10, %v12706_v53  ;;  %v5017_v33 = vpop.f32.mrb[142].mxu1  ;;  %10624 = vmatprep.subr.bf16.mxu0 %v11271_v5 }
 0xa84   :  { %v9889_v42 = vpop.f32.mrb[143].mxu1  ;;  %9877 = vmatprep.mubr.msk.f32.mxu0 %vm11272_vm2, %v11273_v1 }
 0xa87   :  { %9878 = vmatmul.mubr.msk.f32.gmra.mrb[148].mxu0 %vm2976_vm10, %v12713_v52  ;;  %v5022_v38 = vpop.f32.mrb[144].mxu1 }
 0xa88   :  { %v10625_v32 = vpack.c.bf16 %v5022_v38, %v5017_v33  ;;  %v9892_v2 = vpop.f32.mrb[145].mxu1  ;;  %9880 = vmatprep.mubr.msk.f32.mxu0 %vm11272_vm2, %v11273_v1 }
 0xa8a   :  { %10626 = vmatpush3.bf16.msra.mxu0 %v10625_v32 }
 0xa8b   :  { %9881 = vmatmul.mubr.msk.f32.gmra.mrb[150].mxu0 %vm2976_vm10, %v12719_v20  ;;  %v5027_v59 = vpop.f32.mrb[146].mxu1  ;;  %9900 = vmatprep.subr.mxu0 %v11273_v1 }
 0xa8c   :  { %v9895_v41 = vpop.f32.mrb[147].mxu1  ;;  %9902 = vmatprep.mubr.msk.f32.mxu0 %vm11272_vm2, %v11273_v1 }
 0xa8e   :  { %9901 = vmatpush3.msra.mxu0 %v5027_v59 }
 0xa8f   :  { %9903 = vmatmul.mubr.msk.f32.vlgmr.msra.gmra.mrb[152].mxu0 %vm2976_vm10, %v12706_v53  ;;  %v5192_v14 = vpop.f32.mrb[148].mxu1  ;;  %10631 = vmatprep.subr.bf16.mxu0 %v11271_v5 }
 0xa90   :  { %v9917_v12 = vpop.f32.mrb[149].mxu1  ;;  %9905 = vmatprep.mubr.msk.f32.mxu0 %vm11272_vm2, %v11273_v1 }
 0xa93   :  { %9906 = vmatmul.mubr.msk.f32.gmra.mrb[154].mxu0 %vm2976_vm10, %v12713_v52  ;;  %v5197_v0 = vpop.f32.mrb[150].mxu1 }
 0xa94   :  { %v10632_v15 = vpack.c.bf16 %v5197_v0, %v5192_v14  ;;  %v9920_v57 = vpop.f32.mrb[151].mxu1  ;;  %9908 = vmatprep.mubr.msk.f32.mxu0 %vm11272_vm2, %v11273_v1 }
 0xa96   :  { %10633 = vmatpush3.bf16.msra.mxu0 %v10632_v15 }
 0xa97   :  { %9909 = vmatmul.mubr.msk.f32.gmra.mrb[156].mxu0 %vm2976_vm10, %v12719_v20  ;;  %v5202_v16 = vpop.f32.mrb[152].mxu1  ;;  %9928 = vmatprep.subr.mxu0 %v11273_v1 }
 0xa98   :  { %v9923_v13 = vpop.f32.mrb[153].mxu1  ;;  %9930 = vmatprep.mubr.msk.f32.mxu0 %vm11272_vm2, %v11273_v1 }
 0xa9a   :  { %9929 = vmatpush3.msra.mxu0 %v5202_v16 }
 0xa9b   :  { %9931 = vmatmul.mubr.msk.f32.vlgmr.msra.gmra.mrb[158].mxu0 %vm2976_vm10, %v12706_v53  ;;  %v5367_v28 = vpop.f32.mrb[154].mxu1  ;;  %10638 = vmatprep.subr.bf16.mxu0 %v11271_v5 }
 0xa9c   :  { %v9945_v8 = vpop.f32.mrb[155].mxu1  ;;  %9933 = vmatprep.mubr.msk.f32.mxu0 %vm11272_vm2, %v11273_v1 }
 0xa9f   :  { %9934 = vmatmul.mubr.msk.f32.gmra.mrb[160].mxu0 %vm2976_vm10, %v12713_v52  ;;  %v5372_v31 = vpop.f32.mrb[156].mxu1 }
 0xaa0   :  { %v10639_v56 = vpack.c.bf16 %v5372_v31, %v5367_v28  ;;  %v9948_v18 = vpop.f32.mrb[157].mxu1  ;;  %9936 = vmatprep.mubr.msk.f32.mxu0 %vm11272_vm2, %v11273_v1 }
 0xaa2   :  { %10640 = vmatpush3.bf16.msra.mxu0 %v10639_v56 }
 0xaa3   :  { %9937 = vmatmul.mubr.msk.f32.gmra.mrb[162].mxu0 %vm2976_vm10, %v12719_v20  ;;  %v5377_v36 = vpop.f32.mrb[158].mxu1  ;;  %9956 = vmatprep.subr.mxu0 %v11273_v1 }
 0xaa4   :  { %v9951_v39 = vpop.f32.mrb[159].mxu1  ;;  %9958 = vmatprep.mubr.msk.f32.mxu0 %vm11272_vm2, %v11273_v1 }
 0xaa6   :  { %9957 = vmatpush3.msra.mxu0 %v5377_v36 }
 0xaa7   :  { %9959 = vmatmul.mubr.msk.f32.vlgmr.msra.gmra.mrb[164].mxu0 %vm2976_vm10, %v12706_v53 }
 0xaa8   :  { %9961 = vmatprep.mubr.msk.f32.mxu0 %vm11272_vm2, %v11273_v1 }
 0xaab   :  { %9962 = vmatmul.mubr.msk.f32.gmra.mrb[166].mxu0 %vm2976_vm10, %v12713_v52 }
 0xaac   :  { %9964 = vmatprep.mubr.msk.f32.mxu0 %vm11272_vm2, %v11273_v1 }
 0xaaf   :  { %9965 = vmatmul.mubr.msk.f32.gmra.mrb[168].mxu0 %vm2976_vm10, %v12719_v20 }
 0xb4a   :  { %v4747_v63 = vpop.f32.mrb[140].mxu0 }
 0xb4b   :  { %v9848_v40 = vpop.f32.mrb[141].mxu0  ;;  %v4930_v35 = vmul.f32 %v4747_v63, %v4747_v63 }
 0xb4e   :  { %v4752_v22 = vpop.f32.mrb[142].mxu0 }
 0xb4f   :  { %v9851_v55 = vpop.f32.mrb[143].mxu0  ;;  %v4931_v47 = vmul.f32 %v4752_v22, %v4752_v22 }
 0xb52   :  { %v4757_v44 = vpop.f32.mrb[144].mxu0 }
 0xb53   :  { %v9854_v43 = vpop.f32.mrb[145].mxu0  ;;  %v4932_v7 = vmul.f32 %v4757_v44, %v4757_v44 }
 0xb56   :  { %v4916_v58 = vpop.f32.mrb[146].mxu0 }
 0xb57   :  { %v4936_v4 = vmul.f32 %v4916_v58, %v4747_v63  ;;  %v9876_v6 = vpop.f32.mrb[147].mxu0  ;;  %v4933_v52 = vmul.f32 %v4916_v58, %v4916_v58 }
 0xb5a   :  { %v4921_v9 = vpop.f32.mrb[148].mxu0 }
 0xb5b   :  { %v4937_v48 = vmul.f32 %v4921_v9, %v4752_v22  ;;  %v9879_v30 = vpop.f32.mrb[149].mxu0  ;;  %v4934_v20 = vmul.f32 %v4921_v9, %v4921_v9 }
 0xb5e   :  { %v4926_v34 = vpop.f32.mrb[150].mxu0 }
 0xb5f   :  { %v4938_v45 = vmul.f32 %v4926_v34, %v4757_v44  ;;  %v9882_v26 = vpop.f32.mrb[151].mxu0  ;;  %v4935_v32 = vmul.f32 %v4926_v34, %v4926_v34  ;;  %v5565_v34 = vld [vmem:[#allocation31] sm:$0xff] }
 0xb60   :  { %v5566_v26 = vld [vmem:[#allocation31 + $0x8] sm:$0xf] }
 0xb62   :  { %v5097_v49 = vpop.f32.mrb[152].mxu0 }
 0xb63   :  { %v5111_v51 = vsub.f32 %v5097_v49, %v4930_v35  ;;  %v9904_v27 = vpop.f32.mrb[153].mxu0  ;;  %v10645_v49 = vpack.c.bf16 %v5566_v26, %v5565_v34 }
 0xb66   :  { %v5102_v3 = vpop.f32.mrb[154].mxu0 }
 0xb67   :  { %v5112_v54 = vsub.f32 %v5102_v3, %v4931_v47  ;;  %v9907_v25 = vpop.f32.mrb[155].mxu0 }
 0xb6a   :  { %v5107_v53 = vpop.f32.mrb[156].mxu0 }
 0xb6b   :  { %v5113_v10 = vsub.f32 %v5107_v53, %v4932_v7  ;;  %v9910_v61 = vpop.f32.mrb[157].mxu0  ;;  %v5568_v53 = vld [vmem:[%s13044_s10 + $0x8] sm:$0xf] }
 0xb6e   :  { %v5272_v11 = vpop.f32.mrb[158].mxu0 }
 0xb6f   :  { %v5286_v62 = vsub.f32 %v5272_v11, %v4933_v52  ;;  %v9932_v17 = vpop.f32.mrb[159].mxu0 }
 0xb71   :  { %v5470_v37 = vadd.f32 %v5286_v62, %v5111_v51 }
 0xb72   :  { %v5277_v19 = vpop.f32.mrb[160].mxu0 }
 0xb73   :  { %v5473_v33 = vadd.f32 0.0009, %v5470_v37  ;;  %v5287_v42 = vsub.f32 %v5277_v19, %v4934_v20  ;;  %v9935_v38 = vpop.f32.mrb[161].mxu0  ;;  %v5888_v37 = vld [vmem:[#allocation19] sm:$0x3f] }
 0xb75   :  { %10751 = vrcp.f32 %v5473_v33  ;;  %v5471_v2 = vadd.f32 %v5287_v42, %v5112_v54 }
 0xb76   :  { %v5282_v59 = vpop.f32.mrb[162].mxu0 }
 0xb77   :  { %v5474_v41 = vadd.f32 0.0009, %v5471_v2  ;;  %v5288_v14 = vsub.f32 %v5282_v59, %v4935_v32  ;;  %v9938_v12 = vpop.f32.mrb[163].mxu0 }
 0xb79   :  { %10753 = vrcp.f32 %v5474_v41  ;;  %v5472_v0 = vadd.f32 %v5288_v14, %v5113_v10 }
 0xb7a   :  { %v5447_v15 = vpop.f32.mrb[164].mxu0 }
 0xb7b   :  { %v5475_v57 = vadd.f32 0.0009, %v5472_v0  ;;  %v5461_v16 = vsub.f32 %v5447_v15, %v4936_v4  ;;  %v9960_v13 = vpop.f32.mrb[165].mxu0  ;;  %v5889_v15 = vld [vmem:[#allocation21] sm:$0xff] }
 0xb7d   :  { %10755 = vrcp.f32 %v5475_v57  ;;  %v5464_v28 = vmul.f32 2.0, %v5461_v16 }
 0xb7e   :  { %v5452_v8 = vpop.f32.mrb[166].mxu0 }
 0xb7f   :  { %v10752_v31 = vpop.eup %10751  ;;  %v5467_v56 = vadd.f32 0.0009, %v5464_v28  ;;  %v5462_v18 = vsub.f32 %v5452_v8, %v4937_v48  ;;  %v9963_v36 = vpop.f32.mrb[167].mxu0  ;;  %v4578_v48 = vld [vmem:[#allocation18] sm:$0x3] }
 0xb81   :  { %v5477_v39 = vmul.f32 %v10752_v31, %v5467_v56  ;;  %v5465_v63 = vmul.f32 2.0, %v5462_v18 }
 0xb82   :  { %v5457_v40 = vpop.f32.mrb[168].mxu0 }
 0xb83   :  { %v10754_v22 = vpop.eup %10753  ;;  %v5468_v55 = vadd.f32 0.0009, %v5465_v63  ;;  %v5463_v44 = vsub.f32 %v5457_v40, %v4938_v45  ;;  %v9966_v43 = vpop.f32.mrb[169].mxu0  ;;  %v5567_v45 = vld [vmem:[%s13044_s10] sm:$0xff] }
 0xb84   :  { %9995 = vmatprep.mubr.msk.f32.mxu0 %vm2976_vm10, %v5567_v45 }
 0xb85   :  { %v5479_v58 = vmul.f32 %v10754_v22, %v5468_v55  ;;  %v5466_v6 = vmul.f32 2.0, %v5463_v44  ;;  %v6767_v22 = vld [vmem:[%s13045_s26] sm:$0x3f] }
 0xb87   :  { %v10756_v9 = vpop.eup %10755  ;;  %v10642_v30 = vpack.c.bf16 %v5479_v58, %v5477_v39  ;;  %v5469_v4 = vadd.f32 0.0009, %v5466_v6 }
 0xb89   :  { %v5481_v35 = vmul.f32 %v10756_v9, %v5469_v4  ;;  %10643 = vmatpush3.bf16.msra.mxu1 %v10642_v30 }
 0xb8a   :  { %9971 = vmatprep.subr.mxu1 %v11273_v1 }
 0xb8d   :  { %9972 = vmatpush3.msk.msra.mxu1 %vm2338_vm3, %v5481_v35  ;;  %vm5898_vm3 = vcmask 1045504  }
 0xb8e   :  { %9974 = vmatmul.mubr.msk.f32.vlgmr.msra.gmra.mrb[160].mxu1 %vm5482_vm15, %v4578_v48  ;;  %10644 = vmatprep.subr.bf16.mxu1 %v11271_v5 }
 0xb8f   :  { %10647 = vmatpush3.bf16.msk.msra.mxu1 %vm12246_vm5, %v10645_v49  ;;  %9980 = vmatprep.mubr.msk.f32.mxu1 %vm11272_vm2, %v11273_v1 }
 0xb92   :  { %9981 = vmatmul.mubr.msk.f32.vlgmr.msra.gmra.mrb[162].mxu1 %vm4579_vm14, %v12608_v21 }
 0xb93   :  { %9983 = vmatprep.mubr.msk.f32.mxu1 %vm11272_vm2, %v11273_v1 }
 0xb96   :  { %9984 = vmatmul.mubr.msk.f32.gmra.mrb[164].mxu1 %vm4579_vm14, %v12618_v50 }
 0xb97   :  { %9986 = vmatprep.mubr.msk.f32.mxu1 %vm11272_vm2, %v11273_v1 }
 0xb9a   :  { %9987 = vmatmul.mubr.msk.f32.gmra.mrb[166].mxu1 %vm4579_vm14, %v12624_v29 }
 0xb9b   :  { %10017 = vmatprep.mubr.msk.f32.mxu1 %vm2976_vm10, %v5567_v45 }
 0xc61   :  { %v5555_v21 = vpop.f32.mrb[160].mxu1 }
 0xc62   :  { %v9975_v51 = vpop.f32.mrb[161].mxu1  ;;  %v5560_v27 = vsel %vm5559_vm0, %v5555_v21, 0.0 }
 0xc63   :  { %5561 = vadd.xlane.f32.xlu1 %v5560_v27 }
 0xc65   :  { %v5638_v50 = vpop.f32.mrb[162].mxu1 }
 0xc66   :  { %v9982_v47 = vpop.f32.mrb[163].mxu1 }
 0xc69   :  { %v5643_v3 = vpop.f32.mrb[164].mxu1 }
 0xc6a   :  { %v10648_v54 = vpack.c.bf16 %v5643_v3, %v5638_v50  ;;  %v9985_v25 = vpop.f32.mrb[165].mxu1 }
 0xc6c   :  { %10649 = vmatprep.subr.bf16.mxu0 %v10648_v54 }
 0xc6d   :  { %v5648_v29 = vpop.f32.mrb[166].mxu1  ;;  %10651 = vmatpush3.bf16.msra.mxu0 %v10648_v54 }
 0xc6e   :  { %v9988_v7 = vpop.f32.mrb[167].mxu1  ;;  %9993 = vmatprep.subr.mxu0 %v5648_v29 }
 0xc71   :  { %9994 = vmatpush3.msra.mxu0 %v5648_v29 }
 0xc72   :  { %9996 = vmatmul.mubr.msk.f32.vlgmr.msra.gmra.mrb[170].mxu0 %vm2976_vm10, %v5568_v53  ;;  %10652 = vmatprep.subr.bf16.mxu0 %v11271_v5 }
 0xc73   :  { %10655 = vmatpush3.bf16.msk.msra.mxu0 %vm12246_vm5, %v10645_v49  ;;  %10002 = vmatprep.mubr.msk.f32.mxu0 %vm11272_vm2, %v11273_v1 }
 0xc74   :  { %10660 = vmatprep.subr.bf16.mxu0 %v11271_v5 }
 0xc76   :  { %10003 = vmatmul.mubr.msk.f32.vlgmr.msra.gmra.mrb[172].mxu0 %vm4579_vm14, %v12630_v46 }
 0xc77   :  { %10005 = vmatprep.mubr.msk.f32.mxu0 %vm11272_vm2, %v11273_v1 }
 0xc7a   :  { %10006 = vmatmul.mubr.msk.f32.gmra.mrb[174].mxu0 %vm4579_vm14, %v12642_v24 }
 0xc7b   :  { %10008 = vmatprep.mubr.msk.f32.mxu0 %vm11272_vm2, %v11273_v1 }
 0xc7e   :  { %10009 = vmatmul.mubr.msk.f32.gmra.mrb[176].mxu0 %vm4579_vm14, %v12650_v60 }
 0xc7f   :  { %10029 = vmatprep.mubr.msk.f32.mxu0 %vm11272_vm2, %v11273_v1 }
 0xcf0   :  { %v5562_v10 = vpop.xlane.xlu1 %5561 }
 0xcf1   :  { %5564 = vst.msk [vmem:[%s13007_s25] sm:$0x3] %vm5563_vm1, %v5562_v10 }
 0xd45   :  { %v12825_v46 = vpop.f32.mrb[170].mxu0 }
 0xd46   :  { %v12827_v61 = vpop.f32.mrb[171].mxu0  ;;  %v6211_v59 = vmul.f32 %v12825_v46, %v12825_v46 }
 0xd47   :  { %v6210_v38 = vmul.f32 %v12827_v61, %v12827_v61 }
 0xd49   :  { %v5799_v24 = vpop.f32.mrb[172].mxu0 }
 0xd4a   :  { %v10004_v52 = vpop.f32.mrb[173].mxu0 }
 0xd4b   :  { %v6768_v52 = vld [vmem:[%s13046_s30] sm:$0x3f] }
 0xd4d   :  { %v5804_v11 = vpop.f32.mrb[174].mxu0 }
 0xd4e   :  { %v10656_v62 = vpack.c.bf16 %v5804_v11, %v5799_v24  ;;  %v10007_v17 = vpop.f32.mrb[175].mxu0  ;;  %v5890_v24 = vld [vmem:[#allocation22] sm:$0x3]  ;;  %v7071_v11 = vld [vmem:[#allocation24] sm:$0x7] }
 0xd50   :  { %10657 = vmatprep.subr.bf16.mxu1 %v10656_v62 }
 0xd51   :  { %v5809_v60 = vpop.f32.mrb[176].mxu0  ;;  %10659 = vmatpush3.bf16.msra.mxu1 %v10656_v62 }
 0xd52   :  { %v10010_v20 = vpop.f32.mrb[177].mxu0  ;;  %10015 = vmatprep.subr.mxu1 %v5809_v60 }
 0xd55   :  { %10016 = vmatpush3.msra.mxu1 %v5809_v60 }
 0xd56   :  { %10018 = vmatmul.mubr.msk.f32.vlgmr.msra.gmra.mrb[168].mxu1 %vm2976_vm10, %v5568_v53  ;;  %10020 = vmatprep.subr.msk.mxu1 %vm5898_vm3, %v5888_v37  ;;  %vm7834_vm10 = vcmask 15360  }
 0xd57   :  { %10022 = vmatprep.mubr.msk.f32.mxu1 %vm5891_vm4, %v12827_v61  ;;  %10021 = vmatpush3.msk.msra.mxu1 %vm5898_vm3, %v5888_v37 }
 0xd58   :  { %10032 = vmatprep.subr.msk.mxu1 %vm5898_vm3, %v5888_v37 }
 0xd5a   :  { %10023 = vmatmul.mubr.msk.f32.vlgmr.msra.gmra.mrb[170].mxu1 %vm5891_vm4, %v12825_v46 }
 0xd5b   :  { %10033 = vmatpush3.msk.msra.mxu1 %vm5898_vm3, %v5888_v37 }
 0xd5c   :  { %10044 = vmatprep.subr.msk.mxu1 %vm5898_vm3, %v5888_v37 }
 0xe29   :  { %v12839_v19 = vpop.f32.mrb[168].mxu1 }
 0xe2a   :  { %v6525_v33 = vmul.f32 %v12839_v19, %v12825_v46  ;;  %v5879_v42 = vpop.f32.mrb[169].mxu1  ;;  %v6368_v0 = vmul.f32 %v12839_v19, %v12839_v19 }
 0xe2b   :  { %v6524_v32 = vmul.f32 %v5879_v42, %v12827_v61  ;;  %10034 = vmatprep.mubr.msk.f32.mxu1 %vm5891_vm4, %v5879_v42  ;;  %v6367_v14 = vmul.f32 %v5879_v42, %v5879_v42 }
 0xe2c   :  { %10035 = vmatmul.mubr.msk.f32.vlgmr.msra.gmra.mrb[172].mxu1 %vm5891_vm4, %v12839_v19 }
 0xe2d   :  { %v10024_v2 = vpop.f32.mrb[170].mxu1  ;;  %10046 = vmatprep.mubr.msk.f32.mxu1 %vm5891_vm4, %v6210_v38  ;;  %10045 = vmatpush3.msk.msra.mxu1 %vm5898_vm3, %v5888_v37 }
 0xe2e   :  { %v5968_v41 = vpop.f32.mrb[171].mxu1  ;;  %10056 = vmatprep.subr.msk.mxu1 %vm5898_vm3, %v5888_v37 }
 0xe2f   :  { %v10661_v12 = vpack.c.bf16 %v10024_v2, %v5968_v41 }
 0xe30   :  { %10047 = vmatmul.mubr.msk.f32.vlgmr.msra.gmra.mrb[174].mxu1 %vm5891_vm4, %v6211_v59 }
 0xe31   :  { %10663 = vmatpush3.bf16.msk.msra.mxu0 %vm12246_vm5, %v10661_v12  ;;  %10058 = vmatprep.mubr.msk.f32.mxu1 %vm5891_vm4, %v6367_v14 }
 0xe32   :  { %10057 = vmatpush3.msk.msra.mxu1 %vm5898_vm3, %v5888_v37  ;;  %10664 = vmatprep.subr.bf16.mxu0 %v11271_v5 }
 0xe33   :  { %10068 = vmatprep.subr.msk.mxu1 %vm5898_vm3, %v5888_v37 }
 0xe34   :  { %10059 = vmatmul.mubr.msk.f32.vlgmr.msra.gmra.mrb[176].mxu1 %vm5891_vm4, %v6368_v0  ;;  %10030 = vmatmul.mubr.msk.f32.vlgmr.msra.gmra.mrb[178].mxu0 %vm4579_vm14, %v5889_v15 }
 0xe35   :  { %10070 = vmatprep.mubr.msk.f32.mxu1 %vm5891_vm4, %v6524_v32  ;;  %10069 = vmatpush3.msk.msra.mxu1 %vm5898_vm3, %v5888_v37  ;;  %v7072_v32 = vld [vmem:[#allocation25] sm:$0x3] }
 0xe36   :  { %10080 = vmatprep.subr.mxu1 %v11273_v1  ;;  %10041 = vmatprep.mubr.msk.f32.mxu0 %vm11272_vm2, %v11273_v1 }
 0xe38   :  { %10071 = vmatmul.mubr.msk.f32.vlgmr.msra.gmra.mrb[178].mxu1 %vm5891_vm4, %v6525_v33 }
 0xe39   :  { %10082 = vmatprep.mubr.msk.f32.mxu1 %vm11272_vm2, %v11273_v1 }
 0xeff   :  { %v10036_v57 = vpop.f32.mrb[172].mxu1 }
 0xf00   :  { %v6125_v16 = vpop.f32.mrb[173].mxu1 }
 0xf01   :  { %v10665_v13 = vpack.c.bf16 %v10036_v57, %v6125_v16 }
 0xf03   :  { %10667 = vmatpush3.bf16.msk.msra.mxu0 %vm12246_vm5, %v10665_v13  ;;  %v10048_v28 = vpop.f32.mrb[174].mxu1 }
 0xf04   :  { %v6284_v8 = vpop.f32.mrb[175].mxu1  ;;  %10668 = vmatprep.subr.bf16.mxu0 %v11271_v5 }
 0xf05   :  { %v10669_v31 = vpack.c.bf16 %v10048_v28, %v6284_v8 }
 0xf06   :  { %10042 = vmatmul.mubr.msk.f32.vlgmr.msra.gmra.mrb[180].mxu0 %vm4579_vm14, %v5889_v15 }
 0xf07   :  { %10671 = vmatpush3.bf16.msk.msra.mxu0 %vm12246_vm5, %v10669_v31  ;;  %v10060_v56 = vpop.f32.mrb[176].mxu1  ;;  %10053 = vmatprep.mubr.msk.f32.mxu0 %vm11272_vm2, %v11273_v1  ;;  %v6049_v55 = vpop.f32.mrb[178].mxu0 }
 0xf08   :  { %v6441_v18 = vpop.f32.mrb[177].mxu1  ;;  %10672 = vmatprep.subr.bf16.mxu0 %v11271_v5  ;;  %v10031_v44 = vpop.f32.mrb[179].mxu0  ;;  %v6207_v9 = vmul.f32 %v6049_v55, %v6049_v55 }
 0xf09   :  { %v10673_v36 = vpack.c.bf16 %v10060_v56, %v6441_v18 }
 0xf0a   :  { %10054 = vmatmul.mubr.msk.f32.vlgmr.msra.gmra.mrb[182].mxu0 %vm4579_vm14, %v5889_v15 }
 0xf0b   :  { %10675 = vmatpush3.bf16.msk.msra.mxu0 %vm12246_vm5, %v10673_v36  ;;  %v10072_v39 = vpop.f32.mrb[178].mxu1  ;;  %10065 = vmatprep.mubr.msk.f32.mxu0 %vm11272_vm2, %v11273_v1 }
 0xf0c   :  { %v6598_v63 = vpop.f32.mrb[179].mxu1  ;;  %10676 = vmatprep.subr.bf16.mxu0 %v11271_v5 }
 0xf0d   :  { %v10677_v40 = vpack.c.bf16 %v10072_v39, %v6598_v63 }
 0xf0e   :  { %10066 = vmatmul.mubr.msk.f32.vlgmr.msra.gmra.mrb[184].mxu0 %vm4579_vm14, %v5889_v15 }
 0xf0f   :  { %10679 = vmatpush3.bf16.msk.msra.mxu0 %vm12246_vm5, %v10677_v40  ;;  %10077 = vmatprep.mubr.msk.f32.mxu0 %vm11272_vm2, %v11273_v1 }
 0xf10   :  { %10085 = vmatprep.subr.msk.mxu0 %vm5898_vm3, %v6767_v22 }
 0xf12   :  { %10078 = vmatmul.mubr.msk.f32.vlgmr.msra.gmra.mrb[186].mxu0 %vm4579_vm14, %v5889_v15 }
 0xf13   :  { %10087 = vmatprep.mubr.msk.f32.mxu0 %vm5891_vm4, %v12827_v61  ;;  %10086 = vmatpush3.msk.msra.mxu0 %vm5898_vm3, %v6767_v22 }
 0xf14   :  { %10097 = vmatprep.subr.msk.mxu0 %vm5898_vm3, %v6767_v22 }
 0xf16   :  { %10088 = vmatmul.mubr.msk.f32.vlgmr.msra.gmra.mrb[188].mxu0 %vm5891_vm4, %v12825_v46 }
 0xf17   :  { %10099 = vmatprep.mubr.msk.f32.mxu0 %vm5891_vm4, %v5879_v42  ;;  %10098 = vmatpush3.msk.msra.mxu0 %vm5898_vm3, %v6767_v22 }
 0xf18   :  { %10109 = vmatprep.subr.mxu0 %v11273_v1 }
 0xf1a   :  { %10100 = vmatmul.mubr.msk.f32.vlgmr.msra.gmra.mrb[190].mxu0 %vm5891_vm4, %v12839_v19 }
 0xf1b   :  { %10111 = vmatprep.mubr.msk.f32.mxu0 %vm11272_vm2, %v11273_v1  ;;  %10110 = vmatpush3.msk.msra.mxu0 %vm7078_vm7, %v7071_v11 }
 0xf1c   :  { %10119 = vmatprep.subr.mxu0 %v11273_v1 }
 0xfd9   :  { %v6203_v43 = vpop.f32.mrb[180].mxu0 }
 0xfda   :  { %v6209_v58 = vmul.f32 %v6203_v43, %v6049_v55  ;;  %v10043_v6 = vpop.f32.mrb[181].mxu0  ;;  %v6208_v26 = vmul.f32 %v6203_v43, %v6203_v43 }
 0xfdd   :  { %v6362_v30 = vpop.f32.mrb[182].mxu0 }
 0xfde   :  { %v6366_v4 = vsub.f32 %v6362_v30, %v6207_v9  ;;  %v10055_v34 = vpop.f32.mrb[183].mxu0 }
 0xfe1   :  { %v6519_v35 = vpop.f32.mrb[184].mxu0 }
 0xfe2   :  { %v6523_v48 = vsub.f32 %v6519_v35, %v6208_v26  ;;  %v10067_v49 = vpop.f32.mrb[185].mxu0 }
 0xfe4   :  { %v6683_v45 = vadd.f32 %v6523_v48, %v6366_v4 }
 0xfe5   :  { %v6676_v21 = vpop.f32.mrb[186].mxu0 }
 0xfe6   :  { %v6684_v51 = vadd.f32 0.0009, %v6683_v45  ;;  %v6680_v27 = vsub.f32 %v6676_v21, %v6209_v58  ;;  %v10079_v50 = vpop.f32.mrb[187].mxu0 }
 0xfe8   :  { %10757 = vrcp.f32 %v6684_v51  ;;  %v6681_v25 = vmul.f32 2.0, %v6680_v27 }
 0xfe9   :  { %v10089_v47 = vpop.f32.mrb[188].mxu0 }
 0xfea   :  { %v6838_v3 = vpop.f32.mrb[189].mxu0  ;;  %v6682_v10 = vadd.f32 0.0009, %v6681_v25 }
 0xfeb   :  { %v10681_v54 = vpack.c.bf16 %v10089_v47, %v6838_v3  ;;  %v7073_v47 = vld [vmem:[#allocation27] sm:$0x3] }
 0xfed   :  { %v10101_v29 = vpop.f32.mrb[190].mxu0 }
 0xfee   :  { %v6989_v7 = vpop.f32.mrb[191].mxu0 }
 0xfef   :  { %v10685_v53 = vpack.c.bf16 %v10101_v29, %v6989_v7 }
 0xff2   :  { %v10758_v46 = vpop.eup %10757 }
 0xff3   :  { %v6686_v61 = vmul.f32 %v10758_v46, %v6682_v10 }
 0xff5   :  { %10081 = vmatpush3.msra.mxu1 %v6686_v61 }
 0xff6   :  { %10083 = vmatmul.mubr.msk.f32.vlgmr.msra.gmra.mrb[180].mxu1 %vm6687_vm6, %v5890_v24  ;;  %10680 = vmatprep.subr.bf16.mxu1 %v11271_v5 }
 0xff7   :  { %10683 = vmatpush3.bf16.msk.msra.mxu1 %vm12246_vm5, %v10681_v54  ;;  %10094 = vmatprep.mubr.msk.f32.mxu1 %vm11272_vm2, %v11273_v1 }
 0xff8   :  { %10684 = vmatprep.subr.bf16.mxu1 %v11271_v5 }
 0xffa   :  { %10095 = vmatmul.mubr.msk.f32.vlgmr.msra.gmra.mrb[182].mxu1 %vm4579_vm14, %v6768_v52 }
 0xffb   :  { %10687 = vmatpush3.bf16.msk.msra.mxu1 %vm12246_vm5, %v10685_v53  ;;  %10106 = vmatprep.mubr.msk.f32.mxu1 %vm11272_vm2, %v11273_v1  ;;  %vm7074_vm5 = vcmask 23552  }
 0xffc   :  { %10114 = vmatprep.subr.mxu1 %v11273_v1 }
 0xffe   :  { %10107 = vmatmul.mubr.msk.f32.vlgmr.msra.gmra.mrb[184].mxu1 %vm4579_vm14, %v6768_v52 }
 0xfff   :  { %10116 = vmatprep.mubr.msk.f32.mxu1 %vm11272_vm2, %v11273_v1 }
0x10c9   :  { %v6757_v5 = vpop.f32.mrb[180].mxu1 }
0x10ca   :  { %v10084_v23 = vpop.f32.mrb[181].mxu1  ;;  %v6762_v62 = vsel %vm6761_vm8, %v6757_v5, 0.0 }
0x10cb   :  { %6763 = vadd.xlane.f32.xlu0 %v6762_v62 }
0x10cd   :  { %v6919_v17 = vpop.f32.mrb[182].mxu1 }
0x10ce   :  { %10112 = vmatmul.mubr.msk.f32.vlgmr.msra.gmra.mrb[192].mxu0 %vm7074_vm5, %v6919_v17  ;;  %v10096_v60 = vpop.f32.mrb[183].mxu1  ;;  %v7377_v33 = vmul.f32 %v6919_v17, %v6919_v17 }
0x10cf   :  { %10120 = vmatpush3.msk.msra.mxu0 %vm7078_vm7, %v7071_v11  ;;  %10121 = vmatprep.mubr.msk.f32.mxu0 %vm11272_vm2, %v11273_v1 }
0x10d0   :  { %10129 = vmatprep.subr.mxu0 %v11273_v1 }
0x10d1   :  { %v7067_v20 = vpop.f32.mrb[184].mxu1 }
0x10d2   :  { %v7673_v37 = vmul.f32 %v7067_v20, %v6919_v17  ;;  %10122 = vmatmul.mubr.msk.f32.vlgmr.msra.gmra.mrb[194].mxu0 %vm7074_vm5, %v7067_v20  ;;  %v10108_v19 = vpop.f32.mrb[185].mxu1  ;;  %v7525_v42 = vmul.f32 %v7067_v20, %v7067_v20 }
0x10d3   :  { %10130 = vmatpush3.msk.msra.mxu0 %vm7078_vm7, %v7071_v11  ;;  %10131 = vmatprep.mubr.msk.f32.mxu0 %vm11272_vm2, %v11273_v1 }
0x10d4   :  { %10139 = vmatprep.subr.mxu0 %v11273_v1 }
0x10d6   :  { %10132 = vmatmul.mubr.msk.f32.vlgmr.msra.gmra.mrb[196].mxu0 %vm7074_vm5, %v7377_v33 }
0x10d7   :  { %10140 = vmatpush3.msk.msra.mxu0 %vm7078_vm7, %v7071_v11  ;;  %10141 = vmatprep.mubr.msk.f32.mxu0 %vm11272_vm2, %v11273_v1 }
0x10d8   :  { %10149 = vmatprep.subr.mxu0 %v11273_v1 }
0x10da   :  { %10142 = vmatmul.mubr.msk.f32.vlgmr.msra.gmra.mrb[198].mxu0 %vm7074_vm5, %v7525_v42 }
0x10db   :  { %10150 = vmatpush3.msk.msra.mxu0 %vm7078_vm7, %v7071_v11  ;;  %10151 = vmatprep.mubr.msk.f32.mxu0 %vm11272_vm2, %v11273_v1 }
0x10dc   :  { %10159 = vmatprep.subr.mxu0 %v11273_v1 }
0x10de   :  { %10152 = vmatmul.mubr.msk.f32.vlgmr.msra.gmra.mrb[200].mxu0 %vm7074_vm5, %v7673_v37 }
0x10df   :  { %10161 = vmatprep.mubr.msk.f32.mxu0 %vm11272_vm2, %v11273_v1 }
0x1158   :  { %v6764_v38 = vpop.xlane.xlu0 %6763 }
0x1159   :  { %6766 = vst.msk [vmem:[%s13007_s25] sm:$0x3] %vm6765_vm9, %v6764_v38 }
0x11a1   :  { %v7148_v2 = vpop.f32.mrb[192].mxu0 }
0x11a2   :  { %10115 = vmatpush3.msk.msra.mxu1 %vm5898_vm3, %v7148_v2  ;;  %v10113_v59 = vpop.f32.mrb[193].mxu0 }
0x11a3   :  { %10117 = vmatmul.mubr.msk.f32.vlgmr.msra.gmra.mrb[186].mxu1 %vm5891_vm4, %v7072_v32  ;;  %10124 = vmatprep.subr.mxu1 %v11273_v1 }
0x11a4   :  { %10126 = vmatprep.mubr.msk.f32.mxu1 %vm11272_vm2, %v11273_v1 }
0x11a5   :  { %v7297_v41 = vpop.f32.mrb[194].mxu0 }
0x11a6   :  { %10125 = vmatpush3.msk.msra.mxu1 %vm5898_vm3, %v7297_v41  ;;  %v10123_v14 = vpop.f32.mrb[195].mxu0 }
0x11a7   :  { %10127 = vmatmul.mubr.msk.f32.vlgmr.msra.gmra.mrb[188].mxu1 %vm5891_vm4, %v7072_v32  ;;  %10134 = vmatprep.subr.mxu1 %v11273_v1 }
0x11a8   :  { %10136 = vmatprep.mubr.msk.f32.mxu1 %vm11272_vm2, %v11273_v1 }
0x11a9   :  { %v7447_v12 = vpop.f32.mrb[196].mxu0 }
0x11aa   :  { %v10133_v0 = vpop.f32.mrb[197].mxu0  ;;  %10135 = vmatpush3.msk.msra.mxu1 %vm5898_vm3, %v7447_v12 }
0x11ab   :  { %10137 = vmatmul.mubr.msk.f32.vlgmr.msra.gmra.mrb[190].mxu1 %vm5891_vm4, %v7072_v32  ;;  %10144 = vmatprep.subr.mxu1 %v11273_v1 }
0x11ac   :  { %10146 = vmatprep.mubr.msk.f32.mxu1 %vm11272_vm2, %v11273_v1 }
0x11ad   :  { %v7595_v15 = vpop.f32.mrb[198].mxu0 }
0x11ae   :  { %v10143_v57 = vpop.f32.mrb[199].mxu0  ;;  %10145 = vmatpush3.msk.msra.mxu1 %vm5898_vm3, %v7595_v15 }
0x11af   :  { %10147 = vmatmul.mubr.msk.f32.vlgmr.msra.gmra.mrb[192].mxu1 %vm5891_vm4, %v7072_v32  ;;  %10154 = vmatprep.subr.mxu1 %v11273_v1 }
0x11b0   :  { %10156 = vmatprep.mubr.msk.f32.mxu1 %vm11272_vm2, %v11273_v1  ;;  %vm7838_vm2 = vcmask 1041408  }
0x11b1   :  { %v7743_v16 = vpop.f32.mrb[200].mxu0 }
0x11b2   :  { %v10153_v13 = vpop.f32.mrb[201].mxu0  ;;  %10155 = vmatpush3.msk.msra.mxu1 %vm5898_vm3, %v7743_v16 }
0x11b3   :  { %10157 = vmatmul.mubr.msk.f32.vlgmr.msra.gmra.mrb[194].mxu1 %vm5891_vm4, %v7072_v32 }
0x1276   :  { %v7224_v28 = vpop.f32.mrb[186].mxu1 }
0x1277   :  { %v10118_v8 = vpop.f32.mrb[187].mxu1  ;;  %v7374_v56 = vmul.f32 %v7224_v28, %v7224_v28 }
0x127a   :  { %v7370_v31 = vpop.f32.mrb[188].mxu1 }
0x127b   :  { %v7375_v18 = vmul.f32 %v7370_v31, %v7370_v31  ;;  %v7376_v36 = vmul.f32 %v7370_v31, %v7224_v28  ;;  %v10128_v39 = vpop.f32.mrb[189].mxu1 }
0x127d   :  { %v7829_v63 = vadd.f32 %v7375_v18, %v7374_v56  ;;  %v7827_v9 = vmul.f32 2.0, %v7376_v36 }
0x127e   :  { %v7520_v40 = vpop.f32.mrb[190].mxu1 }
0x127f   :  { %v7830_v22 = vadd.f32 0.0001, %v7829_v63  ;;  %v7524_v55 = vsub.f32 %v7520_v40, %v7374_v56  ;;  %v10138_v44 = vpop.f32.mrb[191].mxu1  ;;  %v7828_v35 = vadd.f32 0.0001, %v7827_v9 }
0x1281   :  { %10759 = vrcp.f32 %v7830_v22 }
0x1282   :  { %v7668_v1 = vpop.f32.mrb[192].mxu1 }
0x1283   :  { %v7672_v43 = vsub.f32 %v7668_v1, %v7375_v18  ;;  %v10148_v58 = vpop.f32.mrb[193].mxu1 }
0x1285   :  { %v7823_v6 = vadd.f32 %v7672_v43, %v7524_v55 }
0x1286   :  { %v7816_v30 = vpop.f32.mrb[194].mxu1 }
0x1287   :  { %v7824_v4 = vadd.f32 0.0009, %v7823_v6  ;;  %v7820_v34 = vsub.f32 %v7816_v30, %v7376_v36  ;;  %v10158_v26 = vpop.f32.mrb[195].mxu1 }
0x1289   :  { %10761 = vrcp.f32 %v7824_v4  ;;  %v7821_v45 = vmul.f32 2.0, %v7820_v34 }
0x128b   :  { %v10760_v48 = vpop.eup %10759  ;;  %v7822_v21 = vadd.f32 0.0009, %v7821_v45 }
0x128c   :  { %v7832_v49 = vmul.f32 %v10760_v48, %v7828_v35 }
0x1293   :  { %v10762_v51 = vpop.eup %10761 }
0x1294   :  { %v7826_v27 = vmul.f32 %v10762_v51, %v7822_v21 }
0x1296   :  { %v7833_v50 = vmul.f32 %v7832_v49, %v7826_v27 }
0x1298   :  { %10160 = vmatpush3.msk.msra.mxu0 %vm7838_vm2, %v7833_v50 }
0x1299   :  { %10162 = vmatmul.mubr.msk.f32.vlgmr.msra.gmra.mrb[202].mxu0 %vm7834_vm10, %v7073_v47 }
0x136c   :  { %v7908_v3 = vpop.f32.mrb[202].mxu0 }
0x136d   :  { %v10163_v54 = vpop.f32.mrb[203].mxu0  ;;  %7914 = vrot.lane.b32.xlu1 %v7908_v3, %s11275_s13 }
0x13df   :  { %v7915_v25 = vpop.permute.xlu1 %7914 }
0x13e0   :  { %7918 = vst.msk [vmem:[%s13007_s25] sm:$0x3] %vm7917_vm11, %v7915_v25 }
0x13e1   :  { %7923 = vsyncpa [#allocation3], 1 }
0x13e2   :  { %7924 = vsyncpa [#allocation5], 1 }
0x13e3   :  { %7925 = vsyncpa [#allocation8], 1 }
0x13e4   :  { %7926 = vsyncpa [#allocation11], 1 }
0x13e5   :  { %7927 = vsyncpa [#allocation14], 1 }
0x13e6   :  { %7928 = vsyncpa [#allocation17], 1 }
0x13e7   :  { %7929 = vsyncpa [#allocation20], 1 }
0x13e8   :  { %7930 = vsyncpa [#allocation23], 1 }
0x13e9   :  { %7931 = vsyncpa [#allocation26], 1 }
0x13ea   :  { %7932 = vsyncpa [#allocation29], 1 }
0x13eb   :  { %7933 = vsyncpa [#allocation32], 1 }

</bundles_post_ra>
